<compile_context>
chip_gen: v7x
topology: tpu7x:2x2x1
jax: 0.10.0
libtpu: 0.0.40
codegen_flags: <defaults>
</compile_context>

<pallas_src>
import functools

import jax
import jax.numpy as jnp
from jax.experimental import pallas as pl
from jax.experimental.pallas import tpu as pltpu


def _bdot3(lhs, rhs, lhs_c, rhs_c):
    """Batched matmul over axis 0: contract lhs axis `lhs_c` with rhs axis
    `rhs_c`, f32 accumulation on the MXU."""
    dims = (((lhs_c,), (rhs_c,)), ((0,), (0,)))
    return jax.lax.dot_general(lhs, rhs, dims,
                               preferred_element_type=jnp.float32)


def _astgcn_block_kernel(x_ref, u1_ref, u2_ref, u3_ref, be_ref, ve_ref,
                         w1_ref, w2t_ref, w3_ref, bs_ref, vs_ref,
                         thkf_ref, cheb_ref, twT_ref, tb_ref, rwT_ref, rb_ref,
                         gamma_ref, beta_ref, out_ref):
    """One grid step == Bb batch elements.  x block: (Bb, T, F, N)."""
    Bb, T, F, N = x_ref.shape
    C, KF = thkf_ref.shape                 # Theta stacked: (C_cheb, K*F)
    K = cheb_ref.shape[0]
    Co = twT_ref.shape[1]                  # time-conv taps: (3, C_time, C_cheb)
    BT = Bb * T
    assert KF == K * F
    f32, bf16 = jnp.float32, jnp.bfloat16

    X = x_ref[...]                                        # (Bb, T, F, N) f32

    # ---------------- Temporal attention (torch softmax dim=1 -> axis 1) -----
    q = jnp.sum(X * u1_ref[...][None, None], axis=-1)     # (Bb, T, F)
    lhs_t = jnp.dot(q.reshape(BT, F), u2_ref[...],
                    preferred_element_type=f32).reshape(Bb, T, N)
    ru3 = jnp.sum(X * u3_ref[...][None, None], axis=2)    # (Bb, T, N)
    prod_t = _bdot3(lhs_t, ru3, 2, 2)                     # (Bb, T, T)
    sig_t = jax.nn.sigmoid(prod_t + be_ref[...][None])
    ve_b = jnp.broadcast_to(ve_ref[...][None], (Bb, T, T))
    e = _bdot3(ve_b, sig_t, 2, 1)                         # (Bb, T, T)
    e = jnp.exp(e - jnp.max(e, axis=1, keepdims=True))
    e_norm = e * pl.reciprocal(jnp.sum(e, axis=1, keepdims=True), approx=True)

    # ---------------- Spatial attention (x_TAt folded in analytically) -------
    w1e = jnp.sum(e_norm * w1_ref[...][None], axis=2)     # (Bb, T)
    p_fn = jnp.sum(X * w1e[:, :, None, None], axis=1)     # (Bb, F, N)
    w2t_b = jnp.broadcast_to(w2t_ref[...][None], (Bb, T, F))
    lhs_s = _bdot3(w2t_b, p_fn, 2, 1)                     # (Bb, T, N)
    rw3 = jnp.sum(X * w3_ref[...][None, None], axis=2)    # (Bb, T, N)
    rhs_s = _bdot3(e_norm, rw3, 1, 1)                     # (Bb, T, N)
    prod_s = _bdot3(lhs_s, rhs_s, 1, 1)                   # (Bb, N, N)
    sig_s = jax.nn.sigmoid(prod_s + bs_ref[...][None])
    vs_b = jnp.broadcast_to(vs_ref[...][None], (Bb, N, N))
    s = _bdot3(vs_b, sig_s, 2, 1)                         # (Bb, N, N)
    s = jnp.exp(s - jnp.max(s, axis=1, keepdims=True))
    s_norm = s * pl.reciprocal(jnp.sum(s, axis=1, keepdims=True), approx=True)

    # ---------------- Chebyshev graph conv: N-contraction first --------------
    # g_k[b,t,f,n] = sum_m x[b,t,f,m] * (cheb_k * S_norm[b])[m,n]   (K matmuls)
    # sg[b,t,c,n]  = relu( sum_{k,f} Theta[k,f,c] * g_k[b,t,f,n] )  (1 matmul)
    xb = X.astype(bf16).reshape(Bb, T * F, N)
    parts = []
    for k in range(K):                                    # K tiny (3); unrolled
        m_k = (cheb_ref[k].astype(f32)[None] * s_norm).astype(bf16)  # (Bb,N,N)
        gk = _bdot3(xb, m_k, 2, 1)                        # (Bb, T*F, N) f32
        parts.append(gk.astype(bf16).reshape(Bb, T, F, N))
    g = jnp.concatenate(parts, axis=2).reshape(BT, KF, N)   # rows = (t, (k,f))
    th_b = jnp.broadcast_to(thkf_ref[...][None], (BT, C, KF))
    sg = jnp.maximum(_bdot3(th_b, g, 2, 1), 0.0)          # (BT, C, N) f32
    sg_pad = jnp.concatenate(
        [jnp.zeros((Bb, 1, C, N), bf16),
         sg.astype(bf16).reshape(Bb, T, C, N),
         jnp.zeros((Bb, 1, C, N), bf16)], axis=1)         # (Bb, T+2, C, N)

    # ---------------- 1x3 time conv (pad 1, stride 1) + 1x1 residual conv ----
    rw_b = jnp.broadcast_to(rwT_ref[...][None], (BT, Co, F))
    acc = _bdot3(rw_b, X.reshape(BT, F, N), 2, 1)         # (BT, Co, N) f32
    for d in range(3):                                    # 3 shifted matmuls
        w_d = jnp.broadcast_to(twT_ref[d][None], (BT, Co, C))
        acc = acc + _bdot3(w_d, sg_pad[:, d:d + T].reshape(BT, C, N), 2, 1)
    y = jnp.maximum(acc + (tb_ref[...] + rb_ref[...])[None], 0.0)
    y = y.reshape(Bb, T, Co, N)

    # ---------------- LayerNorm over the time axis (axis 1 here) -------------
    mean = jnp.mean(y, axis=1, keepdims=True)
    var = jnp.mean(jnp.square(y - mean), axis=1, keepdims=True)
    inv = jax.lax.rsqrt(var + 1e-5)
    out_ref[...] = ((y - mean) * inv * gamma_ref[...][None, :, :, None]
                    + beta_ref[...][None, :, :, None])    # single block store


def _pick_block_batch(batch, num_vertices):
    """Samples per grid step: fill lanes / MXU rows, but keep >= 2 parallel
    grid steps (2 TensorCores on v7x) whenever the batch allows it."""
    cap = max(1, min(8, pl.cdiv(128, num_vertices)))
    if batch >= 2:
        cap = max(1, min(cap, batch // 2))
    cap = min(cap, batch)
    for bb in range(cap, 0, -1):
        if batch % bb == 0:
            return bb
    return 1


@jax.jit
def astgcn_block_pallas(x, p):
    B, N, F_, T = x.shape
    K, _, C = p["Theta"].shape
    Co = p["time_b"].shape[0]
    assert Co == T, "nn.LayerNorm(num_of_time_filters) requires num_of_time_filters == T"

    Bb = _pick_block_batch(B, N)
    G = B // Bb

    # TODO(synk): for stacked ASTGCN blocks keep the (B, T, F, N) layout
    # end-to-end (transpose once at model entry/exit) instead of per-block
    # wrapper transposes.
    x_tfn = jnp.transpose(x, (0, 3, 2, 1))                # (B, T, F, N): lanes = N

    # Heavy constants pre-cast to bf16 (half DMA / VMEM); stacked for fusion.
    thkf = jnp.transpose(p["Theta"], (2, 0, 1)).reshape(C, K * F_).astype(jnp.bfloat16)
    cheb_bf = p["cheb"].astype(jnp.bfloat16)              # (K, N, N)
    twT = jnp.transpose(p["time_w"], (0, 2, 1)).astype(jnp.bfloat16)  # (3, Co, C)
    rwT = p["res_w"].T                                    # (Co, F) f32

    args = (
        x_tfn,
        p["U1"].reshape(1, N),
        p["U2"],                                          # (F, N)
        p["U3"].reshape(F_, 1),
        p["b_e"], p["V_e"],
        p["W1"].reshape(1, T),
        p["W2"].T,                                        # (T, F)
        p["W3"].reshape(F_, 1),
        p["bs"], p["Vs"],
        thkf, cheb_bf,
        twT, p["time_b"].reshape(Co, 1),
        rwT, p["res_b"].reshape(Co, 1),
        p["ln_gamma"].reshape(T, 1), p["ln_beta"].reshape(T, 1),
    )

    def const_spec(a):
        nd = a.ndim
        return pl.BlockSpec(a.shape, lambda g, _nd=nd: (0,) * _nd)

    in_specs = [pl.BlockSpec((Bb, T, F_, N), lambda g: (g, 0, 0, 0))]
    in_specs += [const_spec(a) for a in args[1:]]

    out = pl.pallas_call(
        _astgcn_block_kernel,
        out_shape=jax.ShapeDtypeStruct((B, T, Co, N), jnp.float32),
        grid=(G,),
        in_specs=in_specs,
        out_specs=pl.BlockSpec((Bb, T, Co, N), lambda g: (g, 0, 0, 0)),
        compiler_params=pltpu.CompilerParams(
            dimension_semantics=("parallel",),
            # explicit scoped-VMEM budget; safe on v5e/v6e/v7x at these tiles
            vmem_limit_bytes=32 * 1024 * 1024),
    )(*args)
    return jnp.transpose(out, (0, 3, 2, 1))               # (B, N, C_time, T)


# ---------------------------------------------------------------------------
# Pure-JAX reference mirroring the PyTorch forward, for verification.
# ---------------------------------------------------------------------------
def astgcn_block_ref(x, p):
    HI = jax.lax.Precision.HIGHEST
    ein = functools.partial(jnp.einsum, precision=HI)
    B, N, F_, T = x.shape
    K, _, C_cheb = p["Theta"].shape
    C_time = p["time_b"].shape[0]
    # Temporal attention
    lhs = ein("bnft,n->btf", x, p["U1"])
    lhs = ein("btf,fn->btn", lhs, p["U2"])
    rhs = ein("f,bnft->bnt", p["U3"], x)
    product = ein("btn,bns->bts", lhs, rhs)
    E = ein("ts,bsu->btu", p["V_e"], jax.nn.sigmoid(product + p["b_e"][None]))
    E_norm = jax.nn.softmax(E, axis=1)
    x_tat = ein("bnfs,bst->bnft", x, E_norm)
    # Spatial attention
    lhs_s = ein("bnft,t->bnf", x_tat, p["W1"])
    lhs_s = ein("bnf,ft->bnt", lhs_s, p["W2"])
    rhs_s = ein("f,bnft->bnt", p["W3"], x_tat)
    prod_s = ein("bnt,bmt->bnm", lhs_s, rhs_s)
    S = ein("nm,bmo->bno", p["Vs"], jax.nn.sigmoid(prod_s + p["bs"][None]))
    S_norm = jax.nn.softmax(S, axis=1)
    # Chebyshev graph conv
    out = jnp.zeros((B, N, C_cheb, T), jnp.float32)
    for k in range(K):
        Tk_at = p["cheb"][k][None] * S_norm
        rhs_k = ein("bmn,bmft->bnft", Tk_at, x)
        out = out + ein("bnft,fc->bnct", rhs_k, p["Theta"][k])
    sg = jax.nn.relu(out)
    # time conv (1x3, pad 1, stride 1)
    sg_pad = jnp.pad(sg, ((0, 0), (0, 0), (0, 0), (1, 1)))
    tc = jnp.zeros((B, N, C_time, T), jnp.float32)
    for d in range(3):
        tc = tc + ein("bnct,co->bnot", sg_pad[..., d:d + T], p["time_w"][d])
    tc = tc + p["time_b"][None, None, :, None]
    res = ein("bnft,fo->bnot", x, p["res_w"]) + p["res_b"][None, None, :, None]
    y = jax.nn.relu(tc + res)
    mean = jnp.mean(y, axis=-1, keepdims=True)
    var = jnp.mean((y - mean) ** 2, axis=-1, keepdims=True)
    return (y - mean) / jnp.sqrt(var + 1e-5) * p["ln_gamma"] + p["ln_beta"]


def make_cheb_polynomials(key, N, K):
    A = jax.random.uniform(key, (N, N), jnp.float32)
    A = (A + A.T) * 0.5 * (1.0 - jnp.eye(N, dtype=jnp.float32))
    d = jnp.sum(A, axis=1)
    L = jnp.eye(N, dtype=jnp.float32) - A / jnp.sqrt(d[:, None] * d[None, :])
    Lt = L - jnp.eye(N, dtype=jnp.float32)     # ~ 2L/lambda_max - I, lambda_max ~ 2
    polys = [jnp.eye(N, dtype=jnp.float32), Lt]
    while len(polys) < K:
        polys.append(2.0 * Lt @ polys[-1] - polys[-2])
    return jnp.stack(polys[:K])


if __name__ == "__main__":
    B, N, F_IN, T = 4, 16, 4, 8
    K, C_CHEB, C_TIME = 3, 16, 8      # C_TIME == T (required by the PyTorch LN usage)

    key = jax.random.PRNGKey(0)
    ks = jax.random.split(key, 24)

    def rnd(k, shape, s=0.1):
        return s * jax.random.normal(k, shape, jnp.float32)

    def unif(k, shape):
        return jax.random.uniform(k, shape, jnp.float32)

    def xavier(k, shape, fan_in, fan_out):
        a = (6.0 / (fan_in + fan_out)) ** 0.5
        return jax.random.uniform(k, shape, jnp.float32, -a, a)

    x = jax.random.normal(ks[0], (B, N, F_IN, T), jnp.float32)

    params = dict(
        U1=rnd(ks[1], (N,)), U2=rnd(ks[2], (F_IN, N)), U3=rnd(ks[3], (F_IN,)),
        b_e=rnd(ks[4], (T, T)), V_e=rnd(ks[5], (T, T)),
        W1=rnd(ks[6], (T,)), W2=rnd(ks[7], (F_IN, T)), W3=rnd(ks[8], (F_IN,)),
        bs=rnd(ks[9], (N, N)), Vs=rnd(ks[10], (N, N)),
        Theta=xavier(ks[11], (K, F_IN, C_CHEB), F_IN, C_CHEB),
        cheb=make_cheb_polynomials(ks[12], N, K),
        time_w=xavier(ks[13], (3, C_CHEB, C_TIME), 3 * C_CHEB, C_TIME),
        time_b=unif(ks[14], (C_TIME,)),
        res_w=xavier(ks[15], (F_IN, C_TIME), F_IN, C_TIME),
        res_b=unif(ks[16], (C_TIME,)),
        ln_gamma=unif(ks[17], (T,)),
        ln_beta=unif(ks[18], (T,)),
    )

    out = astgcn_block_pallas(x, params)
    out = jax.block_until_ready(out)

    ref = astgcn_block_ref(x, params)
    assert out.shape == (B, N, C_TIME, T)
    err = float(jnp.max(jnp.abs(out - ref)))
    assert jnp.all(jnp.isfinite(out)), "non-finite output"
    assert err < 5e-2, f"max abs err vs reference: {err}"

    print("KERNEL_OK")
</pallas_src>

<mosaic_0001>
module attributes {stable_mosaic.version = 11 : i64} {
  func.func @_astgcn_block_kernel(%arg0: i32, %arg1: memref<2x8x4x16xf32, #tpu.memory_space<vmem>>, %arg2: memref<1x16xf32, #tpu.memory_space<vmem>>, %arg3: memref<4x16xf32, #tpu.memory_space<vmem>>, %arg4: memref<4x1xf32, #tpu.memory_space<vmem>>, %arg5: memref<8x8xf32, #tpu.memory_space<vmem>>, %arg6: memref<8x8xf32, #tpu.memory_space<vmem>>, %arg7: memref<1x8xf32, #tpu.memory_space<vmem>>, %arg8: memref<8x4xf32, #tpu.memory_space<vmem>>, %arg9: memref<4x1xf32, #tpu.memory_space<vmem>>, %arg10: memref<16x16xf32, #tpu.memory_space<vmem>>, %arg11: memref<16x16xf32, #tpu.memory_space<vmem>>, %arg12: memref<16x12xbf16, #tpu.memory_space<vmem>>, %arg13: memref<3x16x16xbf16, #tpu.memory_space<vmem>>, %arg14: memref<3x8x16xbf16, #tpu.memory_space<vmem>>, %arg15: memref<8x1xf32, #tpu.memory_space<vmem>>, %arg16: memref<8x4xf32, #tpu.memory_space<vmem>>, %arg17: memref<8x1xf32, #tpu.memory_space<vmem>>, %arg18: memref<8x1xf32, #tpu.memory_space<vmem>>, %arg19: memref<8x1xf32, #tpu.memory_space<vmem>>, %arg20: memref<2x8x8x16xf32, #tpu.memory_space<vmem>>) attributes {dimension_semantics = [#tpu.dimension_semantics<parallel>], iteration_bounds = array<i64: 2>, scalar_prefetch = 0 : i64, scratch_operands = 0 : i64, tpu.core_type = #tpu.core_type<tc>, window_params = [{transform_indices = @transform_0, window_bounds = array<i64: 2, 8, 4, 16>}, {pipeline_mode = #tpu.pipeline_mode<synchronous>, transform_indices = @transform_1, window_bounds = array<i64: 1, 16>}, {pipeline_mode = #tpu.pipeline_mode<synchronous>, transform_indices = @transform_2, window_bounds = array<i64: 4, 16>}, {pipeline_mode = #tpu.pipeline_mode<synchronous>, transform_indices = @transform_3, window_bounds = array<i64: 4, 1>}, {pipeline_mode = #tpu.pipeline_mode<synchronous>, transform_indices = @transform_4, window_bounds = array<i64: 8, 8>}, {pipeline_mode = #tpu.pipeline_mode<synchronous>, transform_indices = @transform_5, window_bounds = array<i64: 8, 8>}, {pipeline_mode = #tpu.pipeline_mode<synchronous>, transform_indices = @transform_6, window_bounds = array<i64: 1, 8>}, {pipeline_mode = #tpu.pipeline_mode<synchronous>, transform_indices = @transform_7, window_bounds = array<i64: 8, 4>}, {pipeline_mode = #tpu.pipeline_mode<synchronous>, transform_indices = @transform_8, window_bounds = array<i64: 4, 1>}, {pipeline_mode = #tpu.pipeline_mode<synchronous>, transform_indices = @transform_9, window_bounds = array<i64: 16, 16>}, {pipeline_mode = #tpu.pipeline_mode<synchronous>, transform_indices = @transform_10, window_bounds = array<i64: 16, 16>}, {pipeline_mode = #tpu.pipeline_mode<synchronous>, transform_indices = @transform_11, window_bounds = array<i64: 16, 12>}, {pipeline_mode = #tpu.pipeline_mode<synchronous>, transform_indices = @transform_12, window_bounds = array<i64: 3, 16, 16>}, {pipeline_mode = #tpu.pipeline_mode<synchronous>, transform_indices = @transform_13, window_bounds = array<i64: 3, 8, 16>}, {pipeline_mode = #tpu.pipeline_mode<synchronous>, transform_indices = @transform_14, window_bounds = array<i64: 8, 1>}, {pipeline_mode = #tpu.pipeline_mode<synchronous>, transform_indices = @transform_15, window_bounds = array<i64: 8, 4>}, {pipeline_mode = #tpu.pipeline_mode<synchronous>, transform_indices = @transform_16, window_bounds = array<i64: 8, 1>}, {pipeline_mode = #tpu.pipeline_mode<synchronous>, transform_indices = @transform_17, window_bounds = array<i64: 8, 1>}, {pipeline_mode = #tpu.pipeline_mode<synchronous>, transform_indices = @transform_18, window_bounds = array<i64: 8, 1>}, {transform_indices = @transform_19, window_bounds = array<i64: 2, 8, 8, 16>}]} {
    %c0 = arith.constant 0 : index
    %c0_0 = arith.constant 0 : index
    %c0_1 = arith.constant 0 : index
    %c0_2 = arith.constant 0 : index
    %0 = vector.load %arg1[%c0, %c0_0, %c0_1, %c0_2] : memref<2x8x4x16xf32, #tpu.memory_space<vmem>>, vector<2x8x4x16xf32>
    %c0_3 = arith.constant 0 : index
    %c0_4 = arith.constant 0 : index
    %1 = vector.load %arg2[%c0_3, %c0_4] : memref<1x16xf32, #tpu.memory_space<vmem>>, vector<1x16xf32>
    %2 = vector.shape_cast %1 : vector<1x16xf32> to vector<1x1x1x16xf32>
    %3 = vector.broadcast %2 : vector<1x1x1x16xf32> to vector<2x8x4x16xf32>
    %4 = arith.mulf %0, %3 : vector<2x8x4x16xf32>
    %cst = arith.constant dense<0.000000e+00> : vector<2x8x4xf32>
    %5 = vector.multi_reduction <add>, %4, %cst [3] : vector<2x8x4x16xf32> to vector<2x8x4xf32>
    %6 = vector.shape_cast %5 : vector<2x8x4xf32> to vector<16x4xf32>
    %c0_5 = arith.constant 0 : index
    %c0_6 = arith.constant 0 : index
    %7 = vector.load %arg3[%c0_5, %c0_6] : memref<4x16xf32, #tpu.memory_space<vmem>>, vector<4x16xf32>
    %cst_7 = arith.constant dense<0.000000e+00> : vector<16x16xf32>
    %8 = tpu.matmul %6, %7, %cst_7 {dimension_numbers = #tpu.dot_dimension_numbers<[1], [0], [0], [1], [0, 0, 1, 1], [], []>} : vector<16x4xf32>, vector<4x16xf32>, vector<16x16xf32> -> vector<16x16xf32>
    %9 = vector.shape_cast %8 : vector<16x16xf32> to vector<2x8x16xf32>
    %c0_8 = arith.constant 0 : index
    %c0_9 = arith.constant 0 : index
    %10 = vector.load %arg4[%c0_8, %c0_9] : memref<4x1xf32, #tpu.memory_space<vmem>>, vector<4x1xf32>
    %11 = vector.shape_cast %10 : vector<4x1xf32> to vector<1x1x4x1xf32>
    %12 = vector.broadcast %11 : vector<1x1x4x1xf32> to vector<2x8x4x16xf32>
    %13 = arith.mulf %0, %12 : vector<2x8x4x16xf32>
    %cst_10 = arith.constant dense<0.000000e+00> : vector<2x8x16xf32>
    %14 = vector.multi_reduction <add>, %13, %cst_10 [2] : vector<2x8x4x16xf32> to vector<2x8x16xf32>
    %cst_11 = arith.constant dense<0.000000e+00> : vector<2x8x8xf32>
    %15 = tpu.matmul %9, %14, %cst_11 {dimension_numbers = #tpu.dot_dimension_numbers<[2], [2], [1], [1], [0, 0, 0, 1, 1, 1], [0], [0]>} : vector<2x8x16xf32>, vector<2x8x16xf32>, vector<2x8x8xf32> -> vector<2x8x8xf32>
    %c0_12 = arith.constant 0 : index
    %c0_13 = arith.constant 0 : index
    %16 = vector.load %arg5[%c0_12, %c0_13] : memref<8x8xf32, #tpu.memory_space<vmem>>, vector<8x8xf32>
    %17 = vector.shape_cast %16 : vector<8x8xf32> to vector<1x8x8xf32>
    %18 = vector.broadcast %17 : vector<1x8x8xf32> to vector<2x8x8xf32>
    %19 = arith.addf %15, %18 : vector<2x8x8xf32>
    %20 = arith.negf %19 : vector<2x8x8xf32>
    %21 = math.exp %20 : vector<2x8x8xf32>
    %cst_14 = arith.constant 1.000000e+00 : f32
    %22 = vector.broadcast %cst_14 : f32 to vector<2x8x8xf32>
    %23 = arith.addf %22, %21 : vector<2x8x8xf32>
    %24 = arith.divf %22, %23 : vector<2x8x8xf32>
    %c0_15 = arith.constant 0 : index
    %c0_16 = arith.constant 0 : index
    %25 = vector.load %arg6[%c0_15, %c0_16] : memref<8x8xf32, #tpu.memory_space<vmem>>, vector<8x8xf32>
    %26 = vector.shape_cast %25 : vector<8x8xf32> to vector<1x8x8xf32>
    %27 = vector.shape_cast %26 : vector<1x8x8xf32> to vector<1x8x8xf32>
    %28 = vector.broadcast %27 : vector<1x8x8xf32> to vector<2x8x8xf32>
    %cst_17 = arith.constant dense<0.000000e+00> : vector<2x8x8xf32>
    %29 = tpu.matmul %28, %24, %cst_17 {dimension_numbers = #tpu.dot_dimension_numbers<[2], [1], [1], [2], [0, 0, 0, 1, 1, 2], [0], [0]>} : vector<2x8x8xf32>, vector<2x8x8xf32>, vector<2x8x8xf32> -> vector<2x8x8xf32>
    %cst_18 = arith.constant dense<0xFF800000> : vector<2x8xf32>
    %30 = vector.multi_reduction <maximumf>, %29, %cst_18 [1] : vector<2x8x8xf32> to vector<2x8xf32>
    %31 = vector.shape_cast %30 : vector<2x8xf32> to vector<2x1x8xf32>
    %32 = vector.broadcast %31 : vector<2x1x8xf32> to vector<2x8x8xf32>
    %33 = arith.subf %29, %32 : vector<2x8x8xf32>
    %34 = math.exp %33 : vector<2x8x8xf32>
    %cst_19 = arith.constant dense<0.000000e+00> : vector<2x8xf32>
    %35 = vector.multi_reduction <add>, %34, %cst_19 [1] : vector<2x8x8xf32> to vector<2x8xf32>
    %36 = vector.shape_cast %35 : vector<2x8xf32> to vector<2x1x8xf32>
    %37 = tpu.reciprocal %36 {approx = true} : vector<2x1x8xf32> -> vector<2x1x8xf32>
    %38 = vector.broadcast %37 : vector<2x1x8xf32> to vector<2x8x8xf32>
    %39 = arith.mulf %34, %38 : vector<2x8x8xf32>
    %c0_20 = arith.constant 0 : index
    %c0_21 = arith.constant 0 : index
    %40 = vector.load %arg7[%c0_20, %c0_21] : memref<1x8xf32, #tpu.memory_space<vmem>>, vector<1x8xf32>
    %41 = vector.shape_cast %40 : vector<1x8xf32> to vector<1x1x8xf32>
    %42 = vector.broadcast %41 : vector<1x1x8xf32> to vector<2x8x8xf32>
    %43 = arith.mulf %39, %42 : vector<2x8x8xf32>
    %cst_22 = arith.constant dense<0.000000e+00> : vector<2x8xf32>
    %44 = vector.multi_reduction <add>, %43, %cst_22 [2] : vector<2x8x8xf32> to vector<2x8xf32>
    %45 = vector.shape_cast %44 : vector<2x8xf32> to vector<2x8x1x1xf32>
    %46 = vector.broadcast %45 : vector<2x8x1x1xf32> to vector<2x8x4x16xf32>
    %47 = arith.mulf %0, %46 : vector<2x8x4x16xf32>
    %cst_23 = arith.constant dense<0.000000e+00> : vector<2x4x16xf32>
    %48 = vector.multi_reduction <add>, %47, %cst_23 [1] : vector<2x8x4x16xf32> to vector<2x4x16xf32>
    %c0_24 = arith.constant 0 : index
    %c0_25 = arith.constant 0 : index
    %49 = vector.load %arg8[%c0_24, %c0_25] : memref<8x4xf32, #tpu.memory_space<vmem>>, vector<8x4xf32>
    %50 = vector.shape_cast %49 : vector<8x4xf32> to vector<1x8x4xf32>
    %51 = vector.shape_cast %50 : vector<1x8x4xf32> to vector<1x8x4xf32>
    %52 = vector.broadcast %51 : vector<1x8x4xf32> to vector<2x8x4xf32>
    %cst_26 = arith.constant dense<0.000000e+00> : vector<2x8x16xf32>
    %53 = tpu.matmul %52, %48, %cst_26 {dimension_numbers = #tpu.dot_dimension_numbers<[2], [1], [1], [2], [0, 0, 0, 1, 1, 2], [0], [0]>} : vector<2x8x4xf32>, vector<2x4x16xf32>, vector<2x8x16xf32> -> vector<2x8x16xf32>
    %c0_27 = arith.constant 0 : index
    %c0_28 = arith.constant 0 : index
    %54 = vector.load %arg9[%c0_27, %c0_28] : memref<4x1xf32, #tpu.memory_space<vmem>>, vector<4x1xf32>
    %55 = vector.shape_cast %54 : vector<4x1xf32> to vector<1x1x4x1xf32>
    %56 = vector.broadcast %55 : vector<1x1x4x1xf32> to vector<2x8x4x16xf32>
    %57 = arith.mulf %0, %56 : vector<2x8x4x16xf32>
    %cst_29 = arith.constant dense<0.000000e+00> : vector<2x8x16xf32>
    %58 = vector.multi_reduction <add>, %57, %cst_29 [2] : vector<2x8x4x16xf32> to vector<2x8x16xf32>
    %cst_30 = arith.constant dense<0.000000e+00> : vector<2x8x16xf32>
    %59 = tpu.matmul %39, %58, %cst_30 {dimension_numbers = #tpu.dot_dimension_numbers<[1], [1], [2], [2], [0, 0, 0, 2, 1, 2], [0], [0]>} : vector<2x8x8xf32>, vector<2x8x16xf32>, vector<2x8x16xf32> -> vector<2x8x16xf32>
    %cst_31 = arith.constant dense<0.000000e+00> : vector<2x16x16xf32>
    %60 = tpu.matmul %53, %59, %cst_31 {dimension_numbers = #tpu.dot_dimension_numbers<[1], [1], [2], [2], [0, 0, 0, 2, 1, 2], [0], [0]>} : vector<2x8x16xf32>, vector<2x8x16xf32>, vector<2x16x16xf32> -> vector<2x16x16xf32>
    %c0_32 = arith.constant 0 : index
    %c0_33 = arith.constant 0 : index
    %61 = vector.load %arg10[%c0_32, %c0_33] : memref<16x16xf32, #tpu.memory_space<vmem>>, vector<16x16xf32>
    %62 = vector.shape_cast %61 : vector<16x16xf32> to vector<1x16x16xf32>
    %63 = vector.broadcast %62 : vector<1x16x16xf32> to vector<2x16x16xf32>
    %64 = arith.addf %60, %63 : vector<2x16x16xf32>
    %65 = arith.negf %64 : vector<2x16x16xf32>
    %66 = math.exp %65 : vector<2x16x16xf32>
    %cst_34 = arith.constant 1.000000e+00 : f32
    %67 = vector.broadcast %cst_34 : f32 to vector<2x16x16xf32>
    %68 = arith.addf %67, %66 : vector<2x16x16xf32>
    %69 = arith.divf %67, %68 : vector<2x16x16xf32>
    %c0_35 = arith.constant 0 : index
    %c0_36 = arith.constant 0 : index
    %70 = vector.load %arg11[%c0_35, %c0_36] : memref<16x16xf32, #tpu.memory_space<vmem>>, vector<16x16xf32>
    %71 = vector.shape_cast %70 : vector<16x16xf32> to vector<1x16x16xf32>
    %72 = vector.shape_cast %71 : vector<1x16x16xf32> to vector<1x16x16xf32>
    %73 = vector.broadcast %72 : vector<1x16x16xf32> to vector<2x16x16xf32>
    %cst_37 = arith.constant dense<0.000000e+00> : vector<2x16x16xf32>
    %74 = tpu.matmul %73, %69, %cst_37 {dimension_numbers = #tpu.dot_dimension_numbers<[2], [1], [1], [2], [0, 0, 0, 1, 1, 2], [0], [0]>} : vector<2x16x16xf32>, vector<2x16x16xf32>, vector<2x16x16xf32> -> vector<2x16x16xf32>
    %cst_38 = arith.constant dense<0xFF800000> : vector<2x16xf32>
    %75 = vector.multi_reduction <maximumf>, %74, %cst_38 [1] : vector<2x16x16xf32> to vector<2x16xf32>
    %76 = vector.shape_cast %75 : vector<2x16xf32> to vector<2x1x16xf32>
    %77 = vector.broadcast %76 : vector<2x1x16xf32> to vector<2x16x16xf32>
    %78 = arith.subf %74, %77 : vector<2x16x16xf32>
    %79 = math.exp %78 : vector<2x16x16xf32>
    %cst_39 = arith.constant dense<0.000000e+00> : vector<2x16xf32>
    %80 = vector.multi_reduction <add>, %79, %cst_39 [1] : vector<2x16x16xf32> to vector<2x16xf32>
    %81 = vector.shape_cast %80 : vector<2x16xf32> to vector<2x1x16xf32>
    %82 = tpu.reciprocal %81 {approx = true} : vector<2x1x16xf32> -> vector<2x1x16xf32>
    %83 = vector.broadcast %82 : vector<2x1x16xf32> to vector<2x16x16xf32>
    %84 = arith.mulf %79, %83 : vector<2x16x16xf32>
    %85 = arith.truncf %0 : vector<2x8x4x16xf32> to vector<2x8x4x16xbf16>
    %86 = vector.shape_cast %85 : vector<2x8x4x16xbf16> to vector<2x32x16xbf16>
    %c0_40 = arith.constant 0 : index
    %c0_41 = arith.constant 0 : index
    %c0_42 = arith.constant 0 : index
    %87 = vector.load %arg13[%c0_40, %c0_41, %c0_42] : memref<3x16x16xbf16, #tpu.memory_space<vmem>>, vector<1x16x16xbf16>
    %88 = vector.shape_cast %87 : vector<1x16x16xbf16> to vector<16x16xbf16>
    %89 = arith.extf %88 : vector<16x16xbf16> to vector<16x16xf32>
    %90 = vector.shape_cast %89 : vector<16x16xf32> to vector<1x16x16xf32>
    %91 = vector.broadcast %90 : vector<1x16x16xf32> to vector<2x16x16xf32>
    %92 = arith.mulf %91, %84 : vector<2x16x16xf32>
    %93 = arith.truncf %92 : vector<2x16x16xf32> to vector<2x16x16xbf16>
    %cst_43 = arith.constant dense<0.000000e+00> : vector<2x32x16xf32>
    %94 = tpu.matmul %86, %93, %cst_43 {dimension_numbers = #tpu.dot_dimension_numbers<[2], [1], [1], [2], [0, 0, 0, 1, 1, 2], [0], [0]>} : vector<2x32x16xbf16>, vector<2x16x16xbf16>, vector<2x32x16xf32> -> vector<2x32x16xf32>
    %95 = arith.truncf %94 : vector<2x32x16xf32> to vector<2x32x16xbf16>
    %96 = vector.shape_cast %95 : vector<2x32x16xbf16> to vector<2x8x4x16xbf16>
    %c1 = arith.constant 1 : index
    %c0_44 = arith.constant 0 : index
    %c0_45 = arith.constant 0 : index
    %97 = vector.load %arg13[%c1, %c0_44, %c0_45] : memref<3x16x16xbf16, #tpu.memory_space<vmem>>, vector<1x16x16xbf16>
    %98 = vector.shape_cast %97 : vector<1x16x16xbf16> to vector<16x16xbf16>
    %99 = arith.extf %98 : vector<16x16xbf16> to vector<16x16xf32>
    %100 = vector.shape_cast %99 : vector<16x16xf32> to vector<1x16x16xf32>
    %101 = vector.broadcast %100 : vector<1x16x16xf32> to vector<2x16x16xf32>
    %102 = arith.mulf %101, %84 : vector<2x16x16xf32>
    %103 = arith.truncf %102 : vector<2x16x16xf32> to vector<2x16x16xbf16>
    %cst_46 = arith.constant dense<0.000000e+00> : vector<2x32x16xf32>
    %104 = tpu.matmul %86, %103, %cst_46 {dimension_numbers = #tpu.dot_dimension_numbers<[2], [1], [1], [2], [0, 0, 0, 1, 1, 2], [0], [0]>} : vector<2x32x16xbf16>, vector<2x16x16xbf16>, vector<2x32x16xf32> -> vector<2x32x16xf32>
    %105 = arith.truncf %104 : vector<2x32x16xf32> to vector<2x32x16xbf16>
    %106 = vector.shape_cast %105 : vector<2x32x16xbf16> to vector<2x8x4x16xbf16>
    %c2 = arith.constant 2 : index
    %c0_47 = arith.constant 0 : index
    %c0_48 = arith.constant 0 : index
    %107 = vector.load %arg13[%c2, %c0_47, %c0_48] : memref<3x16x16xbf16, #tpu.memory_space<vmem>>, vector<1x16x16xbf16>
    %108 = vector.shape_cast %107 : vector<1x16x16xbf16> to vector<16x16xbf16>
    %109 = arith.extf %108 : vector<16x16xbf16> to vector<16x16xf32>
    %110 = vector.shape_cast %109 : vector<16x16xf32> to vector<1x16x16xf32>
    %111 = vector.broadcast %110 : vector<1x16x16xf32> to vector<2x16x16xf32>
    %112 = arith.mulf %111, %84 : vector<2x16x16xf32>
    %113 = arith.truncf %112 : vector<2x16x16xf32> to vector<2x16x16xbf16>
    %cst_49 = arith.constant dense<0.000000e+00> : vector<2x32x16xf32>
    %114 = tpu.matmul %86, %113, %cst_49 {dimension_numbers = #tpu.dot_dimension_numbers<[2], [1], [1], [2], [0, 0, 0, 1, 1, 2], [0], [0]>} : vector<2x32x16xbf16>, vector<2x16x16xbf16>, vector<2x32x16xf32> -> vector<2x32x16xf32>
    %115 = arith.truncf %114 : vector<2x32x16xf32> to vector<2x32x16xbf16>
    %116 = vector.shape_cast %115 : vector<2x32x16xbf16> to vector<2x8x4x16xbf16>
    %117 = tpu.concatenate %96, %106, %116 in 2 : vector<2x8x4x16xbf16>, vector<2x8x4x16xbf16>, vector<2x8x4x16xbf16> -> vector<2x8x12x16xbf16>
    %118 = vector.shape_cast %117 : vector<2x8x12x16xbf16> to vector<16x12x16xbf16>
    %c0_50 = arith.constant 0 : index
    %c0_51 = arith.constant 0 : index
    %119 = vector.load %arg12[%c0_50, %c0_51] : memref<16x12xbf16, #tpu.memory_space<vmem>>, vector<16x12xbf16>
    %120 = vector.shape_cast %119 : vector<16x12xbf16> to vector<1x16x12xbf16>
    %121 = vector.shape_cast %120 : vector<1x16x12xbf16> to vector<1x16x12xbf16>
    %122 = vector.broadcast %121 : vector<1x16x12xbf16> to vector<16x16x12xbf16>
    %cst_52 = arith.constant dense<0.000000e+00> : vector<16x16x16xf32>
    %123 = tpu.matmul %122, %118, %cst_52 {dimension_numbers = #tpu.dot_dimension_numbers<[2], [1], [1], [2], [0, 0, 0, 1, 1, 2], [0], [0]>} : vector<16x16x12xbf16>, vector<16x12x16xbf16>, vector<16x16x16xf32> -> vector<16x16x16xf32>
    %cst_53 = arith.constant 0.000000e+00 : f32
    %124 = vector.broadcast %cst_53 : f32 to vector<16x16x16xf32>
    %125 = arith.maximumf %123, %124 : vector<16x16x16xf32>
    %cst_54 = arith.constant 0.000000e+00 : bf16
    %126 = vector.broadcast %cst_54 : bf16 to vector<2x1x16x16xbf16>
    %127 = arith.truncf %125 : vector<16x16x16xf32> to vector<16x16x16xbf16>
    %128 = vector.shape_cast %127 : vector<16x16x16xbf16> to vector<2x8x16x16xbf16>
    %cst_55 = arith.constant 0.000000e+00 : bf16
    %129 = vector.broadcast %cst_55 : bf16 to vector<2x1x16x16xbf16>
    %130 = tpu.concatenate %126, %128, %129 in 1 : vector<2x1x16x16xbf16>, vector<2x8x16x16xbf16>, vector<2x1x16x16xbf16> -> vector<2x10x16x16xbf16>
    %c0_56 = arith.constant 0 : index
    %c0_57 = arith.constant 0 : index
    %131 = vector.load %arg16[%c0_56, %c0_57] : memref<8x4xf32, #tpu.memory_space<vmem>>, vector<8x4xf32>
    %132 = vector.shape_cast %131 : vector<8x4xf32> to vector<1x8x4xf32>
    %133 = vector.shape_cast %132 : vector<1x8x4xf32> to vector<1x8x4xf32>
    %134 = vector.broadcast %133 : vector<1x8x4xf32> to vector<16x8x4xf32>
    %135 = vector.shape_cast %0 : vector<2x8x4x16xf32> to vector<16x4x16xf32>
    %cst_58 = arith.constant dense<0.000000e+00> : vector<16x8x16xf32>
    %136 = tpu.matmul %134, %135, %cst_58 {dimension_numbers = #tpu.dot_dimension_numbers<[2], [1], [1], [2], [0, 0, 0, 1, 1, 2], [0], [0]>} : vector<16x8x4xf32>, vector<16x4x16xf32>, vector<16x8x16xf32> -> vector<16x8x16xf32>
    %c0_59 = arith.constant 0 : index
    %c0_60 = arith.constant 0 : index
    %c0_61 = arith.constant 0 : index
    %137 = vector.load %arg14[%c0_59, %c0_60, %c0_61] : memref<3x8x16xbf16, #tpu.memory_space<vmem>>, vector<1x8x16xbf16>
    %138 = vector.shape_cast %137 : vector<1x8x16xbf16> to vector<8x16xbf16>
    %139 = vector.shape_cast %138 : vector<8x16xbf16> to vector<1x8x16xbf16>
    %140 = vector.shape_cast %139 : vector<1x8x16xbf16> to vector<1x8x16xbf16>
    %141 = vector.broadcast %140 : vector<1x8x16xbf16> to vector<16x8x16xbf16>
    %142 = vector.extract_strided_slice %130 {offsets = [0, 0, 0, 0], sizes = [2, 8, 16, 16], strides = [1, 1, 1, 1]} : vector<2x10x16x16xbf16> to vector<2x8x16x16xbf16>
    %143 = vector.shape_cast %142 : vector<2x8x16x16xbf16> to vector<16x16x16xbf16>
    %cst_62 = arith.constant dense<0.000000e+00> : vector<16x8x16xf32>
    %144 = tpu.matmul %141, %143, %cst_62 {dimension_numbers = #tpu.dot_dimension_numbers<[2], [1], [1], [2], [0, 0, 0, 1, 1, 2], [0], [0]>} : vector<16x8x16xbf16>, vector<16x16x16xbf16>, vector<16x8x16xf32> -> vector<16x8x16xf32>
    %145 = arith.addf %136, %144 : vector<16x8x16xf32>
    %c1_63 = arith.constant 1 : index
    %c0_64 = arith.constant 0 : index
    %c0_65 = arith.constant 0 : index
    %146 = vector.load %arg14[%c1_63, %c0_64, %c0_65] : memref<3x8x16xbf16, #tpu.memory_space<vmem>>, vector<1x8x16xbf16>
    %147 = vector.shape_cast %146 : vector<1x8x16xbf16> to vector<8x16xbf16>
    %148 = vector.shape_cast %147 : vector<8x16xbf16> to vector<1x8x16xbf16>
    %149 = vector.shape_cast %148 : vector<1x8x16xbf16> to vector<1x8x16xbf16>
    %150 = vector.broadcast %149 : vector<1x8x16xbf16> to vector<16x8x16xbf16>
    %151 = vector.extract_strided_slice %130 {offsets = [0, 1, 0, 0], sizes = [2, 8, 16, 16], strides = [1, 1, 1, 1]} : vector<2x10x16x16xbf16> to vector<2x8x16x16xbf16>
    %152 = vector.shape_cast %151 : vector<2x8x16x16xbf16> to vector<16x16x16xbf16>
    %cst_66 = arith.constant dense<0.000000e+00> : vector<16x8x16xf32>
    %153 = tpu.matmul %150, %152, %cst_66 {dimension_numbers = #tpu.dot_dimension_numbers<[2], [1], [1], [2], [0, 0, 0, 1, 1, 2], [0], [0]>} : vector<16x8x16xbf16>, vector<16x16x16xbf16>, vector<16x8x16xf32> -> vector<16x8x16xf32>
    %154 = arith.addf %145, %153 : vector<16x8x16xf32>
    %c2_67 = arith.constant 2 : index
    %c0_68 = arith.constant 0 : index
    %c0_69 = arith.constant 0 : index
    %155 = vector.load %arg14[%c2_67, %c0_68, %c0_69] : memref<3x8x16xbf16, #tpu.memory_space<vmem>>, vector<1x8x16xbf16>
    %156 = vector.shape_cast %155 : vector<1x8x16xbf16> to vector<8x16xbf16>
    %157 = vector.shape_cast %156 : vector<8x16xbf16> to vector<1x8x16xbf16>
    %158 = vector.shape_cast %157 : vector<1x8x16xbf16> to vector<1x8x16xbf16>
    %159 = vector.broadcast %158 : vector<1x8x16xbf16> to vector<16x8x16xbf16>
    %160 = vector.extract_strided_slice %130 {offsets = [0, 2, 0, 0], sizes = [2, 8, 16, 16], strides = [1, 1, 1, 1]} : vector<2x10x16x16xbf16> to vector<2x8x16x16xbf16>
    %161 = vector.shape_cast %160 : vector<2x8x16x16xbf16> to vector<16x16x16xbf16>
    %cst_70 = arith.constant dense<0.000000e+00> : vector<16x8x16xf32>
    %162 = tpu.matmul %159, %161, %cst_70 {dimension_numbers = #tpu.dot_dimension_numbers<[2], [1], [1], [2], [0, 0, 0, 1, 1, 2], [0], [0]>} : vector<16x8x16xbf16>, vector<16x16x16xbf16>, vector<16x8x16xf32> -> vector<16x8x16xf32>
    %163 = arith.addf %154, %162 : vector<16x8x16xf32>
    %c0_71 = arith.constant 0 : index
    %c0_72 = arith.constant 0 : index
    %164 = vector.load %arg15[%c0_71, %c0_72] : memref<8x1xf32, #tpu.memory_space<vmem>>, vector<8x1xf32>
    %c0_73 = arith.constant 0 : index
    %c0_74 = arith.constant 0 : index
    %165 = vector.load %arg17[%c0_73, %c0_74] : memref<8x1xf32, #tpu.memory_space<vmem>>, vector<8x1xf32>
    %166 = arith.addf %164, %165 : vector<8x1xf32>
    %167 = vector.shape_cast %166 : vector<8x1xf32> to vector<1x8x1xf32>
    %168 = vector.broadcast %167 : vector<1x8x1xf32> to vector<16x8x16xf32>
    %169 = arith.addf %163, %168 : vector<16x8x16xf32>
    %cst_75 = arith.constant 0.000000e+00 : f32
    %170 = vector.broadcast %cst_75 : f32 to vector<16x8x16xf32>
    %171 = arith.maximumf %169, %170 : vector<16x8x16xf32>
    %172 = vector.shape_cast %171 : vector<16x8x16xf32> to vector<2x8x8x16xf32>
    %cst_76 = arith.constant dense<0.000000e+00> : vector<2x8x16xf32>
    %173 = vector.multi_reduction <add>, %172, %cst_76 [1] : vector<2x8x8x16xf32> to vector<2x8x16xf32>
    %174 = vector.shape_cast %173 : vector<2x8x16xf32> to vector<2x1x8x16xf32>
    %cst_77 = arith.constant 8.000000e+00 : f32
    %175 = vector.broadcast %cst_77 : f32 to vector<2x1x8x16xf32>
    %176 = arith.divf %174, %175 : vector<2x1x8x16xf32>
    %177 = vector.broadcast %176 : vector<2x1x8x16xf32> to vector<2x8x8x16xf32>
    %178 = arith.subf %172, %177 : vector<2x8x8x16xf32>
    %179 = arith.mulf %178, %178 : vector<2x8x8x16xf32>
    %cst_78 = arith.constant dense<0.000000e+00> : vector<2x8x16xf32>
    %180 = vector.multi_reduction <add>, %179, %cst_78 [1] : vector<2x8x8x16xf32> to vector<2x8x16xf32>
    %181 = vector.shape_cast %180 : vector<2x8x16xf32> to vector<2x1x8x16xf32>
    %cst_79 = arith.constant 8.000000e+00 : f32
    %182 = vector.broadcast %cst_79 : f32 to vector<2x1x8x16xf32>
    %183 = arith.divf %181, %182 : vector<2x1x8x16xf32>
    %cst_80 = arith.constant 9.99999974E-6 : f32
    %184 = vector.broadcast %cst_80 : f32 to vector<2x1x8x16xf32>
    %185 = arith.addf %183, %184 : vector<2x1x8x16xf32>
    %186 = math.rsqrt %185 : vector<2x1x8x16xf32>
    %187 = vector.broadcast %176 : vector<2x1x8x16xf32> to vector<2x8x8x16xf32>
    %188 = arith.subf %172, %187 : vector<2x8x8x16xf32>
    %189 = vector.broadcast %186 : vector<2x1x8x16xf32> to vector<2x8x8x16xf32>
    %190 = arith.mulf %188, %189 : vector<2x8x8x16xf32>
    %c0_81 = arith.constant 0 : index
    %c0_82 = arith.constant 0 : index
    %191 = vector.load %arg18[%c0_81, %c0_82] : memref<8x1xf32, #tpu.memory_space<vmem>>, vector<8x1xf32>
    %192 = vector.shape_cast %191 : vector<8x1xf32> to vector<1x8x1x1xf32>
    %193 = vector.broadcast %192 : vector<1x8x1x1xf32> to vector<2x8x8x16xf32>
    %194 = arith.mulf %190, %193 : vector<2x8x8x16xf32>
    %c0_83 = arith.constant 0 : index
    %c0_84 = arith.constant 0 : index
    %195 = vector.load %arg19[%c0_83, %c0_84] : memref<8x1xf32, #tpu.memory_space<vmem>>, vector<8x1xf32>
    %196 = vector.shape_cast %195 : vector<8x1xf32> to vector<1x8x1x1xf32>
    %197 = vector.broadcast %196 : vector<1x8x1x1xf32> to vector<2x8x8x16xf32>
    %198 = arith.addf %194, %197 : vector<2x8x8x16xf32>
    %c0_85 = arith.constant 0 : index
    %c0_86 = arith.constant 0 : index
    %c0_87 = arith.constant 0 : index
    %c0_88 = arith.constant 0 : index
    %199 = vector.load %arg20[%c0_85, %c0_86, %c0_87, %c0_88] : memref<2x8x8x16xf32, #tpu.memory_space<vmem>>, vector<2x8x8x16xf32>
    tpu.vector_store %arg20[%c0_85, %c0_86, %c0_87, %c0_88], %198 {strides = array<i32>} : memref<2x8x8x16xf32, #tpu.memory_space<vmem>>, vector<2x8x8x16xf32>,
    return
  }
  func.func @transform_0(%arg0: i32) -> (i32, i32, i32, i32) {
    %c0_i32 = arith.constant 0 : i32
    %c0_i32_0 = arith.constant 0 : i32
    %c0_i32_1 = arith.constant 0 : i32
    %c0_i32_2 = arith.constant 0 : i32
    return %arg0, %c0_i32, %c0_i32_0, %c0_i32_1 : i32, i32, i32, i32
  }
  func.func @transform_1(%arg0: i32) -> (i32, i32) {
    %c0_i32 = arith.constant 0 : i32
    %c0_i32_0 = arith.constant 0 : i32
    %c0_i32_1 = arith.constant 0 : i32
    return %c0_i32, %c0_i32_0 : i32, i32
  }
  func.func @transform_2(%arg0: i32) -> (i32, i32) {
    %c0_i32 = arith.constant 0 : i32
    %c0_i32_0 = arith.constant 0 : i32
    %c0_i32_1 = arith.constant 0 : i32
    return %c0_i32, %c0_i32_0 : i32, i32
  }
  func.func @transform_3(%arg0: i32) -> (i32, i32) {
    %c0_i32 = arith.constant 0 : i32
    %c0_i32_0 = arith.constant 0 : i32
    %c0_i32_1 = arith.constant 0 : i32
    return %c0_i32, %c0_i32_0 : i32, i32
  }
  func.func @transform_4(%arg0: i32) -> (i32, i32) {
    %c0_i32 = arith.constant 0 : i32
    %c0_i32_0 = arith.constant 0 : i32
    %c0_i32_1 = arith.constant 0 : i32
    return %c0_i32, %c0_i32_0 : i32, i32
  }
  func.func @transform_5(%arg0: i32) -> (i32, i32) {
    %c0_i32 = arith.constant 0 : i32
    %c0_i32_0 = arith.constant 0 : i32
    %c0_i32_1 = arith.constant 0 : i32
    return %c0_i32, %c0_i32_0 : i32, i32
  }
  func.func @transform_6(%arg0: i32) -> (i32, i32) {
    %c0_i32 = arith.constant 0 : i32
    %c0_i32_0 = arith.constant 0 : i32
    %c0_i32_1 = arith.constant 0 : i32
    return %c0_i32, %c0_i32_0 : i32, i32
  }
  func.func @transform_7(%arg0: i32) -> (i32, i32) {
    %c0_i32 = arith.constant 0 : i32
    %c0_i32_0 = arith.constant 0 : i32
    %c0_i32_1 = arith.constant 0 : i32
    return %c0_i32, %c0_i32_0 : i32, i32
  }
  func.func @transform_8(%arg0: i32) -> (i32, i32) {
    %c0_i32 = arith.constant 0 : i32
    %c0_i32_0 = arith.constant 0 : i32
    %c0_i32_1 = arith.constant 0 : i32
    return %c0_i32, %c0_i32_0 : i32, i32
  }
  func.func @transform_9(%arg0: i32) -> (i32, i32) {
    %c0_i32 = arith.constant 0 : i32
    %c0_i32_0 = arith.constant 0 : i32
    %c0_i32_1 = arith.constant 0 : i32
    return %c0_i32, %c0_i32_0 : i32, i32
  }
  func.func @transform_10(%arg0: i32) -> (i32, i32) {
    %c0_i32 = arith.constant 0 : i32
    %c0_i32_0 = arith.constant 0 : i32
    %c0_i32_1 = arith.constant 0 : i32
    return %c0_i32, %c0_i32_0 : i32, i32
  }
  func.func @transform_11(%arg0: i32) -> (i32, i32) {
    %c0_i32 = arith.constant 0 : i32
    %c0_i32_0 = arith.constant 0 : i32
    %c0_i32_1 = arith.constant 0 : i32
    return %c0_i32, %c0_i32_0 : i32, i32
  }
  func.func @transform_12(%arg0: i32) -> (i32, i32, i32) {
    %c0_i32 = arith.constant 0 : i32
    %c0_i32_0 = arith.constant 0 : i32
    %c0_i32_1 = arith.constant 0 : i32
    %c0_i32_2 = arith.constant 0 : i32
    return %c0_i32, %c0_i32_0, %c0_i32_1 : i32, i32, i32
  }
  func.func @transform_13(%arg0: i32) -> (i32, i32, i32) {
    %c0_i32 = arith.constant 0 : i32
    %c0_i32_0 = arith.constant 0 : i32
    %c0_i32_1 = arith.constant 0 : i32
    %c0_i32_2 = arith.constant 0 : i32
    return %c0_i32, %c0_i32_0, %c0_i32_1 : i32, i32, i32
  }
  func.func @transform_14(%arg0: i32) -> (i32, i32) {
    %c0_i32 = arith.constant 0 : i32
    %c0_i32_0 = arith.constant 0 : i32
    %c0_i32_1 = arith.constant 0 : i32
    return %c0_i32, %c0_i32_0 : i32, i32
  }
  func.func @transform_15(%arg0: i32) -> (i32, i32) {
    %c0_i32 = arith.constant 0 : i32
    %c0_i32_0 = arith.constant 0 : i32
    %c0_i32_1 = arith.constant 0 : i32
    return %c0_i32, %c0_i32_0 : i32, i32
  }
  func.func @transform_16(%arg0: i32) -> (i32, i32) {
    %c0_i32 = arith.constant 0 : i32
    %c0_i32_0 = arith.constant 0 : i32
    %c0_i32_1 = arith.constant 0 : i32
    return %c0_i32, %c0_i32_0 : i32, i32
  }
  func.func @transform_17(%arg0: i32) -> (i32, i32) {
    %c0_i32 = arith.constant 0 : i32
    %c0_i32_0 = arith.constant 0 : i32
    %c0_i32_1 = arith.constant 0 : i32
    return %c0_i32, %c0_i32_0 : i32, i32
  }
  func.func @transform_18(%arg0: i32) -> (i32, i32) {
    %c0_i32 = arith.constant 0 : i32
    %c0_i32_0 = arith.constant 0 : i32
    %c0_i32_1 = arith.constant 0 : i32
    return %c0_i32, %c0_i32_0 : i32, i32
  }
  func.func @transform_19(%arg0: i32) -> (i32, i32, i32, i32) {
    %c0_i32 = arith.constant 0 : i32
    %c0_i32_0 = arith.constant 0 : i32
    %c0_i32_1 = arith.constant 0 : i32
    %c0_i32_2 = arith.constant 0 : i32
    return %arg0, %c0_i32, %c0_i32_0, %c0_i32_1 : i32, i32, i32, i32
  }
}

</mosaic_0001>

<bundles_post_ra>
// kernel: astgcn_block_pallas.1
= control target key start
LH: loop header
LB: loop body
LE: loop exit
PB: predicated region body
PF: predicated region fallthrough
CT: control target
= control target key end

     0   :  { %s10650_s0 = inlined_call_operand.vmem [shape: f32[4,8,4,16], index: 0, kind: input, shape index: {}]   ;;  %s10651_s1 = inlined_call_operand.vmem [shape: f32[1,16], index: 1, kind: input, shape index: {}]   ;;  %s10652_s2 = inlined_call_operand.vmem [shape: f32[4,16], index: 2, kind: input, shape index: {}]   ;;  %s10653_s3 = inlined_call_operand.vmem [shape: f32[4,1], index: 3, kind: input, shape index: {}]   ;;  %s10654_s4 = inlined_call_operand.vmem [shape: f32[8,8], index: 4, kind: input, shape index: {}]   ;;  %s10655_s5 = inlined_call_operand.vmem [shape: f32[8,8], index: 5, kind: input, shape index: {}]   ;;  %s10656_s6 = inlined_call_operand.vmem [shape: f32[1,8], index: 6, kind: input, shape index: {}]   ;;  %s10657_s7 = inlined_call_operand.vmem [shape: f32[8,4], index: 7, kind: input, shape index: {}]   ;;  %s10658_s8 = inlined_call_operand.vmem [shape: f32[4,1], index: 8, kind: input, shape index: {}]   ;;  %s10659_s9 = inlined_call_operand.vmem [shape: f32[16,16], index: 9, kind: input, shape index: {}]   ;;  %s10660_s10 = inlined_call_operand.vmem [shape: f32[16,16], index: 10, kind: input, shape index: {}]   ;;  %s10661_s11 = inlined_call_operand.vmem [shape: bf16[16,12], index: 11, kind: input, shape index: {}]   ;;  %s10662_s12 = inlined_call_operand.vmem [shape: bf16[3,16,16], index: 12, kind: input, shape index: {}]   ;;  %s10663_s13 = inlined_call_operand.vmem [shape: bf16[3,8,16], index: 13, kind: input, shape index: {}]   ;;  %s10664_s14 = inlined_call_operand.vmem [shape: f32[8,1], index: 14, kind: input, shape index: {}]   ;;  %s10665_s15 = inlined_call_operand.vmem [shape: f32[8,4], index: 15, kind: input, shape index: {}]   ;;  %s10666_s16 = inlined_call_operand.vmem [shape: f32[8,1], index: 16, kind: input, shape index: {}]   ;;  %s10667_s17 = inlined_call_operand.vmem [shape: f32[8,1], index: 17, kind: input, shape index: {}]   ;;  %s10668_s18 = inlined_call_operand.vmem [shape: f32[8,1], index: 18, kind: input, shape index: {}]   ;;  %s10669_s19 = inlined_call_operand.vmem [shape: f32[4,8,8,16], index: 19, kind: output, shape index: {}]  }
   0x1   :  { %10670 = sst [smem:[#allocation2_spill]] %s10650_s0  ;;  %s9018_s0 = smov 0  }
   0x2   :  { %10671 = sst [smem:[#allocation3_spill]] %s10651_s1 }
   0x3   :  { %10672 = sst [smem:[#allocation4_spill]] %s10652_s2 }
   0x4   :  { %10673 = sst [smem:[#allocation5_spill]] %s10653_s3 }
   0x5 LB: > { %s7834_s30 = sadd.s32 4294967295, %s8911_s0   ;;  %p7838_p0 = scmp.ge.s32.totalorder %s8911_s0, 1  ;;  %s8911_s0 = sphi %s9018_s0, %s29_s0  }
   0x6   : > { %p539_p1 = scmp.lt.s32.totalorder %s8911_s0, 3 }
   0x8   : > { %p540_p2 = pnand %p7838_p0, %p539_p1 }
   0x9   : > { %s7839_s20 = sshll.u32 (!%p540_p2), %s7834_s30, 1  ;;  %s10674_s2 = sld [smem:[#allocation3_spill]] (!%p540_p2)  ;;  %vm651_vm0 = vcmask (!%p540_p2), 125952   ;;  %vm809_vm1 = vcmask (!%p540_p2), 1043456   ;;  %v8913_v50 = vmov (!%p540_p2), 0   ;;  %v8914_v52 = vmov (!%p540_p2), 0.0  }
   0xa   : > { %543 = sbr.rel (%p540_p2) target bundleno = 2919 (0xb67), region = 96  ;;  %p598_p3 = scmp.lt.s32.totalorder (!%p540_p2), %s7839_s20, 3  ;;  %8820 = vset.pattern.permute.xlu0 (!%p540_p2), %v8913_v50  ;;  %8821 = vset.pattern.permute.xlu1 (!%p540_p2), %v8913_v50  ;;  %v717_v57 = vlaneseq (!%p540_p2)  ;;  %vm783_vm2 = vcmask (!%p540_p2), 1041409   ;;  %vm785_vm3 = vcmask (!%p540_p2), 1042434   ;;  %vm787_vm4 = vcmask (!%p540_p2), 1043459  }
   0xb   : > { %s10675_s25 = sld [smem:[#allocation2_spill]] (!%p540_p2)  ;;  %s10676_s28 = sld [smem:[#allocation4_spill]] (!%p540_p2)  ;;  %8257 = vmatprep.subr.mxu1 (!%p540_p2), %v8914_v52  ;;  %vm789_vm5 = vcmask (!%p540_p2), 1044484   ;;  %vm791_vm6 = vcmask (!%p540_p2), 1045509   ;;  %vm793_vm7 = vcmask (!%p540_p2), 1046534   ;;  %vm795_vm8 = vcmask (!%p540_p2), 1047559  }
   0xc   : > { %v718_v60 = vand.u32 (!%p540_p2), 127, %v717_v57  ;;  %v9129_v61 = vshrl.u32 (!%p540_p2), %v717_v57, 7  ;;  %vm804_vm9 = vcmask (!%p540_p2), 31744   ;;  %vm1038_vm10 = vcmask (!%p540_p2), 130048  }
   0xd   : > { %vm8915_vm11 = vmmov (!%p540_p2), 0   ;;  %vm1217_vm12 = vcmask (!%p540_p2), 64512   ;;  %vm3454_vm13 = vcmask (!%p540_p2), 1041408   ;;  %vm3546_vm14 = vcmask (!%p540_p2), 1045504  }
   0xe   : > { %8259 = vmatprep.mubr.msk.f32.mxu1 (!%p540_p2), %vm8915_vm11, %v8914_v52  ;;  %vm3542_vm15 = vcmask (!%p540_p2), 97280  }
   0xf   : > { %v7845_v0 = vld [vmem:[%s10674_s2] ss:$0 sm:$0xff] (!%p540_p2) }
  0x11   : > { %s10679_s20 = smov (!%p598_p3, %s7839_s20), 3  ;;  %v700_v49 = vld [vmem:[%s10676_s28] sm:$0xf] }
  0x12   : > { %s8019_s21 = sshll.u32 %s10679_s20, 5  ;;  %8242 = vmatprep.subr.msk.mxu0 %vm809_vm1, %v700_v49 }
  0x13   : > { %s9035_s3 = scalar_lea.vmem %s10675_s25, %s8019_s21  ;;  %8243 = vmatpush3.msk.msra.mxu0 %vm809_vm1, %v700_v49  ;;  %s10677_s21 = sld [smem:[#allocation5_spill]] }
  0x14   : > { %v9038_v1 = vld [vmem:[%s9035_s3 + $0x8] sm:$0xf]  ;;  %v9041_v2 = vld [vmem:[%s9035_s3] sm:$0xf]  ;;  %v9050_v7 = vld [vmem:[%s9035_s3 + $0x4] sm:$0xf]  ;;  %8247 = vmatprep.subr.mxu0 %v8914_v52 }
  0x15   : > { %v9044_v3 = vld [vmem:[%s9035_s3 + $0x20] sm:$0xf]  ;;  %v637_v4 = vmul.f32 %v7845_v0, %v9038_v1  ;;  %v635_v5 = vmul.f32 %v7845_v0, %v9041_v2  ;;  %v636_v8 = vmul.f32 %v7845_v0, %v9050_v7  ;;  %v9054_v9 = vld [vmem:[%s9035_s3 + $0xc] sm:$0xf]  ;;  %v9057_v10 = vld [vmem:[%s9035_s3 + $0x24] sm:$0xf] }
  0x16   : > { %v643_v6 = vmul.f32 %v7845_v0, %v9044_v3  ;;  %v638_v15 = vmul.f32 %v7845_v0, %v9054_v9  ;;  %v644_v16 = vmul.f32 %v7845_v0, %v9057_v10  ;;  %v9066_v17 = vld [vmem:[%s9035_s3 + $0x10] sm:$0xf]  ;;  %v9069_v18 = vld [vmem:[%s9035_s3 + $0x28] sm:$0xf]  ;;  %v9076_v23 = vld [vmem:[%s9035_s3 + $0x14] sm:$0xf] }
  0x17   : > { %v658_v11 = vsel %vm651_vm0, %v637_v4, 0.0  ;;  %v652_v12 = vsel %vm651_vm0, %v635_v5, 0.0  ;;  %v655_v14 = vsel %vm651_vm0, %v636_v8, 0.0  ;;  %v639_v21 = vmul.f32 %v7845_v0, %v9066_v17  ;;  %v9079_v24 = vld [vmem:[%s9035_s3 + $0x2c] sm:$0xf]  ;;  %s8020_s25 = sshll.u32 %s10679_s20, 6 }
  0x18   : > { %659 = vadd.xlane.f32.xlu1 %v658_v11  ;;  %653 = vadd.xlane.f32.xlu0 %v652_v12  ;;  %v676_v13 = vsel %vm651_vm0, %v643_v6, 0.0  ;;  %v661_v19 = vsel %vm651_vm0, %v638_v15, 0.0  ;;  %v679_v20 = vsel %vm651_vm0, %v644_v16, 0.0  ;;  %v645_v22 = vmul.f32 %v7845_v0, %v9069_v18  ;;  %v9086_v29 = vld [vmem:[%s9035_s3 + $0x18] sm:$0xf]  ;;  %s10549_s27 = scalar_lea.vmem %s10669_s19, %s8020_s25 }
  0x19   : > { %v664_v25 = vsel %vm651_vm0, %v639_v21, 0.0  ;;  %v640_v27 = vmul.f32 %v7845_v0, %v9076_v23  ;;  %v646_v28 = vmul.f32 %v7845_v0, %v9079_v24  ;;  %v9089_v30 = vld [vmem:[%s9035_s3 + $0x30] sm:$0xf]  ;;  %v641_v33 = vmul.f32 %v7845_v0, %v9086_v29  ;;  %v9096_v35 = vld [vmem:[%s9035_s3 + $0x1c] sm:$0xf] }
  0x1a   : > { %v682_v26 = vsel %vm651_vm0, %v645_v22, 0.0  ;;  %v647_v34 = vmul.f32 %v7845_v0, %v9089_v30  ;;  %v9099_v36 = vld [vmem:[%s9035_s3 + $0x34] sm:$0xf]  ;;  %v642_v39 = vmul.f32 %v7845_v0, %v9096_v35  ;;  %v9106_v41 = vld [vmem:[%s9035_s3 + $0x38] sm:$0xf] }
  0x1b   : > { %v667_v31 = vsel %vm651_vm0, %v640_v27, 0.0  ;;  %v685_v32 = vsel %vm651_vm0, %v646_v28, 0.0  ;;  %v670_v37 = vsel %vm651_vm0, %v641_v33, 0.0  ;;  %v648_v40 = vmul.f32 %v7845_v0, %v9099_v36  ;;  %v9109_v42 = vld [vmem:[%s9035_s3 + $0x3c] sm:$0xf] }
  0x1c   : > { %677 = vadd.xlane.f32.xlu1 %v676_v13  ;;  %656 = vadd.xlane.f32.xlu0 %v655_v14  ;;  %v688_v38 = vsel %vm651_vm0, %v647_v34, 0.0  ;;  %v673_v43 = vsel %vm651_vm0, %v642_v39, 0.0  ;;  %v649_v45 = vmul.f32 %v7845_v0, %v9106_v41  ;;  %v650_v46 = vmul.f32 %v7845_v0, %v9109_v42  ;;  %v888_v51 = vld [vmem:[%s10677_s21] sm:$0xf] }
  0x1d   : > { %v691_v44 = vsel %vm651_vm0, %v648_v40, 0.0  ;;  %v721_v0 = vsub.s32 %v718_v60, %v9129_v61 }
  0x1e   : > { %v694_v47 = vsel %vm651_vm0, %v649_v45, 0.0  ;;  %v697_v48 = vsel %vm651_vm0, %v650_v46, 0.0 }
  0x20   : > { %662 = vadd.xlane.f32.xlu1 %v661_v19  ;;  %680 = vadd.xlane.f32.xlu0 %v679_v20 }
  0x24   : > { %665 = vadd.xlane.f32.xlu1 %v664_v25  ;;  %683 = vadd.xlane.f32.xlu0 %v682_v26 }
  0x28   : > { %668 = vadd.xlane.f32.xlu1 %v667_v31  ;;  %686 = vadd.xlane.f32.xlu0 %v685_v32 }
  0x2c   : > { %671 = vadd.xlane.f32.xlu1 %v670_v37  ;;  %689 = vadd.xlane.f32.xlu0 %v688_v38 }
  0x30   : > { %674 = vadd.xlane.f32.xlu1 %v673_v43  ;;  %692 = vadd.xlane.f32.xlu0 %v691_v44 }
  0x34   : > { %695 = vadd.xlane.f32.xlu0 %v694_v47  ;;  %698 = vadd.xlane.f32.xlu1 %v697_v48 }
  0x4a   : > { %891 = vperm.xlu0 %8820, %v888_v51  }
  0xa5   : > { %v660_v53 = vpop.xlane.xlu1 %659  ;;  %v654_v54 = vpop.xlane.xlu0 %653 }
  0xa6   : > { %v722_v8 = vrot.slane %v654_v54, %v721_v0  ;;  %v730_v13 = vrot.slane %v660_v53, %v721_v0 }
  0xa9   : > { %v678_v55 = vpop.xlane.xlu1 %677  ;;  %v657_v56 = vpop.xlane.xlu0 %656 }
  0xaa   : > { %v726_v4 = vrot.slane %v657_v56, %v721_v0  ;;  %v754_v27 = vrot.slane %v678_v55, %v721_v0 }
  0xac   : > { %v784_v11 = vsel %vm783_vm2, %v726_v4, %v722_v8 }
  0xad   : > { %v663_v58 = vpop.xlane.xlu1 %662  ;;  %v681_v59 = vpop.xlane.xlu0 %680  ;;  %v786_v20 = vsel %vm785_vm3, %v730_v13, %v784_v11 }
  0xae   : > { %v734_v12 = vrot.slane %v663_v58, %v721_v0  ;;  %v758_v21 = vrot.slane %v681_v59, %v721_v0 }
  0xb0   : > { %v788_v25 = vsel %vm787_vm4, %v734_v12, %v786_v20  ;;  %v797_v39 = vsel %vm783_vm2, %v758_v21, %v754_v27 }
  0xb1   : > { %v666_v62 = vpop.xlane.xlu1 %665  ;;  %v684_v63 = vpop.xlane.xlu0 %683 }
  0xb2   : > { %v738_v14 = vrot.slane %v666_v62, %v721_v0  ;;  %v762_v26 = vrot.slane %v684_v63, %v721_v0 }
  0xb4   : > { %v790_v28 = vsel %vm789_vm5, %v738_v14, %v788_v25  ;;  %v798_v44 = vsel %vm785_vm3, %v762_v26, %v797_v39 }
  0xb5   : > { %v669_v5 = vpop.xlane.xlu1 %668  ;;  %v687_v6 = vpop.xlane.xlu0 %686 }
  0xb6   : > { %v742_v19 = vrot.slane %v669_v5, %v721_v0  ;;  %v766_v31 = vrot.slane %v687_v6, %v721_v0 }
  0xb8   : > { %v792_v38 = vsel %vm791_vm6, %v742_v19, %v790_v28  ;;  %v799_v46 = vsel %vm787_vm4, %v766_v31, %v798_v44 }
  0xb9   : > { %v672_v15 = vpop.xlane.xlu1 %671  ;;  %v690_v16 = vpop.xlane.xlu0 %689 }
  0xba   : > { %v746_v22 = vrot.slane %v672_v15, %v721_v0  ;;  %v770_v34 = vrot.slane %v690_v16, %v721_v0 }
  0xbc   : > { %v794_v43 = vsel %vm793_vm7, %v746_v22, %v792_v38  ;;  %v800_v49 = vsel %vm789_vm5, %v770_v34, %v799_v46 }
  0xbd   : > { %v675_v32 = vpop.xlane.xlu1 %674  ;;  %v693_v33 = vpop.xlane.xlu0 %692 }
  0xbe   : > { %v750_v37 = vrot.slane %v675_v32, %v721_v0  ;;  %v774_v40 = vrot.slane %v693_v33, %v721_v0 }
  0xc0   : > { %v796_v45 = vsel %vm795_vm8, %v750_v37, %v794_v43  ;;  %v801_v54 = vsel %vm791_vm6, %v774_v40, %v800_v49 }
  0xc1   : > { %8244 = vmatprep.mubr.msk.f32.mxu0 %vm804_vm9, %v796_v45  ;;  %v696_v47 = vpop.xlane.xlu0 %695  ;;  %v699_v48 = vpop.xlane.xlu1 %698 }
  0xc2   : > { %v778_v51 = vrot.slane %v696_v47, %v721_v0  ;;  %v782_v53 = vrot.slane %v699_v48, %v721_v0 }
  0xc4   : > { %v802_v55 = vsel %vm793_vm7, %v778_v51, %v801_v54 }
  0xc5   : > { %v803_v56 = vsel %vm795_vm8, %v782_v53, %v802_v55 }
  0xc6   : > { %8245 = vmatmul.mubr.msk.f32.vlgmr.msra.gmra.mrb[0].mxu0 %vm804_vm9, %v803_v56 }
  0xc7   : > { %8249 = vmatprep.mubr.msk.f32.mxu0 %vm8915_vm11, %v8914_v52 }
  0xc9   : > { %v9148_v57 = vpop.permute.xlu0 %891 }
  0xca   : > { %v894_v58 = vmul.f32 %v9148_v57, %v9041_v2  ;;  %v895_v59 = vmul.f32 %v9148_v57, %v9050_v7  ;;  %v896_v60 = vmul.f32 %v9148_v57, %v9038_v1  ;;  %v897_v62 = vmul.f32 %v9148_v57, %v9054_v9 }
  0xcb   : > { %v898_v63 = vmul.f32 %v9148_v57, %v9066_v17  ;;  %v899_v0 = vmul.f32 %v9148_v57, %v9076_v23  ;;  %v900_v4 = vmul.f32 %v9148_v57, %v9086_v29  ;;  %v901_v5 = vmul.f32 %v9148_v57, %v9096_v35 }
  0xcc   : > { %v910_v6 = vsel %vm651_vm0, %v894_v58, 0.0  ;;  %v917_v8 = vsel %vm651_vm0, %v895_v59, 0.0  ;;  %v924_v11 = vsel %vm651_vm0, %v896_v60, 0.0  ;;  %v931_v12 = vsel %vm651_vm0, %v897_v62, 0.0 }
  0xcd   : > { %v911_v13 = vrot.slane %v910_v6, 4  ;;  %v918_v14 = vrot.slane %v917_v8, 4  ;;  %v925_v15 = vrot.slane %v924_v11, 4  ;;  %v932_v16 = vrot.slane %v931_v12, 4 }
  0xce   : > { %v938_v19 = vsel %vm651_vm0, %v898_v63, 0.0  ;;  %v945_v20 = vsel %vm651_vm0, %v899_v0, 0.0  ;;  %v952_v21 = vsel %vm651_vm0, %v900_v4, 0.0  ;;  %v959_v22 = vsel %vm651_vm0, %v901_v5, 0.0 }
  0xcf   : > { %v912_v25 = vadd.f32 %v911_v13, %v910_v6  ;;  %v919_v26 = vadd.f32 %v918_v14, %v917_v8  ;;  %v926_v27 = vadd.f32 %v925_v15, %v924_v11  ;;  %v933_v28 = vadd.f32 %v932_v16, %v931_v12 }
  0xd0   : > { %v939_v31 = vrot.slane %v938_v19, 4  ;;  %v946_v32 = vrot.slane %v945_v20, 4  ;;  %v953_v33 = vrot.slane %v952_v21, 4  ;;  %v960_v34 = vrot.slane %v959_v22, 4 }
  0xd1   : > { %v913_v37 = vrot.slane %v912_v25, 2  ;;  %v920_v38 = vrot.slane %v919_v26, 2  ;;  %v927_v39 = vrot.slane %v926_v27, 2  ;;  %v934_v40 = vrot.slane %v933_v28, 2 }
  0xd2   : > { %v940_v43 = vadd.f32 %v939_v31, %v938_v19  ;;  %v947_v44 = vadd.f32 %v946_v32, %v945_v20  ;;  %v954_v45 = vadd.f32 %v953_v33, %v952_v21  ;;  %v961_v46 = vadd.f32 %v960_v34, %v959_v22 }
  0xd3   : > { %v914_v47 = vadd.f32 %v913_v37, %v912_v25  ;;  %v921_v48 = vadd.f32 %v920_v38, %v919_v26  ;;  %v928_v49 = vadd.f32 %v927_v39, %v926_v27  ;;  %v935_v51 = vadd.f32 %v934_v40, %v933_v28 }
  0xd4   : > { %v941_v53 = vrot.slane %v940_v43, 2  ;;  %v948_v54 = vrot.slane %v947_v44, 2  ;;  %v955_v55 = vrot.slane %v954_v45, 2  ;;  %v962_v56 = vrot.slane %v961_v46, 2 }
  0xd5   : > { %v915_v58 = vrot.slane %v914_v47, 1  ;;  %v922_v59 = vrot.slane %v921_v48, 1  ;;  %v929_v60 = vrot.slane %v928_v49, 1  ;;  %v936_v62 = vrot.slane %v935_v51, 1 }
  0xd6   : > { %v942_v63 = vadd.f32 %v941_v53, %v940_v43  ;;  %v949_v0 = vadd.f32 %v948_v54, %v947_v44  ;;  %v956_v4 = vadd.f32 %v955_v55, %v954_v45  ;;  %v963_v5 = vadd.f32 %v962_v56, %v961_v46 }
  0xd7   : > { %v916_v6 = vadd.f32 %v915_v58, %v914_v47  ;;  %v923_v8 = vadd.f32 %v922_v59, %v921_v48  ;;  %v930_v11 = vadd.f32 %v929_v60, %v928_v49  ;;  %v937_v12 = vadd.f32 %v936_v62, %v935_v51 }
  0xd8   : > { %v943_v13 = vrot.slane %v942_v63, 1  ;;  %v950_v14 = vrot.slane %v949_v0, 1  ;;  %v957_v15 = vrot.slane %v956_v4, 1  ;;  %v964_v16 = vrot.slane %v963_v5, 1 }
  0xd9   : > { %v1031_v19 = vsel %vm783_vm2, %v923_v8, %v916_v6  ;;  %v902_v34 = vmul.f32 %v9148_v57, %v9044_v3  ;;  %v903_v37 = vmul.f32 %v9148_v57, %v9057_v10  ;;  %v904_v38 = vmul.f32 %v9148_v57, %v9069_v18 }
  0xda   : > { %v944_v20 = vadd.f32 %v943_v13, %v942_v63  ;;  %v951_v21 = vadd.f32 %v950_v14, %v949_v0  ;;  %v958_v22 = vadd.f32 %v957_v15, %v956_v4  ;;  %v1032_v25 = vsel %vm785_vm3, %v930_v11, %v1031_v19 }
  0xdb   : > { %v965_v26 = vadd.f32 %v964_v16, %v963_v5  ;;  %v1033_v27 = vsel %vm787_vm4, %v937_v12, %v1032_v25  ;;  %v966_v39 = vsel %vm651_vm0, %v902_v34, 0.0  ;;  %v973_v40 = vsel %vm651_vm0, %v903_v37, 0.0 }
  0xdc   : > { %v1034_v28 = vsel %vm789_vm5, %v944_v20, %v1033_v27  ;;  %v905_v43 = vmul.f32 %v9148_v57, %v9079_v24  ;;  %v967_v44 = vrot.slane %v966_v39, 4  ;;  %v974_v45 = vrot.slane %v973_v40, 4 }
  0xdd   : > { %v1035_v31 = vsel %vm791_vm6, %v951_v21, %v1034_v28  ;;  %v980_v46 = vsel %vm651_vm0, %v904_v38, 0.0  ;;  %v906_v47 = vmul.f32 %v9148_v57, %v9089_v30  ;;  %v907_v54 = vmul.f32 %v9148_v57, %v9099_v36 }
  0xde   : > { %v1036_v32 = vsel %vm793_vm7, %v958_v22, %v1035_v31  ;;  %v981_v48 = vrot.slane %v980_v46, 4  ;;  %v987_v49 = vsel %vm651_vm0, %v905_v43, 0.0  ;;  %v968_v51 = vadd.f32 %v967_v44, %v966_v39 }
  0xdf   : > { %v1037_v33 = vsel %vm795_vm8, %v965_v26, %v1036_v32  ;;  %v975_v53 = vadd.f32 %v974_v45, %v973_v40  ;;  %v988_v55 = vrot.slane %v987_v49, 4  ;;  %v994_v56 = vsel %vm651_vm0, %v906_v47, 0.0 }
  0xe0   : > { %8248 = vmatpush3.xpose.msk.msra.mxu0 %vm1038_vm10, %v1037_v33  ;;  %v982_v58 = vadd.f32 %v981_v48, %v980_v46  ;;  %v908_v59 = vmul.f32 %v9148_v57, %v9106_v41  ;;  %v969_v60 = vrot.slane %v968_v51, 2  ;;  %v995_v63 = vrot.slane %v994_v56, 4 }
  0xe1   : > { %8252 = vmatprep.subr.mxu0 %v8914_v52  ;;  %v976_v62 = vrot.slane %v975_v53, 2  ;;  %v1001_v0 = vsel %vm651_vm0, %v907_v54, 0.0  ;;  %v989_v4 = vadd.f32 %v988_v55, %v987_v49  ;;  %v909_v5 = vmul.f32 %v9148_v57, %v9109_v42 }
  0xe2   : > { %v983_v6 = vrot.slane %v982_v58, 2  ;;  %v970_v8 = vadd.f32 %v969_v60, %v968_v51  ;;  %v1002_v12 = vrot.slane %v1001_v0, 4  ;;  %v1008_v13 = vsel %vm651_vm0, %v908_v59, 0.0 }
  0xe3   : > { %v977_v11 = vadd.f32 %v976_v62, %v975_v53  ;;  %v996_v14 = vadd.f32 %v995_v63, %v994_v56  ;;  %v990_v15 = vrot.slane %v989_v4, 2  ;;  %v1009_v19 = vrot.slane %v1008_v13, 4 }
  0xe4   : > { %v984_v16 = vadd.f32 %v983_v6, %v982_v58  ;;  %v1015_v20 = vsel %vm651_vm0, %v909_v5, 0.0  ;;  %v971_v21 = vrot.slane %v970_v8, 1  ;;  %v1003_v25 = vadd.f32 %v1002_v12, %v1001_v0  ;;  %v1022_v12 = vld [vmem:[%s10654_s4] sm:$0xff] }
  0xe5   : > { %v978_v22 = vrot.slane %v977_v11, 1  ;;  %v997_v26 = vrot.slane %v996_v14, 2  ;;  %v991_v27 = vadd.f32 %v990_v15, %v989_v4  ;;  %v1016_v28 = vrot.slane %v1015_v20, 4 }
  0xe6   : > { %v985_v31 = vrot.slane %v984_v16, 1  ;;  %v1010_v57 = vadd.f32 %v1009_v19, %v1008_v13  ;;  %v972_v32 = vadd.f32 %v971_v21, %v970_v8  ;;  %v1004_v34 = vrot.slane %v1003_v25, 2 }
  0xe7   : > { %v979_v33 = vadd.f32 %v978_v22, %v977_v11  ;;  %v998_v37 = vadd.f32 %v997_v26, %v996_v14  ;;  %v992_v38 = vrot.slane %v991_v27, 1  ;;  %v1017_v39 = vadd.f32 %v1016_v28, %v1015_v20 }
  0xe8   : > { %v986_v40 = vadd.f32 %v985_v31, %v984_v16  ;;  %v1011_v43 = vrot.slane %v1010_v57, 2  ;;  %v1005_v44 = vadd.f32 %v1004_v34, %v1003_v25  ;;  %v1216_v31 = vld [vmem:[%s10655_s5] sm:$0xff] }
  0xe9   : > { %v1122_v45 = vsel %vm783_vm2, %v979_v33, %v972_v32  ;;  %v999_v46 = vrot.slane %v998_v37, 1  ;;  %v993_v47 = vadd.f32 %v992_v38, %v991_v27  ;;  %v1018_v48 = vrot.slane %v1017_v39, 2 }
  0xea   : > { %v1012_v49 = vadd.f32 %v1011_v43, %v1010_v57  ;;  %v1123_v51 = vsel %vm785_vm3, %v986_v40, %v1122_v45  ;;  %v1006_v53 = vrot.slane %v1005_v44, 1 }
  0xeb   : > { %v1000_v54 = vadd.f32 %v999_v46, %v998_v37  ;;  %v1019_v55 = vadd.f32 %v1018_v48, %v1017_v39  ;;  %v1124_v56 = vsel %vm787_vm4, %v993_v47, %v1123_v51 }
  0xec   : > { %v1013_v58 = vrot.slane %v1012_v49, 1  ;;  %v1007_v59 = vadd.f32 %v1006_v53, %v1005_v44 }
  0xed   : > { %v1125_v60 = vsel %vm789_vm5, %v1000_v54, %v1124_v56  ;;  %v1020_v62 = vrot.slane %v1019_v55, 1 }
  0xee   : > { %v1014_v63 = vadd.f32 %v1013_v58, %v1012_v49  ;;  %v1126_v0 = vsel %vm791_vm6, %v1007_v59, %v1125_v60 }
  0xef   : > { %v1021_v4 = vadd.f32 %v1020_v62, %v1019_v55 }
  0xf0   : > { %v1127_v5 = vsel %vm793_vm7, %v1014_v63, %v1126_v0 }
  0xf1   : > { %v1128_v11 = vsel %vm795_vm8, %v1021_v4, %v1127_v5 }
 0x199   : > { %v8246_v6 = vpop.f32.mrb[0].mxu0 }
 0x19a   : > { %v879_v8 = vpop.f32.mrb[1].mxu0 }
 0x19b   : > { %8250 = vmatmul.mubr.msk.f32.vlgmr.msra.gmra.mrb[2].mxu0 %vm1038_vm10, %v879_v8 }
 0x19c   : > { %8253 = vmatpush3.xpose.msk.msra.mxu0 %vm1038_vm10, %v1128_v11  ;;  %8254 = vmatprep.mubr.msk.f32.mxu0 %vm8915_vm11, %v8914_v52 }
 0x19d   : > { %8262 = vmatprep.subr.mxu0 %v8914_v52 }
 0x19f   : > { %8255 = vmatmul.mubr.msk.f32.vlgmr.msra.gmra.mrb[4].mxu0 %vm1038_vm10, %v8246_v6 }
 0x1a0   : > { %8264 = vmatprep.mubr.msk.f32.mxu0 %vm8915_vm11, %v8914_v52 }
 0x26e   : > { %v1110_v13 = vpop.f32.mrb[2].mxu0 }
 0x26f   : > { %v1111_v14 = vadd.f32 %v1110_v13, %v1022_v12  ;;  %v8251_v15 = vpop.f32.mrb[3].mxu0 }
 0x271   : > { %v7853_v16 = vmul.f32 -1.442695, %v1111_v14 }
 0x272   : > { %v1200_v19 = vpop.f32.mrb[4].mxu0 }
 0x273   : > { %8825 = vpow2.f32 %v7853_v16  ;;  %v1201_v20 = vadd.f32 %v1200_v19, %v1022_v12  ;;  %v8256_v21 = vpop.f32.mrb[5].mxu0 }
 0x275   : > { %v7854_v22 = vmul.f32 -1.442695, %v1201_v20 }
 0x277   : > { %8827 = vpow2.f32 %v7854_v22 }
 0x27d   : > { %v8826_v25 = vpop.eup %8825 }
 0x27e   : > { %v1210_v26 = vadd.f32 1.0, %v8826_v25 }
 0x280   : > { %8829 = vrcp.f32 %v1210_v26  ;;  %v7857_v26 = vld [vmem:[%s10656_s6] ss:$0 sm:$0xff] }
 0x281   : > { %v8828_v27 = vpop.eup %8827 }
 0x282   : > { %v1211_v28 = vadd.f32 1.0, %v8828_v27 }
 0x284   : > { %8831 = vrcp.f32 %v1211_v28 }
 0x28a   : > { %v8830_v57 = vpop.eup %8829 }
 0x28b   : > { %8258 = vmatpush3.msra.mxu1 %v8830_v57 }
 0x28c   : > { %8260 = vmatmul.mubr.msk.f32.vlgmr.msra.gmra.mrb[0].mxu1 %vm1217_vm12, %v1216_v31  ;;  %8267 = vmatprep.subr.mxu1 %v8914_v52 }
 0x28d   : > { %8269 = vmatprep.mubr.msk.f32.mxu1 %vm8915_vm11, %v8914_v52 }
 0x28e   : > { %v8832_v32 = vpop.eup %8831 }
 0x28f   : > { %8263 = vmatpush3.msra.mxu0 %v8832_v32 }
 0x290   : > { %8265 = vmatmul.mubr.msk.f32.vlgmr.msra.gmra.mrb[6].mxu0 %vm1217_vm12, %v1216_v31  ;;  %8272 = vmatprep.subr.mxu0 %v8914_v52 }
 0x291   : > { %8274 = vmatprep.mubr.msk.f32.mxu0 %vm8915_vm11, %v8914_v52 }
 0x35f   : > { %v1287_v33 = vpop.f32.mrb[0].mxu1 }
 0x360   : > { %v1361_v34 = vsel %vm1217_vm12, %v1287_v33, -inf  ;;  %v8261_v37 = vpop.f32.mrb[1].mxu1 }
 0x361   : > { %v1362_v38 = vrot.slane %v1361_v34, 4  ;;  %v8916_v37 = vmov 1966171168  }
 0x363   : > { %v1363_v39 = vmax.f32 %v1361_v34, %v1362_v38  ;;  %v1357_v40 = vpop.f32.mrb[6].mxu0  ;;  %v7502_v38 = vunpack.c.l.s4 %v8916_v37 }
 0x364   : > { %v1368_v43 = vsel %vm1217_vm12, %v1357_v40, -inf  ;;  %v8266_v44 = vpop.f32.mrb[7].mxu0 }
 0x365   : > { %v1364_v45 = vrot.slane %v1363_v39, 2  ;;  %v1369_v46 = vrot.slane %v1368_v43, 4  ;;  %v7498_v44 = vld [vmem:[%s10667_s17] sm:$0xff] }
 0x367   : > { %v1365_v47 = vmax.f32 %v1363_v39, %v1364_v45  ;;  %v1370_v48 = vmax.f32 %v1368_v43, %v1369_v46  ;;  %v1692_v39 = vld [vmem:[%s10658_s8] sm:$0xf] }
 0x369   : > { %v1366_v49 = vrot.slane %v1365_v47, 1  ;;  %v1371_v51 = vrot.slane %v1370_v48, 2 }
 0x36b   : > { %v1367_v53 = vmax.f32 %v1365_v47, %v1366_v49  ;;  %v1372_v54 = vmax.f32 %v1370_v48, %v1371_v51  ;;  %v7500_v47 = vcombine.high %v7498_v44, %v7498_v44  ;;  %v7341_v51 = vld [vmem:[%s10664_s14] sm:$0xff] }
 0x36d   : > { %v1375_v55 = vsub.f32 %v1287_v33, %v1367_v53  ;;  %v1373_v56 = vrot.slane %v1372_v54, 1  ;;  %v7342_v53 = vld [vmem:[%s10666_s16] sm:$0xff] }
 0x36f   : > { %v1377_v58 = vmul.f32 1.442695, %v1375_v55  ;;  %v1374_v59 = vmax.f32 %v1372_v54, %v1373_v56  ;;  %v7343_v54 = vadd.f32 %v7342_v53, %v7341_v51  ;;  %v9276_v55 = vsub.s32 0, %v9129_v61 }
 0x371   : > { %8833 = vpow2.f32 %v1377_v58  ;;  %v1376_v60 = vsub.f32 %v1357_v40, %v1374_v59  ;;  %v7503_v40 = vunpack.c.0.s8 %v7502_v38  ;;  %v7629_v59 = vld [vmem:[%s10668_s18] sm:$0xff] }
 0x373   : > { %v1379_v62 = vmul.f32 1.442695, %v1376_v60  ;;  %v9253_v43 = vsub.s32 %v7503_v40, %v9129_v61 }
 0x375   : > { %8835 = vpow2.f32 %v1379_v62  ;;  %v9259_v45 = vrot.slane %v7498_v44, %v9253_v43  ;;  %v9267_v49 = vrot.slane %v7500_v47, %v9253_v43 }
 0x377   : > { %v7515_v46 = vcombine.high %v9259_v45, %v9259_v45  ;;  %v7516_v58 = vcombine.high %v9267_v49, %v9267_v49 }
 0x379   : > { %v9264_v48 = vrot.slane %v7515_v46, %v9253_v43  ;;  %v7544_v62 = vrot.slane %v7516_v58, %v9253_v43 }
 0x37b   : > { %v8834_v63 = vpop.eup %8833  ;;  %v7547_v56 = vcombine.high %v9264_v48, %v9264_v48 }
 0x37c   : > { %v1381_v0 = vsel %vm1217_vm12, %v8834_v63, 0.0 }
 0x37d   : > { %v1382_v4 = vrot.slane %v1381_v0, 4  ;;  %v7564_v60 = vrot.slane %v7547_v56, %v9276_v55 }
 0x37f   : > { %v8836_v5 = vpop.eup %8835  ;;  %v1383_v6 = vadd.f32 %v1382_v4, %v1381_v0  ;;  %v7572_v0 = vrot.slane %v7544_v62, %v9276_v55  ;;  %v7548_v4 = vcombine.high %v7544_v62, %v7544_v62 }
 0x380   : > { %v1388_v8 = vsel %vm1217_vm12, %v8836_v5, 0.0 }
 0x381   : > { %v1384_v11 = vrot.slane %v1383_v6, 2  ;;  %v1389_v12 = vrot.slane %v1388_v8, 4 }
 0x383   : > { %v1385_v13 = vadd.f32 %v1384_v11, %v1383_v6  ;;  %v1390_v14 = vadd.f32 %v1389_v12, %v1388_v8  ;;  %v7631_v6 = vcombine.high %v7629_v59, %v7629_v59  ;;  %v7580_v8 = vrot.slane %v7548_v4, %v9276_v55 }
 0x385   : > { %v1391_v15 = vrot.slane %v1390_v14, 2  ;;  %v1386_v16 = vrot.slane %v1385_v13, 1  ;;  %v9296_v12 = vrot.slane %v7631_v6, %v9253_v43 }
 0x387   : > { %v1392_v19 = vadd.f32 %v1391_v15, %v1390_v14  ;;  %v1387_v20 = vadd.f32 %v1386_v16, %v1385_v13  ;;  %v7647_v15 = vcombine.high %v9296_v12, %v9296_v12 }
 0x389   : > { %8837 = vrcp.f32 %v1387_v20  ;;  %v1393_v21 = vrot.slane %v1392_v19, 1 }
 0x38b   : > { %v1394_v22 = vadd.f32 %v1393_v21, %v1392_v19  ;;  %v7675_v19 = vrot.slane %v7647_v15, %v9253_v43 }
 0x38d   : > { %8839 = vrcp.f32 %v1394_v22  ;;  %v7703_v20 = vrot.slane %v7675_v19, %v9276_v55  ;;  %v7679_v21 = vcombine.high %v7675_v19, %v7675_v19 }
 0x38f   : > { %v7711_v22 = vrot.slane %v7679_v21, %v9276_v55 }
 0x393   : > { %v8838_v25 = vpop.eup %8837 }
 0x394   : > { %v1397_v27 = vmul.f32 %v8838_v25, %v8834_v63  ;;  %v9288_v63 = vrot.slane %v7629_v59, %v9253_v43  ;;  %v1422_v25 = vsub.s32 1, %v9129_v61 }
 0x396   : > { %v1406_v28 = vmul.f32 %v7857_v26, %v1397_v27 }
 0x397   : > { %v8840_v31 = vpop.eup %8839 }
 0x398   : > { %v1408_v57 = vsel %vm1217_vm12, %v1406_v28, 0.0  ;;  %v1398_v32 = vmul.f32 %v8840_v31, %v8836_v5  ;;  %v7646_v5 = vcombine.high %v9288_v63, %v9288_v63  ;;  %v1430_v28 = vsub.s32 3, %v9129_v61 }
 0x399   : > { %1409 = vadd.xlane.f32.xlu1 %v1408_v57  ;;  %v1434_v31 = vsub.s32 4, %v9129_v61  ;;  %v1438_v57 = vsub.s32 5, %v9129_v61 }
 0x39a   : > { %1947 = vxpose.xlu0.b32.start.end [1/1] (short) (narrow) %v1398_v32, 8  ;;  %v1407_v33 = vmul.f32 %v7857_v26, %v1398_v32  ;;  %v7668_v11 = vrot.slane %v7646_v5, %v9253_v43  ;;  %v1426_v26 = vsub.s32 2, %v9129_v61  ;;  %v1442_v32 = vsub.s32 6, %v9129_v61 }
 0x39c   : > { %v1411_v34 = vsel %vm1217_vm12, %v1407_v33, 0.0  ;;  %v7687_v13 = vrot.slane %v7668_v11, %v9276_v55  ;;  %v7678_v14 = vcombine.high %v7668_v11, %v7668_v11 }
 0x39d   : > { %1412 = vadd.xlane.f32.xlu1 %v1411_v34 }
 0x39e   : > { %v7695_v16 = vrot.slane %v7678_v14, %v9276_v55 }
 0x3ae   : > { %1695 = vperm.xlu1 %8821, %v1692_v39  }
 0x3c3   : > { %7346 = vperm.xlu0 %8820, %v7343_v54  }
 0x3c7   : > { %7594 = vperm.xlu0 %8820, %v7564_v60  }
 0x3cb   : > { %7602 = vperm.xlu0 %8820, %v7572_v0  }
 0x3cf   : > { %7610 = vperm.xlu0 %8820, %v7580_v8  }
 0x3d3   : > { %7717 = vperm.xlu0 %8820, %v7687_v13  }
 0x3d7   : > { %7725 = vperm.xlu0 %8820, %v7695_v16   ;;  %1826 = vxpose.xlu1.b32.start.end [1/1] (short) (narrow) %v1397_v27, 8  ;;  %v1446_v27 = vsub.s32 7, %v9129_v61 }
 0x3db   : > { %7733 = vperm.xlu0 %8820, %v7703_v20  }
 0x3df   : > { %7741 = vperm.xlu0 %8820, %v7711_v22  }
 0x426   : > { %v1410_v33 = vpop.xlane.xlu1 %1409 }
 0x427   : > { %v1419_v34 = vrot.slane %v1410_v33, %v9276_v55  ;;  %v1423_v37 = vrot.slane %v1410_v33, %v1422_v25  ;;  %v1427_v38 = vrot.slane %v1410_v33, %v1426_v26  ;;  %v1431_v39 = vrot.slane %v1410_v33, %v1430_v28 }
 0x428   : > { %v1435_v40 = vrot.slane %v1410_v33, %v1434_v31  ;;  %v1439_v44 = vrot.slane %v1410_v33, %v1438_v57  ;;  %v1443_v46 = vrot.slane %v1410_v33, %v1442_v32  ;;  %v1447_v47 = vrot.slane %v1410_v33, %v1446_v27 }
 0x429   : > { %v1496_v51 = vmul.f32 %v1419_v34, %v9041_v2  ;;  %v1497_v53 = vmul.f32 %v1423_v37, %v9050_v7  ;;  %v1498_v54 = vmul.f32 %v1427_v38, %v9038_v1  ;;  %v1499_v56 = vmul.f32 %v1431_v39, %v9054_v9 }
 0x42a   : > { %v1413_v58 = vpop.xlane.xlu1 %1412  ;;  %v1500_v59 = vmul.f32 %v1435_v40, %v9066_v17  ;;  %v1501_v60 = vmul.f32 %v1439_v44, %v9076_v23  ;;  %v1502_v62 = vmul.f32 %v1443_v46, %v9086_v29  ;;  %v1503_v0 = vmul.f32 %v1447_v47, %v9096_v35 }
 0x42b   : > { %v1512_v4 = vsel %vm651_vm0, %v1496_v51, 0.0  ;;  %v1513_v5 = vsel %vm651_vm0, %v1497_v53, 0.0  ;;  %v1451_v6 = vrot.slane %v1413_v58, %v9276_v55  ;;  %v1455_v8 = vrot.slane %v1413_v58, %v1422_v25 }
 0x42c   : > { %v1459_v11 = vrot.slane %v1413_v58, %v1426_v26  ;;  %v1463_v13 = vrot.slane %v1413_v58, %v1430_v28  ;;  %v1467_v14 = vrot.slane %v1413_v58, %v1434_v31  ;;  %v1471_v15 = vrot.slane %v1413_v58, %v1438_v57 }
 0x42d   : > { %v1504_v16 = vmul.f32 %v1451_v6, %v9044_v3  ;;  %v1505_v19 = vmul.f32 %v1455_v8, %v9057_v10  ;;  %v1514_v20 = vadd.f32 %v1513_v5, %v1512_v4  ;;  %v1515_v21 = vsel %vm651_vm0, %v1498_v54, 0.0 }
 0x42e   : > { %v1506_v22 = vmul.f32 %v1459_v11, %v9069_v18  ;;  %v1507_v33 = vmul.f32 %v1463_v13, %v9079_v24  ;;  %v1517_v34 = vsel %vm651_vm0, %v1499_v56, 0.0  ;;  %v1519_v37 = vsel %vm651_vm0, %v1500_v59, 0.0  ;;  %v9338_v44 = vpop.permute.xlu1 %1695 }
 0x42f   : > { %v1527_v25 = vsel %vm651_vm0, %v1504_v16, 0.0  ;;  %v1528_v26 = vsel %vm651_vm0, %v1505_v19, 0.0  ;;  %v1516_v28 = vadd.f32 %v1515_v21, %v1514_v20  ;;  %v1521_v3 = vsel %vm651_vm0, %v1501_v60, 0.0 }
 0x430   : > { %v1523_v10 = vsel %vm651_vm0, %v1502_v62, 0.0  ;;  %v1525_v31 = vsel %vm651_vm0, %v1503_v0, 0.0  ;;  %v1475_v57 = vrot.slane %v1413_v58, %v1442_v32  ;;  %v1479_v38 = vrot.slane %v1413_v58, %v1446_v27 }
 0x431   : > { %v1518_v18 = vadd.f32 %v1517_v34, %v1516_v28  ;;  %v1508_v24 = vmul.f32 %v1467_v14, %v9089_v30  ;;  %v1509_v39 = vmul.f32 %v1471_v15, %v9099_v36  ;;  %v1529_v40 = vadd.f32 %v1528_v26, %v1527_v25 }
 0x432   : > { %v1510_v46 = vmul.f32 %v1475_v57, %v9106_v41  ;;  %v1511_v47 = vmul.f32 %v1479_v38, %v9109_v42  ;;  %v1530_v51 = vsel %vm651_vm0, %v1506_v22, 0.0  ;;  %v1532_v53 = vsel %vm651_vm0, %v1507_v33, 0.0 }
 0x433   : > { %v1520_v54 = vadd.f32 %v1519_v37, %v1518_v18  ;;  %v1531_v56 = vadd.f32 %v1530_v51, %v1529_v40  ;;  %v1534_v32 = vsel %vm651_vm0, %v1508_v24, 0.0  ;;  %v1536_v27 = vsel %vm651_vm0, %v1509_v39, 0.0 }
 0x434   : > { %v1538_v30 = vsel %vm651_vm0, %v1510_v46, 0.0  ;;  %v1540_v36 = vsel %vm651_vm0, %v1511_v47, 0.0  ;;  %v1698_v58 = vmul.f32 %v9338_v44, %v9041_v2  ;;  %v1699_v41 = vmul.f32 %v9338_v44, %v9050_v7 }
 0x435   : > { %v1522_v42 = vadd.f32 %v1521_v3, %v1520_v54  ;;  %v1533_v59 = vadd.f32 %v1532_v53, %v1531_v56  ;;  %v1700_v60 = vmul.f32 %v9338_v44, %v9038_v1  ;;  %v1701_v62 = vmul.f32 %v9338_v44, %v9054_v9 }
 0x436   : > { %v1702_v0 = vmul.f32 %v9338_v44, %v9066_v17  ;;  %v1703_v4 = vmul.f32 %v9338_v44, %v9076_v23  ;;  %v1704_v2 = vmul.f32 %v9338_v44, %v9086_v29  ;;  %v1705_v7 = vmul.f32 %v9338_v44, %v9096_v35  ;;  %v1542_v23 = vld [vmem:[%s10657_s7] sm:$0xff] }
 0x437   : > { %v1524_v5 = vadd.f32 %v1523_v10, %v1522_v42  ;;  %v1535_v6 = vadd.f32 %v1534_v32, %v1533_v59  ;;  %v1714_v8 = vsel %vm651_vm0, %v1698_v58, 0.0  ;;  %v1721_v1 = vsel %vm651_vm0, %v1699_v41, 0.0 }
 0x438   : > { %v1715_v11 = vrot.slane %v1714_v8, 4  ;;  %v1722_v9 = vrot.slane %v1721_v1, 4  ;;  %v1728_v13 = vsel %vm651_vm0, %v1700_v60, 0.0  ;;  %v1735_v17 = vsel %vm651_vm0, %v1701_v62, 0.0 }
 0x439   : > { %v1526_v14 = vadd.f32 %v1525_v31, %v1524_v5  ;;  %v1537_v29 = vadd.f32 %v1536_v27, %v1535_v6  ;;  %v1729_v15 = vrot.slane %v1728_v13, 4  ;;  %v1736_v35 = vrot.slane %v1735_v17, 4 }
 0x43a   : > { %v1716_v16 = vadd.f32 %v1715_v11, %v1714_v8  ;;  %v1723_v19 = vadd.f32 %v1722_v9, %v1721_v1  ;;  %v1742_v20 = vsel %vm651_vm0, %v1702_v0, 0.0  ;;  %v1749_v21 = vsel %vm651_vm0, %v1703_v4, 0.0  ;;  %v9387_v1 = vld [vmem:[%s9035_s3 + $0x20] sm:$0xf] }
 0x43b   : > { %8268 = vmatpush3.msk.msra.mxu1 %vm809_vm1, %v1526_v14  ;;  %v1539_v22 = vadd.f32 %v1538_v30, %v1537_v29  ;;  %v1730_v33 = vadd.f32 %v1729_v15, %v1728_v13  ;;  %v1737_v34 = vadd.f32 %v1736_v35, %v1735_v17  ;;  %v1743_v37 = vrot.slane %v1742_v20, 4  ;;  %v9393_v14 = vld [vmem:[%s9035_s3 + $0x24] sm:$0xf] }
 0x43c   : > { %8270 = vmatmul.mubr.msk.f32.vlgmr.msra.gmra.mrb[2].mxu1 %vm804_vm9, %v1542_v23  ;;  %8277 = vmatprep.subr.mxu1 %v8914_v52  ;;  %v1717_v25 = vrot.slane %v1716_v16, 2  ;;  %v1724_v26 = vrot.slane %v1723_v19, 2  ;;  %v1750_v28 = vrot.slane %v1749_v21, 4  ;;  %v1756_v3 = vsel %vm651_vm0, %v1704_v2, 0.0 }
 0x43d   : > { %v1541_v10 = vadd.f32 %v1540_v36, %v1539_v22  ;;  %v1731_v31 = vrot.slane %v1730_v33, 2  ;;  %v1738_v57 = vrot.slane %v1737_v34, 2  ;;  %v1744_v38 = vadd.f32 %v1743_v37, %v1742_v20  ;;  %8279 = vmatprep.mubr.msk.f32.mxu1 %vm8915_vm11, %v8914_v52  ;;  %v9405_v22 = vld [vmem:[%s9035_s3 + $0x2c] sm:$0xf] }
 0x43e   : > { %v1718_v18 = vadd.f32 %v1717_v25, %v1716_v16  ;;  %v1725_v24 = vadd.f32 %v1724_v26, %v1723_v19  ;;  %v1751_v39 = vadd.f32 %v1750_v28, %v1749_v21  ;;  %v1757_v40 = vrot.slane %v1756_v3, 4  ;;  %v9399_v16 = vld [vmem:[%s9035_s3 + $0x28] sm:$0xf]  ;;  %v9416_v28 = vld [vmem:[%s9035_s3 + $0x34] sm:$0xf] }
 0x43f   : > { %8273 = vmatpush3.msk.msra.mxu0 %vm809_vm1, %v1541_v10  ;;  %v1732_v46 = vadd.f32 %v1731_v31, %v1730_v33  ;;  %v1739_v47 = vadd.f32 %v1738_v57, %v1737_v34  ;;  %v1745_v51 = vrot.slane %v1744_v38, 2  ;;  %v1763_v53 = vsel %vm651_vm0, %v1705_v7, 0.0  ;;  %v9410_v34 = vld [vmem:[%s9035_s3 + $0x30] sm:$0xf]  ;;  %v9421_v10 = vld [vmem:[%s9035_s3 + $0x38] sm:$0xf] }
 0x440   : > { %8275 = vmatmul.mubr.msk.f32.vlgmr.msra.gmra.mrb[8].mxu0 %vm804_vm9, %v1542_v23  ;;  %8282 = vmatprep.subr.mxu0 %v8914_v52  ;;  %v1719_v54 = vrot.slane %v1718_v18, 1  ;;  %v1726_v56 = vrot.slane %v1725_v24, 1  ;;  %v1752_v32 = vrot.slane %v1751_v39, 2  ;;  %v1758_v27 = vadd.f32 %v1757_v40, %v1756_v3 }
 0x441   : > { %v1733_v30 = vrot.slane %v1732_v46, 1  ;;  %v1740_v36 = vrot.slane %v1739_v47, 1  ;;  %v1746_v58 = vadd.f32 %v1745_v51, %v1744_v38  ;;  %v1764_v41 = vrot.slane %v1763_v53, 4  ;;  %8284 = vmatprep.mubr.msk.f32.mxu0 %vm8915_vm11, %v8914_v52  ;;  %v9426_v38 = vld [vmem:[%s9035_s3 + $0x3c] sm:$0xf] }
 0x442   : > { %v1720_v42 = vadd.f32 %v1719_v54, %v1718_v18  ;;  %v1727_v59 = vadd.f32 %v1726_v56, %v1725_v24  ;;  %v1753_v60 = vadd.f32 %v1752_v32, %v1751_v39  ;;  %v1759_v62 = vrot.slane %v1758_v27, 2 }
 0x443   : > { %v1734_v0 = vadd.f32 %v1733_v30, %v1732_v46  ;;  %v1741_v4 = vadd.f32 %v1740_v36, %v1739_v47  ;;  %v1747_v2 = vrot.slane %v1746_v58, 1  ;;  %v1765_v7 = vadd.f32 %v1764_v41, %v1763_v53 }
 0x444   : > { %v1754_v5 = vrot.slane %v1753_v60, 1  ;;  %v1760_v6 = vadd.f32 %v1759_v62, %v1758_v27  ;;  %v1866_v8 = vsel %vm783_vm2, %v1727_v59, %v1720_v42  ;;  %v1706_v11 = vmul.f32 %v9387_v1, %v9338_v44 }
 0x445   : > { %v1748_v9 = vadd.f32 %v1747_v2, %v1746_v58  ;;  %v1766_v13 = vrot.slane %v1765_v7, 2  ;;  %v1867_v17 = vsel %vm785_vm3, %v1734_v0, %v1866_v8  ;;  %v1707_v23 = vmul.f32 %v9393_v14, %v9338_v44 }
 0x446   : > { %v1755_v29 = vadd.f32 %v1754_v5, %v1753_v60  ;;  %v1761_v15 = vrot.slane %v1760_v6, 1  ;;  %v1868_v35 = vsel %vm787_vm4, %v1741_v4, %v1867_v17  ;;  %v1708_v19 = vmul.f32 %v9399_v16, %v9338_v44 }
 0x447   : > { %v1767_v20 = vadd.f32 %v1766_v13, %v1765_v7  ;;  %v1869_v21 = vsel %vm789_vm5, %v1748_v9, %v1868_v35  ;;  %v1709_v33 = vmul.f32 %v9405_v22, %v9338_v44  ;;  %v1710_v37 = vmul.f32 %v9410_v34, %v9338_v44 }
 0x448   : > { %v1762_v25 = vadd.f32 %v1761_v15, %v1760_v6  ;;  %v1870_v26 = vsel %vm791_vm6, %v1755_v29, %v1869_v21  ;;  %v1711_v3 = vmul.f32 %v9416_v28, %v9338_v44  ;;  %v1712_v31 = vmul.f32 %v9421_v10, %v9338_v44 }
 0x449   : > { %v1768_v57 = vrot.slane %v1767_v20, 1  ;;  %v1713_v18 = vmul.f32 %v9426_v38, %v9338_v44  ;;  %v1770_v24 = vsel %vm651_vm0, %v1706_v11, 0.0  ;;  %v1777_v39 = vsel %vm651_vm0, %v1707_v23, 0.0 }
 0x44a   : > { %v1871_v40 = vsel %vm793_vm7, %v1762_v25, %v1870_v26  ;;  %v1771_v46 = vrot.slane %v1770_v24, 4  ;;  %v1778_v47 = vrot.slane %v1777_v39, 4  ;;  %v1784_v51 = vsel %vm651_vm0, %v1708_v19, 0.0 }
 0x44b   : > { %v1769_v53 = vadd.f32 %v1768_v57, %v1767_v20  ;;  %v1785_v54 = vrot.slane %v1784_v51, 4  ;;  %v1791_v56 = vsel %vm651_vm0, %v1709_v33, 0.0  ;;  %v1798_v32 = vsel %vm651_vm0, %v1710_v37, 0.0 }
 0x44c   : > { %v1772_v27 = vadd.f32 %v1771_v46, %v1770_v24  ;;  %v1779_v30 = vadd.f32 %v1778_v47, %v1777_v39  ;;  %v1792_v36 = vrot.slane %v1791_v56, 4  ;;  %v1799_v44 = vrot.slane %v1798_v32, 4 }
 0x44d   : > { %v1872_v58 = vsel %vm795_vm8, %v1769_v53, %v1871_v40  ;;  %v1786_v41 = vadd.f32 %v1785_v54, %v1784_v51  ;;  %v1805_v42 = vsel %vm651_vm0, %v1711_v3, 0.0  ;;  %v1812_v59 = vsel %vm651_vm0, %v1712_v31, 0.0 }
 0x44e   : > { %8278 = vmatpush3.msra.mxu1 %v1872_v58  ;;  %v1773_v60 = vrot.slane %v1772_v27, 2  ;;  %v1780_v62 = vrot.slane %v1779_v30, 2  ;;  %v1793_v0 = vadd.f32 %v1792_v36, %v1791_v56  ;;  %v1800_v4 = vadd.f32 %v1799_v44, %v1798_v32 }
 0x44f   : > { %v1787_v2 = vrot.slane %v1786_v41, 2  ;;  %v1806_v7 = vrot.slane %v1805_v42, 4  ;;  %v1813_v5 = vrot.slane %v1812_v59, 4  ;;  %v1819_v6 = vsel %vm651_vm0, %v1713_v18, 0.0 }
 0x450   : > { %v1774_v8 = vadd.f32 %v1773_v60, %v1772_v27  ;;  %v1781_v11 = vadd.f32 %v1780_v62, %v1779_v30  ;;  %v1794_v9 = vrot.slane %v1793_v0, 2  ;;  %v1801_v13 = vrot.slane %v1800_v4, 2 }
 0x451   : > { %v1788_v17 = vadd.f32 %v1787_v2, %v1786_v41  ;;  %v1807_v23 = vadd.f32 %v1806_v7, %v1805_v42  ;;  %v1814_v29 = vadd.f32 %v1813_v5, %v1812_v59  ;;  %v1820_v15 = vrot.slane %v1819_v6, 4 }
 0x452   : > { %v1775_v35 = vrot.slane %v1774_v8, 1  ;;  %v1782_v19 = vrot.slane %v1781_v11, 1  ;;  %v1795_v20 = vadd.f32 %v1794_v9, %v1793_v0  ;;  %v1802_v21 = vadd.f32 %v1801_v13, %v1800_v4  ;;  %v1963_v4 = vpop.trf.xlu0 }
 0x453   : > { %v1789_v33 = vrot.slane %v1788_v17, 1  ;;  %v1808_v37 = vrot.slane %v1807_v23, 2  ;;  %v1815_v25 = vrot.slane %v1814_v29, 2  ;;  %v1821_v26 = vadd.f32 %v1820_v15, %v1819_v6 }
 0x454   : > { %v1776_v3 = vadd.f32 %v1775_v35, %v1774_v8  ;;  %v1783_v31 = vadd.f32 %v1782_v19, %v1781_v11  ;;  %v1796_v57 = vrot.slane %v1795_v20, 1  ;;  %v1803_v18 = vrot.slane %v1802_v21, 1 }
 0x455   : > { %v1790_v24 = vadd.f32 %v1789_v33, %v1788_v17  ;;  %v1809_v39 = vadd.f32 %v1808_v37, %v1807_v23  ;;  %v1816_v40 = vadd.f32 %v1815_v25, %v1814_v29  ;;  %v1822_v46 = vrot.slane %v1821_v26, 2 }
 0x456   : > { %v1797_v47 = vadd.f32 %v1796_v57, %v1795_v20  ;;  %v1804_v51 = vadd.f32 %v1803_v18, %v1802_v21  ;;  %v1987_v53 = vsel %vm783_vm2, %v1783_v31, %v1776_v3  ;;  %v7523_v9 = vrot.slane %v9259_v45, %v9253_v43 }
 0x457   : > { %v1810_v54 = vrot.slane %v1809_v39, 1  ;;  %v1817_v56 = vrot.slane %v1816_v40, 1  ;;  %v1823_v32 = vadd.f32 %v1822_v46, %v1821_v26  ;;  %v1988_v27 = vsel %vm785_vm3, %v1790_v24, %v1987_v53  ;;  %v1842_v30 = vpop.trf.xlu1 }
 0x458   : > { %v1989_v36 = vsel %vm787_vm4, %v1797_v47, %v1988_v27  ;;  %8280 = vmatmul.mubr.msk.f32.vlgmr.msra.gmra.mrb[4].mxu1 %vm1217_vm12, %v1842_v30  ;;  %v7552_v17 = vrot.slane %v7523_v9, %v9276_v55  ;;  %v7556_v29 = vrot.slane %v9264_v48, %v9276_v55  ;;  %v7545_v15 = vcombine.high %v7523_v9, %v7523_v9 }
 0x459   : > { %v1811_v44 = vadd.f32 %v1810_v54, %v1809_v39  ;;  %v1818_v58 = vadd.f32 %v1817_v56, %v1816_v40  ;;  %v1824_v41 = vrot.slane %v1823_v32, 1  ;;  %v1990_v42 = vsel %vm789_vm5, %v1804_v51, %v1989_v36 }
 0x45a   : > { %v7560_v35 = vrot.slane %v7545_v15, %v9276_v55  ;;  %v7530_v19 = vrot.slane %v9267_v49, %v9253_v43  ;;  %v7654_v33 = vrot.slane %v9288_v63, %v9253_v43  ;;  %v7661_v49 = vrot.slane %v9296_v12, %v9253_v43  ;;  %v2320_v43 = vld [vmem:[%s10660_s10] sm:$0xff] }
 0x45b   : > { %v1825_v59 = vadd.f32 %v1824_v41, %v1823_v32  ;;  %v1991_v60 = vsel %vm791_vm6, %v1811_v44, %v1990_v42  ;;  %v2068_v12 = vld [vmem:[%s10659_s9] sm:$0xff]  ;;  %v8917_v9 = vmov 1983009808  }
 0x45c   : > { %v1992_v62 = vsel %vm793_vm7, %v1818_v58, %v1991_v60  ;;  %v7568_v45 = vrot.slane %v7530_v19, %v9276_v55  ;;  %v7546_v20 = vcombine.high %v7530_v19, %v7530_v19  ;;  %v7683_v48 = vrot.slane %v7654_v33, %v9276_v55  ;;  %v8882_v15 = vld [vmem:[%s9035_s3 + $0x4] sm:$0xf]  ;;  %v8883_v19 = vld [vmem:[%s9035_s3 + $0x8] sm:$0xf] }
 0x45d   : > { %v1993_v0 = vsel %vm795_vm8, %v1825_v59, %v1992_v62  ;;  %v7676_v37 = vcombine.high %v7654_v33, %v7654_v33  ;;  %v7699_v26 = vrot.slane %v7661_v49, %v9276_v55  ;;  %v7677_v3 = vcombine.high %v7661_v49, %v7661_v49 }
 0x45e   : > { %8283 = vmatpush3.msra.mxu0 %v1993_v0  ;;  %v7576_v21 = vrot.slane %v7546_v20, %v9276_v55 }
 0x45f   : > { %8285 = vmatmul.mubr.msk.f32.vlgmr.msra.gmra.mrb[10].mxu0 %vm1217_vm12, %v1963_v4  ;;  %v7691_v25 = vrot.slane %v7676_v37, %v9276_v55  ;;  %v7707_v31 = vrot.slane %v7677_v3, %v9276_v55  ;;  %v2069_v55 = vld [vmem:[%s10659_s9 + $0x8] sm:$0xff]  ;;  %v7882_v37 = vpack.c.bf16 %v9393_v14, %v9387_v1 }
 0x50f   : > { %v1615_v2 = vpop.f32.mrb[2].mxu1 }
 0x510   : > { %v8271_v7 = vpop.f32.mrb[3].mxu1  ;;  %2070 = vxpose.xlu1.b32.start.end [1/1] (short) (narrow) %v1615_v2, 16 }
 0x513   : > { %v1688_v5 = vpop.f32.mrb[8].mxu0 }
 0x514   : > { %v8276_v6 = vpop.f32.mrb[9].mxu0 }
 0x515   : > { %2183 = vxpose.xlu1.b32.start.end [1/1] (short) (narrow) %v1688_v5, 16  ;;  %v2321_v5 = vld [vmem:[%s10660_s10 + $0x8] sm:$0xff] }
 0x52b   : > { %v1943_v8 = vpop.f32.mrb[4].mxu1 }
 0x52c   : > { %v8281_v11 = vpop.f32.mrb[5].mxu1  ;;  %8287 = vmatprep.subr.mxu1 %v1943_v8 }
 0x52d   : > { %8288 = vmatpush3.msra.mxu1 %v1943_v8 }
 0x532   : > { %v2064_v13 = vpop.f32.mrb[10].mxu0 }
 0x533   : > { %8292 = vmatprep.subr.mxu0 %v2064_v13  ;;  %v8286_v23 = vpop.f32.mrb[11].mxu0 }
 0x534   : > { %8293 = vmatpush3.msra.mxu0 %v2064_v13  ;;  %v2569_v13 = vunpack.c.l.s4 %v8917_v9 }
 0x537   : > { %7582 = vperm.xlu1 %8821, %v7552_v17   ;;  %v2570_v17 = vunpack.c.0.s8 %v2569_v13 }
 0x539   : > { %v9488_v23 = vsub.s32 %v2570_v17, %v9129_v61  ;;  %v7883_v61 = vpack.c.bf16 %v9405_v22, %v9399_v16 }
 0x53b   : > { %7586 = vperm.xlu1 %8821, %v7556_v29   ;;  %v8881_v29 = vld [vmem:[%s9035_s3] sm:$0xf]  ;;  %v2678_v49 = vrot.slane %v7883_v61, %v9488_v23 }
 0x53c   : > { %v8022_v61 = vld [vmem:[%s10662_s12] sm:$0xff]  }
 0x53f   : > { %7590 = vperm.xlu1 %8821, %v7560_v35   ;;  %v7876_v35 = vpack.c.bf16 %v8882_v15, %v8881_v29 }
 0x543   : > { %7598 = vperm.xlu1 %8821, %v7568_v45   ;;  %v8884_v45 = vld [vmem:[%s9035_s3 + $0xc] sm:$0xf] }
 0x544   : > { %v7877_v20 = vpack.c.bf16 %v8884_v45, %v8883_v19 }
 0x546   : > { %v2581_v33 = vrot.slane %v7877_v20, %v9488_v23 }
 0x547   : > { %7606 = vperm.xlu1 %8821, %v7576_v21   ;;  %v2574_v21 = vrot.slane %v7876_v35, %v9488_v23 }
 0x54b   : > { %7713 = vperm.xlu1 %8821, %v7683_v48   ;;  %v9496_v48 = vcombine.low %v2574_v21, %v2581_v33 }
 0x54f   : > { %7721 = vperm.xlu1 %8821, %v7691_v25   ;;  %v2671_v25 = vrot.slane %v7882_v37, %v9488_v23 }
 0x553   : > { %7729 = vperm.xlu1 %8821, %v7699_v26   ;;  %v9506_v26 = vcombine.low %v2671_v25, %v2678_v49  ;;  %v8033_v25 = vld [vmem:[%s10662_s12 + $0x8] sm:$0xff]   ;;  %v8034_v49 = vld [vmem:[%s10662_s12 + $0x10] sm:$0xff]  }
 0x557   : > { %7737 = vperm.xlu1 %8821, %v7707_v31  }
 0x590   : > { %v2086_v57 = vpop.trf.xlu1 }
 0x591   : > { %8289 = vmatprep.mubr.msk.f32.mxu1 %vm1217_vm12, %v2086_v57 }
 0x594   : > { %v2087_v63 = vpop.trf.xlu1 }
 0x595   : > { %8290 = vmatmul.mubr.msk.f32.vlgmr.msra.gmra.mrb[6].mxu1 %vm1217_vm12, %v2087_v63 }
 0x596   : > { %8301 = vmatprep.mubr.msk.f32.mxu1 %vm1038_vm10, %v2320_v43 }
 0x598   : > { %v2199_v18 = vpop.trf.xlu1 }
 0x599   : > { %8294 = vmatprep.mubr.msk.f32.mxu0 %vm1217_vm12, %v2199_v18 }
 0x59c   : > { %v2200_v24 = vpop.trf.xlu1 }
 0x59d   : > { %8295 = vmatmul.mubr.msk.f32.vlgmr.msra.gmra.mrb[12].mxu0 %vm1217_vm12, %v2200_v24 }
 0x59e   : > { %8308 = vmatprep.mubr.msk.f32.mxu0 %vm1038_vm10, %v2320_v43 }
 0x668   : > { %v8291_v39 = vpop.f32.mrb[6].mxu1 }
 0x669   : > { %v2180_v40 = vadd.f32 %v8291_v39, %v2069_v55  ;;  %v2174_v46 = vpop.f32.mrb[7].mxu1 }
 0x66a   : > { %v2175_v47 = vadd.f32 %v2174_v46, %v2068_v12 }
 0x66b   : > { %v7869_v51 = vmul.f32 -1.442695, %v2180_v40 }
 0x66c   : > { %v7868_v53 = vmul.f32 -1.442695, %v2175_v47 }
 0x66d   : > { %8841 = vpow2.f32 %v7869_v51 }
 0x66e   : > { %8843 = vpow2.f32 %v7868_v53 }
 0x670   : > { %v8296_v54 = vpop.f32.mrb[12].mxu0 }
 0x671   : > { %v2293_v56 = vadd.f32 %v8296_v54, %v2069_v55  ;;  %v2287_v32 = vpop.f32.mrb[13].mxu0 }
 0x672   : > { %v2288_v27 = vadd.f32 %v2287_v32, %v2068_v12 }
 0x673   : > { %v7871_v30 = vmul.f32 -1.442695, %v2293_v56 }
 0x674   : > { %v7870_v36 = vmul.f32 -1.442695, %v2288_v27 }
 0x675   : > { %8845 = vpow2.f32 %v7871_v30 }
 0x676   : > { %8847 = vpow2.f32 %v7870_v36 }
 0x677   : > { %v8842_v44 = vpop.eup %8841 }
 0x678   : > { %v8844_v58 = vpop.eup %8843  ;;  %v2309_v41 = vadd.f32 1.0, %v8842_v44 }
 0x679   : > { %v2308_v42 = vadd.f32 1.0, %v8844_v58 }
 0x67a   : > { %8849 = vrcp.f32 %v2309_v41 }
 0x67b   : > { %8851 = vrcp.f32 %v2308_v42 }
 0x67f   : > { %v8846_v59 = vpop.eup %8845 }
 0x680   : > { %v8848_v60 = vpop.eup %8847  ;;  %v2311_v62 = vadd.f32 1.0, %v8846_v59 }
 0x681   : > { %v2310_v0 = vadd.f32 1.0, %v8848_v60 }
 0x682   : > { %8853 = vrcp.f32 %v2311_v62 }
 0x683   : > { %8855 = vrcp.f32 %v2310_v0 }
 0x684   : > { %v8850_v4 = vpop.eup %8849 }
 0x685   : > { %v8852_v2 = vpop.eup %8851 }
 0x686   : > { %v8799_v7 = vpack.c.bf16 %v8850_v4, %v8852_v2 }
 0x688   : > { %8800 = vmatprep.subr.bf16.mxu1 %v8799_v7 }
 0x689   : > { %8802 = vmatpush3.bf16.msra.mxu1 %v8799_v7 }
 0x68c   : > { %v8854_v6 = vpop.eup %8853  ;;  %8302 = vmatmul.mubr.msk.f32.vlgmr.msra.gmra.mrb[8].mxu1 %vm1038_vm10, %v2321_v5 }
 0x68d   : > { %v8856_v8 = vpop.eup %8855  ;;  %8313 = vmatprep.mubr.msk.bf16.mxu1 %vm1038_vm10, %v9496_v48 }
 0x68e   : > { %v8803_v11 = vpack.c.bf16 %v8854_v6, %v8856_v8 }
 0x690   : > { %8804 = vmatprep.subr.bf16.mxu0 %v8803_v11 }
 0x691   : > { %8806 = vmatpush3.bf16.msra.mxu0 %v8803_v11 }
 0x694   : > { %8309 = vmatmul.mubr.msk.f32.vlgmr.msra.gmra.mrb[14].mxu0 %vm1038_vm10, %v2321_v5 }
 0x695   : > { %8319 = vmatprep.mubr.msk.bf16.mxu0 %vm1038_vm10, %v9506_v26 }
 0x75f   : > { %v8303_v3 = vpop.f32.mrb[8].mxu1 }
 0x760   : > { %v2479_v31 = vsel %vm1038_vm10, %v8303_v3, -inf  ;;  %v2394_v57 = vpop.f32.mrb[9].mxu1 }
 0x761   : > { %v2478_v63 = vsel %vm1038_vm10, %v2394_v57, -inf }
 0x762   : > { %v2480_v18 = vmax.f32 %v2478_v63, %v2479_v31  ;;  %v8886_v31 = vld [vmem:[%s9035_s3 + $0x14] sm:$0xf]  ;;  %v8887_v63 = vld [vmem:[%s9035_s3 + $0x18] sm:$0xf] }
 0x764   : > { %v2481_v1 = vrot.slane %v2480_v18, 4 }
 0x766   : > { %v2482_v14 = vmax.f32 %v2480_v18, %v2481_v1  ;;  %v8888_v18 = vld [vmem:[%s9035_s3 + $0x1c] sm:$0xf] }
 0x767   : > { %v8310_v24 = vpop.f32.mrb[14].mxu0  ;;  %v7879_v1 = vpack.c.bf16 %v8888_v18, %v8887_v63 }
 0x768   : > { %v2483_v16 = vrot.slane %v2482_v14, 2  ;;  %v2488_v22 = vsel %vm1038_vm10, %v8310_v24, -inf  ;;  %v2469_v43 = vpop.f32.mrb[15].mxu0 }
 0x769   : > { %v2487_v55 = vsel %vm1038_vm10, %v2469_v43, -inf }
 0x76a   : > { %v2484_v12 = vmax.f32 %v2482_v14, %v2483_v16  ;;  %v2489_v39 = vmax.f32 %v2487_v55, %v2488_v22  ;;  %v8023_v14 = vunpack.c.l.bf16 %v8022_v61  ;;  %v8027_v16 = vunpack.c.l.bf16 %v8033_v25 }
 0x76b   : > { %v8028_v22 = vunpack.c.h.bf16 %v8033_v25  ;;  %v8031_v55 = vunpack.c.l.bf16 %v8034_v49 }
 0x76c   : > { %v2485_v40 = vrot.slane %v2484_v12, 1  ;;  %v2490_v46 = vrot.slane %v2489_v39, 4 }
 0x76e   : > { %v2486_v47 = vmax.f32 %v2484_v12, %v2485_v40  ;;  %v2491_v51 = vmax.f32 %v2489_v39, %v2490_v46  ;;  %v8032_v12 = vunpack.c.h.bf16 %v8034_v49 }
 0x770   : > { %v2496_v53 = vsub.f32 %v2394_v57, %v2486_v47  ;;  %v2497_v54 = vsub.f32 %v8303_v3, %v2486_v47  ;;  %v2492_v56 = vrot.slane %v2491_v51, 2  ;;  %v8885_v3 = vld [vmem:[%s9035_s3 + $0x10] sm:$0xf]  ;;  %v2598_v47 = vrot.slane %v7879_v1, %v9488_v23 }
 0x771   : > { %v7878_v57 = vpack.c.bf16 %v8886_v31, %v8885_v3 }
 0x772   : > { %v2500_v32 = vmul.f32 1.442695, %v2496_v53  ;;  %v2502_v27 = vmul.f32 1.442695, %v2497_v54  ;;  %v2493_v30 = vmax.f32 %v2491_v51, %v2492_v56 }
 0x773   : > { %v2591_v46 = vrot.slane %v7878_v57, %v9488_v23 }
 0x774   : > { %8857 = vpow2.f32 %v2500_v32  ;;  %v2494_v36 = vrot.slane %v2493_v30, 1 }
 0x775   : > { %8859 = vpow2.f32 %v2502_v27 }
 0x776   : > { %v2495_v44 = vmax.f32 %v2493_v30, %v2494_v36 }
 0x778   : > { %v2498_v58 = vsub.f32 %v2469_v43, %v2495_v44  ;;  %v2499_v41 = vsub.f32 %v8310_v24, %v2495_v44  ;;  %v8024_v24 = vunpack.c.h.bf16 %v8022_v61 }
 0x77a   : > { %v2504_v42 = vmul.f32 1.442695, %v2498_v58  ;;  %v2506_v59 = vmul.f32 1.442695, %v2499_v41  ;;  %v7884_v58 = vpack.c.bf16 %v9416_v28, %v9410_v34  ;;  %v7885_v41 = vpack.c.bf16 %v9426_v38, %v9421_v10 }
 0x77c   : > { %8861 = vpow2.f32 %v2504_v42  ;;  %v2599_v42 = vcombine.low %v2591_v46, %v2598_v47 }
 0x77d   : > { %8863 = vpow2.f32 %v2506_v59 }
 0x77e   : > { %v8858_v60 = vpop.eup %8857 }
 0x77f   : > { %v8860_v62 = vpop.eup %8859  ;;  %v2508_v0 = vsel %vm1038_vm10, %v8858_v60, 0.0 }
 0x780   : > { %v2509_v4 = vsel %vm1038_vm10, %v8860_v62, 0.0 }
 0x781   : > { %v2510_v2 = vadd.f32 %v2509_v4, %v2508_v0  ;;  %v2688_v0 = vrot.slane %v7884_v58, %v9488_v23  ;;  %v2695_v4 = vrot.slane %v7885_v41, %v9488_v23 }
 0x783   : > { %v2511_v7 = vrot.slane %v2510_v2, 4 }
 0x785   : > { %v2512_v5 = vadd.f32 %v2511_v7, %v2510_v2 }
 0x786   : > { %v8862_v6 = vpop.eup %8861 }
 0x787   : > { %v8864_v8 = vpop.eup %8863  ;;  %v2513_v11 = vrot.slane %v2512_v5, 2  ;;  %v2517_v9 = vsel %vm1038_vm10, %v8862_v6, 0.0 }
 0x788   : > { %v2518_v13 = vsel %vm1038_vm10, %v8864_v8, 0.0 }
 0x789   : > { %v2514_v17 = vadd.f32 %v2513_v11, %v2512_v5  ;;  %v2519_v29 = vadd.f32 %v2518_v13, %v2517_v9  ;;  %v2696_v11 = vcombine.low %v2688_v0, %v2695_v4 }
 0x78b   : > { %v2515_v15 = vrot.slane %v2514_v17, 1  ;;  %v2520_v35 = vrot.slane %v2519_v29, 4 }
 0x78d   : > { %v2516_v19 = vadd.f32 %v2515_v15, %v2514_v17  ;;  %v2521_v45 = vadd.f32 %v2520_v35, %v2519_v29 }
 0x78f   : > { %8865 = vrcp.f32 %v2516_v19  ;;  %v2522_v20 = vrot.slane %v2521_v45, 2 }
 0x791   : > { %v2523_v21 = vadd.f32 %v2522_v20, %v2521_v45 }
 0x793   : > { %v2524_v33 = vrot.slane %v2523_v21, 1 }
 0x795   : > { %v2525_v37 = vadd.f32 %v2524_v33, %v2523_v21 }
 0x797   : > { %8867 = vrcp.f32 %v2525_v37 }
 0x799   : > { %v8866_v43 = vpop.eup %8865 }
 0x79a   : > { %v2528_v39 = vmul.f32 %v8866_v43, %v8858_v60  ;;  %v2529_v40 = vmul.f32 %v8866_v43, %v8860_v62 }
 0x79c   : > { %v2552_v51 = vmul.f32 %v8023_v14, %v2528_v39  ;;  %v2553_v53 = vmul.f32 %v8024_v24, %v2529_v40  ;;  %v2833_v54 = vmul.f32 %v8027_v16, %v2528_v39  ;;  %v2834_v56 = vmul.f32 %v8028_v22, %v2529_v40 }
 0x79d   : > { %v3018_v32 = vmul.f32 %v8031_v55, %v2528_v39  ;;  %v3019_v27 = vmul.f32 %v8032_v12, %v2529_v40 }
 0x79e   : > { %v2556_v30 = vpack.c.bf16 %v2553_v53, %v2552_v51  ;;  %v2837_v36 = vpack.c.bf16 %v2834_v56, %v2833_v54 }
 0x79f   : > { %v3022_v44 = vpack.c.bf16 %v3019_v27, %v3018_v32 }
 0x7a0   : > { %8311 = vmatprep.subr.bf16.mxu1 %v2556_v30 }
 0x7a1   : > { %v8868_v59 = vpop.eup %8867  ;;  %8312 = vmatpush3.bf16.msra.mxu1 %v2556_v30 }
 0x7a2   : > { %8323 = vmatprep.subr.bf16.mxu1 %v2837_v36  ;;  %v2530_v60 = vmul.f32 %v8868_v59, %v8862_v6  ;;  %v2531_v62 = vmul.f32 %v8868_v59, %v8864_v8 }
 0x7a4   : > { %8314 = vmatmul.mubr.msk.bf16.vlgmr.msra.gmra.mrb[12].mxu1 %vm1038_vm10, %v2599_v42  ;;  %v2554_v2 = vmul.f32 %v8023_v14, %v2530_v60  ;;  %v2555_v7 = vmul.f32 %v8024_v24, %v2531_v62  ;;  %v2835_v5 = vmul.f32 %v8027_v16, %v2530_v60  ;;  %v2836_v34 = vmul.f32 %v8028_v22, %v2531_v62 }
 0x7a5   : > { %8324 = vmatpush3.bf16.msra.mxu1 %v2837_v36  ;;  %8325 = vmatprep.mubr.msk.bf16.mxu1 %vm1038_vm10, %v9496_v48  ;;  %v3020_v28 = vmul.f32 %v8031_v55, %v2530_v60  ;;  %v3021_v10 = vmul.f32 %v8032_v12, %v2531_v62 }
 0x7a6   : > { %8335 = vmatprep.subr.bf16.mxu1 %v3022_v44  ;;  %v2557_v38 = vpack.c.bf16 %v2555_v7, %v2554_v2  ;;  %v2838_v6 = vpack.c.bf16 %v2836_v34, %v2835_v5 }
 0x7a7   : > { %v3023_v8 = vpack.c.bf16 %v3021_v10, %v3020_v28 }
 0x7a8   : > { %8317 = vmatprep.subr.bf16.mxu0 %v2557_v38 }
 0x7a9   : > { %8318 = vmatpush3.bf16.msra.mxu0 %v2557_v38 }
 0x7aa   : > { %8329 = vmatprep.subr.bf16.mxu0 %v2838_v6 }
 0x7ac   : > { %8320 = vmatmul.mubr.msk.bf16.vlgmr.msra.gmra.mrb[16].mxu0 %vm1038_vm10, %v2696_v11  ;;  %8326 = vmatmul.mubr.msk.bf16.vlgmr.msra.gmra.mrb[16].mxu1 %vm1038_vm10, %v2599_v42 }
 0x7ad   : > { %8336 = vmatpush3.bf16.msra.mxu1 %v3022_v44  ;;  %8330 = vmatpush3.bf16.msra.mxu0 %v2838_v6 }
 0x7ae   : > { %8341 = vmatprep.subr.bf16.mxu0 %v3023_v8  ;;  %8331 = vmatprep.mubr.msk.bf16.mxu0 %vm1038_vm10, %v9506_v26 }
 0x7af   : > { %8337 = vmatprep.mubr.msk.bf16.mxu1 %vm1038_vm10, %v9496_v48  ;;  %8347 = vmatprep.subr.bf16.mxu1 %v8914_v52 }
 0x7b4   : > { %8332 = vmatmul.mubr.msk.bf16.vlgmr.msra.gmra.mrb[20].mxu0 %vm1038_vm10, %v2696_v11  ;;  %8338 = vmatmul.mubr.msk.bf16.vlgmr.msra.gmra.mrb[20].mxu1 %vm1038_vm10, %v2599_v42 }
 0x7b5   : > { %8342 = vmatpush3.bf16.msra.mxu0 %v3023_v8  ;;  %8343 = vmatprep.mubr.msk.bf16.mxu0 %vm1038_vm10, %v9506_v26 }
 0x7b6   : > { %8353 = vmatprep.subr.bf16.mxu0 %v8914_v52  ;;  %8349 = vmatprep.mubr.msk.bf16.mxu1 %vm8915_vm11, %v8914_v52 }
 0x7bc   : > { %8344 = vmatmul.mubr.msk.bf16.vlgmr.msra.gmra.mrb[24].mxu0 %vm1038_vm10, %v2696_v11 }
 0x7bd   : > { %8355 = vmatprep.mubr.msk.bf16.mxu0 %vm8915_vm11, %v8914_v52 }
 0x877   : > { %v8315_v48 = vpop.f32.mrb[12].mxu1 }
 0x878   : > { %v2640_v9 = vpop.f32.mrb[13].mxu1 }
 0x879   : > { %v8316_v13 = vpop.f32.mrb[14].mxu1 }
 0x87a   : > { %v2753_v17 = vpack.c.bf16 %v8316_v13, %v8315_v48  ;;  %v7889_v29 = vpack.c.bf16 %v8316_v13, %v8316_v13  ;;  %v2643_v15 = vpop.f32.mrb[15].mxu1 }
 0x87b   : > { %v2752_v35 = vpack.c.bf16 %v2643_v15, %v2640_v9  ;;  %v7888_v26 = vpack.c.bf16 %v2643_v15, %v2643_v15 }
 0x87c   : > { %v9560_v19 = vrot.slane %v2753_v17, %v9488_v23  ;;  %v9563_v45 = vrot.slane %v7889_v29, %v9488_v23 }
 0x87d   : > { %v9566_v20 = vrot.slane %v2752_v35, %v9488_v23  ;;  %v9571_v49 = vrot.slane %v7888_v26, %v9488_v23 }
 0x87e   : > { %v2792_v25 = vcombine.high %v9560_v19, %v9560_v19  ;;  %v2793_v57 = vcombine.high %v9563_v45, %v9563_v45 }
 0x87f   : > { %v8327_v21 = vpop.f32.mrb[16].mxu1  ;;  %v8321_v33 = vpop.f32.mrb[16].mxu0  ;;  %v2775_v16 = vcombine.high %v9566_v20, %v9566_v20  ;;  %v2776_v47 = vcombine.high %v9571_v49, %v9571_v49 }
 0x880   : > { %v2873_v37 = vpop.f32.mrb[17].mxu1  ;;  %v2737_v61 = vpop.f32.mrb[17].mxu0 }
 0x881   : > { %v8328_v3 = vpop.f32.mrb[18].mxu1  ;;  %v8322_v31 = vpop.f32.mrb[18].mxu0 }
 0x882   : > { %v2938_v63 = vpack.c.bf16 %v8328_v3, %v8327_v21  ;;  %v7899_v18 = vpack.c.bf16 %v8328_v3, %v8328_v3  ;;  %v2876_v1 = vpop.f32.mrb[19].mxu1  ;;  %v2755_v14 = vpack.c.bf16 %v8322_v31, %v8321_v33  ;;  %v2740_v24 = vpop.f32.mrb[19].mxu0  ;;  %v7891_v40 = vpack.c.bf16 %v8322_v31, %v8322_v31 }
 0x883   : > { %v2937_v22 = vpack.c.bf16 %v2876_v1, %v2873_v37  ;;  %v7898_v43 = vpack.c.bf16 %v2876_v1, %v2876_v1  ;;  %v2754_v55 = vpack.c.bf16 %v2740_v24, %v2737_v61  ;;  %v7890_v46 = vpack.c.bf16 %v2740_v24, %v2740_v24 }
 0x884   : > { %v2969_v12 = vrot.slane %v2938_v63, %v9488_v23  ;;  %v2976_v39 = vrot.slane %v7899_v18, %v9488_v23  ;;  %v9584_v54 = vrot.slane %v2755_v14, %v9488_v23  ;;  %v9590_v0 = vrot.slane %v7891_v40, %v9488_v23 }
 0x885   : > { %v2952_v51 = vrot.slane %v2937_v22, %v9488_v23  ;;  %v2959_v53 = vrot.slane %v7898_v43, %v9488_v23  ;;  %v9593_v4 = vrot.slane %v2754_v55, %v9488_v23  ;;  %v9596_v2 = vrot.slane %v7890_v46, %v9488_v23 }
 0x886   : > { %v3230_v56 = vcombine.low %v2969_v12, %v2969_v12  ;;  %v7914_v32 = vcombine.high %v2969_v12, %v2969_v12  ;;  %v3246_v27 = vcombine.low %v2976_v39, %v2976_v39  ;;  %v7915_v30 = vcombine.high %v2976_v39, %v2976_v39 }
 0x887   : > { %v3198_v36 = vcombine.low %v2952_v51, %v2952_v51  ;;  %v7912_v44 = vcombine.high %v2952_v51, %v2952_v51  ;;  %v3214_v58 = vcombine.low %v2959_v53, %v2959_v53  ;;  %v7913_v41 = vcombine.high %v2959_v53, %v2959_v53  ;;  %v8339_v42 = vpop.f32.mrb[20].mxu1  ;;  %v8333_v59 = vpop.f32.mrb[20].mxu0 }
 0x888   : > { %v9587_v60 = vrot.slane %v3230_v56, %v9488_v23  ;;  %v3058_v62 = vpop.f32.mrb[21].mxu1  ;;  %v2922_v7 = vpop.f32.mrb[21].mxu0  ;;  %v9599_v5 = vrot.slane %v7914_v32, %v9488_v23  ;;  %v9602_v34 = vrot.slane %v3246_v27, %v9488_v23  ;;  %v9605_v28 = vrot.slane %v7915_v30, %v9488_v23 }
 0x889   : > { %v9608_v10 = vrot.slane %v3198_v36, %v9488_v23  ;;  %v8340_v38 = vpop.f32.mrb[22].mxu1  ;;  %v8334_v6 = vpop.f32.mrb[22].mxu0  ;;  %v9611_v8 = vrot.slane %v7912_v44, %v9488_v23  ;;  %v9614_v11 = vrot.slane %v3214_v58, %v9488_v23  ;;  %v9617_v29 = vrot.slane %v7913_v41, %v9488_v23 }
 0x88a   : > { %v3123_v48 = vpack.c.bf16 %v8340_v38, %v8339_v42  ;;  %v7909_v9 = vpack.c.bf16 %v8340_v38, %v8340_v38  ;;  %v3061_v13 = vpop.f32.mrb[23].mxu1  ;;  %v2925_v17 = vpop.f32.mrb[23].mxu0  ;;  %v2826_v26 = vcombine.high %v9584_v54, %v9584_v54  ;;  %v2940_v37 = vpack.c.bf16 %v8334_v6, %v8333_v59 }
 0x88b   : > { %v3122_v15 = vpack.c.bf16 %v3061_v13, %v3058_v62  ;;  %v7908_v35 = vpack.c.bf16 %v3061_v13, %v3061_v13  ;;  %v7901_v61 = vpack.c.bf16 %v8334_v6, %v8334_v6  ;;  %v2939_v63 = vpack.c.bf16 %v2925_v17, %v2922_v7 }
 0x88c   : > { %v3154_v21 = vrot.slane %v3123_v48, %v9488_v23  ;;  %v3161_v33 = vrot.slane %v7909_v9, %v9488_v23  ;;  %v7900_v18 = vpack.c.bf16 %v2925_v17, %v2925_v17  ;;  %v2827_v51 = vcombine.high %v9590_v0, %v9590_v0 }
 0x88d   : > { %v3137_v3 = vrot.slane %v3122_v15, %v9488_v23  ;;  %v3144_v31 = vrot.slane %v7908_v35, %v9488_v23  ;;  %v2809_v53 = vcombine.high %v9593_v4, %v9593_v4  ;;  %v2810_v56 = vcombine.high %v9596_v2, %v9596_v2 }
 0x88e   : > { %v3162_v1 = vcombine.high %v3154_v21, %v3154_v21  ;;  %v3163_v14 = vcombine.high %v3161_v33, %v3161_v33  ;;  %v9626_v24 = vrot.slane %v3154_v21, %v9488_v23  ;;  %v9629_v22 = vrot.slane %v3161_v33, %v9488_v23 }
 0x88f   : > { %v3145_v43 = vcombine.high %v3137_v3, %v3137_v3  ;;  %v3146_v55 = vcombine.high %v3144_v31, %v3144_v31  ;;  %v3332_v12 = vrot.slane %v3137_v3, %v9488_v23  ;;  %v3348_v39 = vrot.slane %v3144_v31, %v9488_v23  ;;  %v8345_v40 = vpop.f32.mrb[24].mxu0 }
 0x890   : > { %v9634_v46 = vrot.slane %v3162_v1, %v9488_v23  ;;  %v3107_v32 = vpop.f32.mrb[25].mxu0  ;;  %v3365_v27 = vcombine.low %v9626_v24, %v9626_v24  ;;  %v9645_v30 = vrot.slane %v3163_v14, %v9488_v23  ;;  %v3381_v41 = vcombine.low %v9629_v22, %v9629_v22 }
 0x891   : > { %v3340_v36 = vrot.slane %v3145_v43, %v9488_v23  ;;  %v3356_v44 = vrot.slane %v3146_v55, %v9488_v23  ;;  %v8346_v58 = vpop.f32.mrb[26].mxu0  ;;  %v3333_v42 = vcombine.low %v3332_v12, %v3332_v12  ;;  %v3003_v59 = vrot.slane %v2940_v37, %v9488_v23 }
 0x892   : > { %v3010_v62 = vrot.slane %v7901_v61, %v9488_v23  ;;  %v3110_v7 = vpop.f32.mrb[27].mxu0  ;;  %v3373_v38 = vcombine.low %v9634_v46, %v9634_v46  ;;  %v3349_v6 = vcombine.low %v3348_v39, %v3348_v39  ;;  %v2986_v48 = vrot.slane %v2939_v63, %v9488_v23 }
 0x893   : > { %v2993_v9 = vrot.slane %v7900_v18, %v9488_v23  ;;  %v3294_v13 = vcombine.low %v3003_v59, %v3003_v59  ;;  %v7918_v17 = vcombine.high %v3003_v59, %v3003_v59  ;;  %v3389_v21 = vcombine.low %v9645_v30, %v9645_v30 }
 0x894   : > { %v3310_v15 = vcombine.low %v3010_v62, %v3010_v62  ;;  %v7919_v35 = vcombine.high %v3010_v62, %v3010_v62  ;;  %v3341_v33 = vcombine.low %v3340_v36, %v3340_v36  ;;  %v3357_v37 = vcombine.low %v3356_v44, %v3356_v44 }
 0x895   : > { %v3262_v3 = vcombine.low %v2986_v48, %v2986_v48  ;;  %v9660_v61 = vrot.slane %v3294_v13, %v9488_v23  ;;  %v7916_v31 = vcombine.high %v2986_v48, %v2986_v48  ;;  %v3278_v1 = vcombine.low %v2993_v9, %v2993_v9 }
 0x896   : > { %v7917_v14 = vcombine.high %v2993_v9, %v2993_v9  ;;  %v9663_v63 = vrot.slane %v7918_v17, %v9488_v23  ;;  %v9666_v18 = vrot.slane %v3310_v15, %v9488_v23  ;;  %v9669_v43 = vrot.slane %v7919_v35, %v9488_v23 }
 0x897   : > { %v3269_v55 = vrot.slane %v3262_v3, %v9488_v23  ;;  %v3125_v12 = vpack.c.bf16 %v8346_v58, %v8345_v40  ;;  %v7911_v39 = vpack.c.bf16 %v8346_v58, %v8346_v58  ;;  %v3124_v36 = vpack.c.bf16 %v3110_v7, %v3107_v32 }
 0x898   : > { %v7910_v44 = vpack.c.bf16 %v3110_v7, %v3110_v7  ;;  %v3457_v59 = vsel %vm3454_vm13, %v9566_v20, %v9608_v10  ;;  %v3460_v62 = vsel %vm3454_vm13, %v2775_v16, %v9611_v8  ;;  %v3463_v48 = vsel %vm3454_vm13, %v9571_v49, %v9614_v11 }
 0x899   : > { %v3466_v40 = vsel %vm3454_vm13, %v2776_v47, %v9617_v29  ;;  %v3188_v32 = vrot.slane %v3125_v12, %v9488_v23  ;;  %v3195_v10 = vrot.slane %v7911_v39, %v9488_v23  ;;  %v3171_v58 = vrot.slane %v3124_v36, %v9488_v23 }
 0x89a   : > { %v3178_v20 = vrot.slane %v7910_v44, %v9488_v23  ;;  %v3504_v16 = vsel %vm809_vm1, %v3457_v59, %v3333_v42  ;;  %v3506_v8 = vsel %vm809_vm1, %v3460_v62, %v3341_v33  ;;  %v3508_v11 = vsel %vm809_vm1, %v3463_v48, %v3349_v6 }
 0x89b   : > { %v3510_v7 = vsel %vm809_vm1, %v3466_v40, %v3357_v37  ;;  %v3196_v9 = vcombine.high %v3188_v32, %v3188_v32  ;;  %v3197_v49 = vcombine.high %v3195_v10, %v3195_v10  ;;  %v3428_v47 = vrot.slane %v3188_v32, %v9488_v23 }
 0x89c   : > { %v3444_v29 = vrot.slane %v3195_v10, %v9488_v23  ;;  %v3179_v13 = vcombine.high %v3171_v58, %v3171_v58  ;;  %v3180_v17 = vcombine.high %v3178_v20, %v3178_v20  ;;  %v3396_v15 = vrot.slane %v3171_v58, %v9488_v23 }
 0x89d   : > { %v3412_v35 = vrot.slane %v3178_v20, %v9488_v23  ;;  %v3277_v42 = vrot.slane %v7916_v31, %v9488_v23  ;;  %v3285_v33 = vrot.slane %v3278_v1, %v9488_v23  ;;  %v3293_v6 = vrot.slane %v7917_v14, %v9488_v23  ;;  %v9712_v31 = vld [vmem:[%s10661_s11] sm:$0xff]  }
 0x89e   : > { %v3436_v37 = vrot.slane %v3196_v9, %v9488_v23  ;;  %v3429_v3 = vcombine.low %v3428_v47, %v3428_v47  ;;  %v3445_v12 = vcombine.low %v3444_v29, %v3444_v29  ;;  %v3452_v39 = vrot.slane %v3197_v49, %v9488_v23  ;;  %v9881_v47 = vld [vmem:[%s10663_s13] sm:$0xf] }
 0x89f   : > { %v3404_v36 = vrot.slane %v3179_v13, %v9488_v23  ;;  %v3397_v44 = vcombine.low %v3396_v15, %v3396_v15  ;;  %v3420_v59 = vrot.slane %v3180_v17, %v9488_v23  ;;  %v3547_v62 = vsel %vm3546_vm14, %v3504_v16, 0 }
 0x8a0   : > { %v3590_v48 = vsel %vm3546_vm14, %v3506_v8, 0  ;;  %v3437_v1 = vcombine.low %v3436_v37, %v3436_v37  ;;  %v3413_v40 = vcombine.low %v3412_v35, %v3412_v35  ;;  %8348 = vmatpush3.bf16.msra.mxu1 %v3547_v62  ;;  %v3469_v23 = vsel %vm3454_vm13, %v9560_v19, %v9587_v60 }
 0x8a1   : > { %v3405_v14 = vcombine.low %v3404_v36, %v3404_v36  ;;  %8354 = vmatpush3.bf16.msra.mxu0 %v3590_v48  ;;  %8359 = vmatprep.subr.bf16.mxu1 %v8914_v52  ;;  %v3472_v32 = vsel %vm3454_vm13, %v2792_v25, %v9599_v5  ;;  %v3475_v10 = vsel %vm3454_vm13, %v9563_v45, %v9602_v34  ;;  %v3633_v34 = vsel %vm3546_vm14, %v3508_v11, 0 }
 0x8a2   : > { %8365 = vmatprep.subr.bf16.mxu0 %v8914_v52  ;;  %v3512_v58 = vsel %vm809_vm1, %v3469_v23, %v3365_v27  ;;  %v3514_v60 = vsel %vm809_vm1, %v3472_v32, %v3373_v38  ;;  %v3516_v19 = vsel %vm809_vm1, %v3475_v10, %v3381_v41  ;;  %v3478_v25 = vsel %vm3454_vm13, %v2793_v57, %v9605_v28 }
 0x8a3   : > { %v3421_v5 = vcombine.low %v3420_v59, %v3420_v59  ;;  %8350 = vmatmul.mubr.msk.bf16.vlgmr.msra.gmra.mrb[24].mxu1 %vm3542_vm15, %v9712_v31  ;;  %v3676_v24 = vsel %vm3546_vm14, %v3510_v7, 0  ;;  %v3518_v22 = vsel %vm809_vm1, %v3478_v25, %v3389_v21  ;;  %v3481_v45 = vsel %vm3454_vm13, %v9593_v4, %v3269_v55 }
 0x8a4   : > { %8356 = vmatmul.mubr.msk.bf16.vlgmr.msra.gmra.mrb[28].mxu0 %vm3542_vm15, %v9712_v31  ;;  %8360 = vmatpush3.bf16.msra.mxu1 %v3633_v34  ;;  %v3484_v57 = vsel %vm3454_vm13, %v2809_v53, %v3277_v42  ;;  %v3487_v28 = vsel %vm3454_vm13, %v9596_v2, %v3285_v33  ;;  %v3520_v46 = vsel %vm809_vm1, %v3481_v45, %v3397_v44 }
 0x8a5   : > { %8366 = vmatpush3.bf16.msra.mxu0 %v3676_v24  ;;  %8361 = vmatprep.mubr.msk.bf16.mxu1 %vm8915_vm11, %v8914_v52  ;;  %v3522_v27 = vsel %vm809_vm1, %v3484_v57, %v3405_v14  ;;  %v3524_v30 = vsel %vm809_vm1, %v3487_v28, %v3413_v40  ;;  %v3453_v41 = vcombine.low %v3452_v39, %v3452_v39 }
 0x8a6   : > { %8371 = vmatprep.subr.bf16.mxu1 %v8914_v52  ;;  %8367 = vmatprep.mubr.msk.bf16.mxu0 %vm8915_vm11, %v8914_v52  ;;  %v3490_v4 = vsel %vm3454_vm13, %v2810_v56, %v3293_v6  ;;  %v3493_v38 = vsel %vm3454_vm13, %v9584_v54, %v9660_v61  ;;  %v3496_v21 = vsel %vm3454_vm13, %v2826_v26, %v9663_v63  ;;  %v3719_v26 = vsel %vm3546_vm14, %v3512_v58, 0 }
 0x8a7   : > { %8377 = vmatprep.subr.bf16.mxu0 %v8914_v52  ;;  %v3526_v53 = vsel %vm809_vm1, %v3490_v4, %v3421_v5  ;;  %v3499_v55 = vsel %vm3454_vm13, %v9590_v0, %v9666_v18  ;;  %v3528_v2 = vsel %vm809_vm1, %v3493_v38, %v3429_v3  ;;  %v3530_v56 = vsel %vm809_vm1, %v3496_v21, %v3437_v1 }
 0x8a8   : > { %v3532_v20 = vsel %vm809_vm1, %v3499_v55, %v3445_v12  ;;  %v3502_v61 = vsel %vm3454_vm13, %v2827_v51, %v9669_v43  ;;  %v3762_v63 = vsel %vm3546_vm14, %v3514_v60, 0  ;;  %v3805_v0 = vsel %vm3546_vm14, %v3516_v19, 0 }
 0x8a9   : > { %v3534_v54 = vsel %vm809_vm1, %v3502_v61, %v3453_v41  ;;  %v3848_v51 = vsel %vm3546_vm14, %v3518_v22, 0  ;;  %v3891_v18 = vsel %vm3546_vm14, %v3520_v46, 0  ;;  %v3934_v43 = vsel %vm3546_vm14, %v3522_v27, 0 }
 0x8aa   : > { %v3977_v16 = vsel %vm3546_vm14, %v3524_v30, 0  ;;  %v4020_v8 = vsel %vm3546_vm14, %v3526_v53, 0  ;;  %v4063_v11 = vsel %vm3546_vm14, %v3528_v2, 0  ;;  %v4106_v7 = vsel %vm3546_vm14, %v3530_v56, 0 }
 0x8ab   : > { %8362 = vmatmul.mubr.msk.bf16.vlgmr.msra.gmra.mrb[28].mxu1 %vm3542_vm15, %v9712_v31  ;;  %v4149_v9 = vsel %vm3546_vm14, %v3532_v20, 0  ;;  %v4192_v49 = vsel %vm3546_vm14, %v3534_v54, 0 }
 0x8ac   : > { %8368 = vmatmul.mubr.msk.bf16.vlgmr.msra.gmra.mrb[32].mxu0 %vm3542_vm15, %v9712_v31  ;;  %8372 = vmatpush3.bf16.msra.mxu1 %v3719_v26 }
 0x8ad   : > { %8378 = vmatpush3.bf16.msra.mxu0 %v3762_v63  ;;  %8373 = vmatprep.mubr.msk.bf16.mxu1 %vm8915_vm11, %v8914_v52 }
 0x8ae   : > { %8383 = vmatprep.subr.bf16.mxu1 %v8914_v52  ;;  %8379 = vmatprep.mubr.msk.bf16.mxu0 %vm8915_vm11, %v8914_v52 }
 0x8af   : > { %8389 = vmatprep.subr.bf16.mxu0 %v8914_v52 }
 0x8b3   : > { %8374 = vmatmul.mubr.msk.bf16.vlgmr.msra.gmra.mrb[32].mxu1 %vm3542_vm15, %v9712_v31 }
 0x8b4   : > { %8380 = vmatmul.mubr.msk.bf16.vlgmr.msra.gmra.mrb[36].mxu0 %vm3542_vm15, %v9712_v31  ;;  %8384 = vmatpush3.bf16.msra.mxu1 %v3805_v0 }
 0x8b5   : > { %8390 = vmatpush3.bf16.msra.mxu0 %v3848_v51  ;;  %8385 = vmatprep.mubr.msk.bf16.mxu1 %vm8915_vm11, %v8914_v52 }
 0x8b6   : > { %8395 = vmatprep.subr.bf16.mxu1 %v8914_v52  ;;  %8391 = vmatprep.mubr.msk.bf16.mxu0 %vm8915_vm11, %v8914_v52 }
 0x8b7   : > { %8401 = vmatprep.subr.bf16.mxu0 %v8914_v52 }
 0x8bb   : > { %8386 = vmatmul.mubr.msk.bf16.vlgmr.msra.gmra.mrb[36].mxu1 %vm3542_vm15, %v9712_v31 }
 0x8bc   : > { %8392 = vmatmul.mubr.msk.bf16.vlgmr.msra.gmra.mrb[40].mxu0 %vm3542_vm15, %v9712_v31  ;;  %8396 = vmatpush3.bf16.msra.mxu1 %v3891_v18 }
 0x8bd   : > { %8402 = vmatpush3.bf16.msra.mxu0 %v3934_v43  ;;  %8397 = vmatprep.mubr.msk.bf16.mxu1 %vm8915_vm11, %v8914_v52 }
 0x8be   : > { %8407 = vmatprep.subr.bf16.mxu1 %v8914_v52  ;;  %8403 = vmatprep.mubr.msk.bf16.mxu0 %vm8915_vm11, %v8914_v52 }
 0x8bf   : > { %8413 = vmatprep.subr.bf16.mxu0 %v8914_v52 }
 0x8c3   : > { %8398 = vmatmul.mubr.msk.bf16.vlgmr.msra.gmra.mrb[40].mxu1 %vm3542_vm15, %v9712_v31 }
 0x8c4   : > { %8404 = vmatmul.mubr.msk.bf16.vlgmr.msra.gmra.mrb[44].mxu0 %vm3542_vm15, %v9712_v31  ;;  %8408 = vmatpush3.bf16.msra.mxu1 %v3977_v16 }
 0x8c5   : > { %8414 = vmatpush3.bf16.msra.mxu0 %v4020_v8  ;;  %8409 = vmatprep.mubr.msk.bf16.mxu1 %vm8915_vm11, %v8914_v52 }
 0x8c6   : > { %8419 = vmatprep.subr.bf16.mxu1 %v8914_v52  ;;  %8415 = vmatprep.mubr.msk.bf16.mxu0 %vm8915_vm11, %v8914_v52 }
 0x8c7   : > { %8425 = vmatprep.subr.bf16.mxu0 %v8914_v52 }
 0x8cb   : > { %8410 = vmatmul.mubr.msk.bf16.vlgmr.msra.gmra.mrb[44].mxu1 %vm3542_vm15, %v9712_v31 }
 0x8cc   : > { %8416 = vmatmul.mubr.msk.bf16.vlgmr.msra.gmra.mrb[48].mxu0 %vm3542_vm15, %v9712_v31  ;;  %8420 = vmatpush3.bf16.msra.mxu1 %v4063_v11 }
 0x8cd   : > { %8426 = vmatpush3.bf16.msra.mxu0 %v4106_v7  ;;  %8421 = vmatprep.mubr.msk.bf16.mxu1 %vm8915_vm11, %v8914_v52 }
 0x8ce   : > { %8431 = vmatprep.subr.bf16.mxu1 %v8914_v52  ;;  %8427 = vmatprep.mubr.msk.bf16.mxu0 %vm8915_vm11, %v8914_v52 }
 0x8cf   : > { %8437 = vmatprep.subr.bf16.mxu0 %v8914_v52 }
 0x8d3   : > { %8422 = vmatmul.mubr.msk.bf16.vlgmr.msra.gmra.mrb[48].mxu1 %vm3542_vm15, %v9712_v31 }
 0x8d4   : > { %8428 = vmatmul.mubr.msk.bf16.vlgmr.msra.gmra.mrb[52].mxu0 %vm3542_vm15, %v9712_v31  ;;  %8432 = vmatpush3.bf16.msra.mxu1 %v4149_v9 }
 0x8d5   : > { %8438 = vmatpush3.bf16.msra.mxu0 %v4192_v49  ;;  %8433 = vmatprep.mubr.msk.bf16.mxu1 %vm8915_vm11, %v8914_v52 }
 0x8d6   : > { %8439 = vmatprep.mubr.msk.bf16.mxu0 %vm8915_vm11, %v8914_v52  ;;  %8443 = vmatprep.subr.bf16.mxu1 %v8914_v52 }
 0x8d7   : > { %8449 = vmatprep.subr.bf16.mxu0 %v8914_v52 }
 0x8db   : > { %8434 = vmatmul.mubr.msk.bf16.vlgmr.msra.gmra.mrb[52].mxu1 %vm3542_vm15, %v9712_v31 }
 0x8dc   : > { %8440 = vmatmul.mubr.msk.bf16.vlgmr.msra.gmra.mrb[56].mxu0 %vm3542_vm15, %v9712_v31  ;;  %8444 = vmatpush3.bf16.msra.mxu1 %v8913_v50 }
 0x8dd   : > { %8445 = vmatprep.mubr.msk.bf16.mxu1 %vm8915_vm11, %v8914_v52  ;;  %8455 = vmatprep.subr.bf16.mxu1 %v8914_v52 }
 0x8de   : > { %8451 = vmatprep.mubr.msk.bf16.mxu0 %vm8915_vm11, %v8914_v52 }
 0x8e3   : > { %8446 = vmatmul.mubr.msk.bf16.vlgmr.msra.gmra.mrb[56].mxu1 %vm1038_vm10, %v9881_v47 }
 0x8e4   : > { %8457 = vmatprep.mubr.msk.bf16.mxu1 %vm8915_vm11, %v8914_v52 }
 0x976   : > { %v3583_v29 = vpop.f32.mrb[24].mxu1 }
 0x977   : > { %v3626_v13 = vpop.f32.mrb[28].mxu0  ;;  %v8351_v17 = vpop.f32.mrb[25].mxu1  ;;  %v4235_v6 = vmax.f32 %v3583_v29, 0.0 }
 0x978   : > { %v4237_v15 = vmax.f32 %v3626_v13, 0.0  ;;  %v8357_v35 = vpop.f32.mrb[29].mxu0  ;;  %v3586_v42 = vpop.f32.mrb[26].mxu1 }
 0x979   : > { %v3629_v33 = vpop.f32.mrb[30].mxu0  ;;  %v4236_v37 = vmax.f32 %v3586_v42, 0.0  ;;  %v8352_v3 = vpop.f32.mrb[27].mxu1 }
 0x97a   : > { %v4238_v12 = vmax.f32 %v3629_v33, 0.0  ;;  %v8358_v39 = vpop.f32.mrb[31].mxu0 }
 0x97b   : > { %v9887_v36 = vpack.c.bf16 %v4236_v37, %v4235_v6 }
 0x97c   : > { %v9889_v44 = vpack.c.bf16 %v4238_v12, %v4237_v15 }
 0x97d   : > { %8450 = vmatpush3.bf16.msra.mxu0 %v9887_v36 }
 0x97e   : > { %8456 = vmatpush3.bf16.msra.mxu1 %v9889_v44  ;;  %v3669_v59 = vpop.f32.mrb[28].mxu1  ;;  %8461 = vmatprep.subr.bf16.mxu0 %v8914_v52 }
 0x97f   : > { %v3712_v62 = vpop.f32.mrb[32].mxu0  ;;  %8467 = vmatprep.subr.bf16.mxu1 %v8914_v52  ;;  %v8363_v48 = vpop.f32.mrb[29].mxu1  ;;  %v4239_v23 = vmax.f32 %v3669_v59, 0.0 }
 0x980   : > { %v4241_v31 = vmax.f32 %v3712_v62, 0.0  ;;  %v8369_v1 = vpop.f32.mrb[33].mxu0  ;;  %v3672_v14 = vpop.f32.mrb[30].mxu1  ;;  %8452 = vmatmul.mubr.msk.bf16.vlgmr.msra.gmra.mrb[60].mxu0 %vm1038_vm10, %v9881_v47 }
 0x981   : > { %v3715_v40 = vpop.f32.mrb[34].mxu0  ;;  %8458 = vmatmul.mubr.msk.bf16.vlgmr.msra.gmra.mrb[60].mxu1 %vm1038_vm10, %v9881_v47  ;;  %v4240_v32 = vmax.f32 %v3672_v14, 0.0  ;;  %v8364_v10 = vpop.f32.mrb[31].mxu1  ;;  %8463 = vmatprep.mubr.msk.bf16.mxu0 %vm8915_vm11, %v8914_v52 }
 0x982   : > { %v4242_v58 = vmax.f32 %v3715_v40, 0.0  ;;  %v8370_v60 = vpop.f32.mrb[35].mxu0  ;;  %8469 = vmatprep.mubr.msk.bf16.mxu1 %vm8915_vm11, %v8914_v52 }
 0x983   : > { %v9903_v19 = vpack.c.bf16 %v4240_v32, %v4239_v23 }
 0x984   : > { %v9905_v25 = vpack.c.bf16 %v4242_v58, %v4241_v31 }
 0x985   : > { %8462 = vmatpush3.bf16.msra.mxu0 %v9903_v19 }
 0x986   : > { %8468 = vmatpush3.bf16.msra.mxu1 %v9905_v25  ;;  %v3755_v5 = vpop.f32.mrb[32].mxu1  ;;  %8473 = vmatprep.subr.bf16.mxu0 %v8914_v52 }
 0x987   : > { %v3798_v34 = vpop.f32.mrb[36].mxu0  ;;  %8479 = vmatprep.subr.bf16.mxu1 %v8914_v52  ;;  %v8375_v24 = vpop.f32.mrb[33].mxu1  ;;  %v4243_v46 = vmax.f32 %v3755_v5, 0.0 }
 0x988   : > { %v4245_v22 = vmax.f32 %v3798_v34, 0.0  ;;  %v8381_v45 = vpop.f32.mrb[37].mxu0  ;;  %v3758_v57 = vpop.f32.mrb[34].mxu1  ;;  %8464 = vmatmul.mubr.msk.bf16.vlgmr.msra.gmra.mrb[64].mxu0 %vm1038_vm10, %v9881_v47 }
 0x989   : > { %v3801_v28 = vpop.f32.mrb[38].mxu0  ;;  %8470 = vmatmul.mubr.msk.bf16.vlgmr.msra.gmra.mrb[64].mxu1 %vm1038_vm10, %v9881_v47  ;;  %v4244_v27 = vmax.f32 %v3758_v57, 0.0  ;;  %v8376_v30 = vpop.f32.mrb[35].mxu1  ;;  %8475 = vmatprep.mubr.msk.bf16.mxu0 %vm8915_vm11, %v8914_v52 }
 0x98a   : > { %v4246_v41 = vmax.f32 %v3801_v28, 0.0  ;;  %v8382_v4 = vpop.f32.mrb[39].mxu0  ;;  %8481 = vmatprep.mubr.msk.bf16.mxu1 %vm8915_vm11, %v8914_v52 }
 0x98b   : > { %v9919_v53 = vpack.c.bf16 %v4244_v27, %v4243_v46 }
 0x98c   : > { %v9921_v38 = vpack.c.bf16 %v4246_v41, %v4245_v22 }
 0x98d   : > { %8474 = vmatpush3.bf16.msra.mxu0 %v9919_v53 }
 0x98e   : > { %8480 = vmatpush3.bf16.msra.mxu1 %v9921_v38  ;;  %v3841_v21 = vpop.f32.mrb[36].mxu1  ;;  %8485 = vmatprep.subr.bf16.mxu0 %v8914_v52 }
 0x98f   : > { %v3884_v55 = vpop.f32.mrb[40].mxu0  ;;  %8491 = vmatprep.subr.bf16.mxu1 %v8914_v52  ;;  %v8387_v2 = vpop.f32.mrb[37].mxu1  ;;  %v4247_v26 = vmax.f32 %v3841_v21, 0.0 }
 0x990   : > { %v4249_v56 = vmax.f32 %v3884_v55, 0.0  ;;  %v8393_v20 = vpop.f32.mrb[41].mxu0  ;;  %v3844_v61 = vpop.f32.mrb[38].mxu1  ;;  %8476 = vmatmul.mubr.msk.bf16.vlgmr.msra.gmra.mrb[68].mxu0 %vm1038_vm10, %v9881_v47 }
 0x991   : > { %v3887_v54 = vpop.f32.mrb[42].mxu0  ;;  %8482 = vmatmul.mubr.msk.bf16.vlgmr.msra.gmra.mrb[68].mxu1 %vm1038_vm10, %v9881_v47  ;;  %v4248_v63 = vmax.f32 %v3844_v61, 0.0  ;;  %v8388_v0 = vpop.f32.mrb[39].mxu1  ;;  %8487 = vmatprep.mubr.msk.bf16.mxu0 %vm8915_vm11, %v8914_v52 }
 0x992   : > { %v4250_v51 = vmax.f32 %v3887_v54, 0.0  ;;  %v8394_v18 = vpop.f32.mrb[43].mxu0  ;;  %8493 = vmatprep.mubr.msk.bf16.mxu1 %vm8915_vm11, %v8914_v52 }
 0x993   : > { %v9935_v43 = vpack.c.bf16 %v4248_v63, %v4247_v26  ;;  %v8889_v18 = vld [vmem:[%s9035_s3] sm:$0xf] }
 0x994   : > { %v9937_v16 = vpack.c.bf16 %v4250_v51, %v4249_v56 }
 0x995   : > { %8486 = vmatpush3.bf16.msra.mxu0 %v9935_v43 }
 0x996   : > { %v3927_v8 = vpop.f32.mrb[40].mxu1  ;;  %8497 = vmatprep.subr.bf16.mxu0 %v8914_v52 }
 0x997   : > { %v3970_v11 = vpop.f32.mrb[44].mxu0  ;;  %v8399_v7 = vpop.f32.mrb[41].mxu1  ;;  %v4251_v17 = vmax.f32 %v3927_v8, 0.0 }
 0x998   : > { %v4253_v9 = vmax.f32 %v3970_v11, 0.0  ;;  %v8405_v49 = vpop.f32.mrb[45].mxu0  ;;  %v3930_v29 = vpop.f32.mrb[42].mxu1  ;;  %8488 = vmatmul.mubr.msk.bf16.vlgmr.msra.gmra.mrb[72].mxu0 %vm1038_vm10, %v9881_v47 }
 0x999   : > { %v3973_v13 = vpop.f32.mrb[46].mxu0  ;;  %v4252_v15 = vmax.f32 %v3930_v29, 0.0  ;;  %v8400_v35 = vpop.f32.mrb[43].mxu1  ;;  %8499 = vmatprep.mubr.msk.bf16.mxu0 %vm8915_vm11, %v8914_v52  ;;  %v10004_v49 = vld [vmem:[%s10665_s15] sm:$0xff] }
 0x99a   : > { %v4254_v42 = vmax.f32 %v3973_v13, 0.0  ;;  %v8406_v33 = vpop.f32.mrb[47].mxu0  ;;  %v8890_v29 = vld [vmem:[%s9035_s3 + $0x4] sm:$0xf]  ;;  %v8891_v13 = vld [vmem:[%s9035_s3 + $0x8] sm:$0xf] }
 0x99b   : > { %v9945_v6 = vpack.c.bf16 %v4252_v15, %v4251_v17  ;;  %v8893_v17 = vld [vmem:[%s9035_s3 + $0x10] sm:$0xf]  ;;  %v8894_v15 = vld [vmem:[%s9035_s3 + $0x14] sm:$0xf]  ;;  %v8895_v35 = vld [vmem:[%s9035_s3 + $0x18] sm:$0xf] }
 0x99c   : > { %v9947_v37 = vpack.c.bf16 %v4254_v42, %v4253_v9  ;;  %v8896_v42 = vld [vmem:[%s9035_s3 + $0x1c] sm:$0xf]  ;;  %v8897_v33 = vld [vmem:[%s9035_s3 + $0x20] sm:$0xf] }
 0x99d   : > { %8492 = vmatpush3.bf16.msra.mxu1 %v9945_v6 }
 0x99e   : > { %8498 = vmatpush3.bf16.msra.mxu0 %v9947_v37  ;;  %v4013_v3 = vpop.f32.mrb[44].mxu1  ;;  %8503 = vmatprep.subr.bf16.mxu1 %v8914_v52 }
 0x99f   : > { %v4056_v12 = vpop.f32.mrb[48].mxu0  ;;  %8509 = vmatprep.subr.bf16.mxu0 %v8914_v52  ;;  %v8411_v39 = vpop.f32.mrb[45].mxu1  ;;  %v4255_v1 = vmax.f32 %v4013_v3, 0.0  ;;  %v8898_v3 = vld [vmem:[%s9035_s3 + $0x24] sm:$0xf] }
 0x9a0   : > { %v4257_v59 = vmax.f32 %v4056_v12, 0.0  ;;  %v8417_v62 = vpop.f32.mrb[49].mxu0  ;;  %v4016_v48 = vpop.f32.mrb[46].mxu1  ;;  %8494 = vmatmul.mubr.msk.bf16.vlgmr.msra.gmra.mrb[72].mxu1 %vm1038_vm10, %v9881_v47  ;;  %v8899_v12 = vld [vmem:[%s9035_s3 + $0x28] sm:$0xf] }
 0x9a1   : > { %v4059_v31 = vpop.f32.mrb[50].mxu0  ;;  %8500 = vmatmul.mubr.msk.bf16.vlgmr.msra.gmra.mrb[76].mxu0 %vm1038_vm10, %v9881_v47  ;;  %v4256_v14 = vmax.f32 %v4016_v48, 0.0  ;;  %v8412_v40 = vpop.f32.mrb[47].mxu1  ;;  %8505 = vmatprep.mubr.msk.bf16.mxu1 %vm8915_vm11, %v8914_v52  ;;  %v8900_v39 = vld [vmem:[%s9035_s3 + $0x2c] sm:$0xf] }
 0x9a2   : > { %v4258_v23 = vmax.f32 %v4059_v31, 0.0  ;;  %v8418_v32 = vpop.f32.mrb[51].mxu0  ;;  %8511 = vmatprep.mubr.msk.bf16.mxu0 %vm8915_vm11, %v8914_v52  ;;  %v8902_v62 = vld [vmem:[%s9035_s3 + $0x34] sm:$0xf]  ;;  %v8903_v48 = vld [vmem:[%s9035_s3 + $0x38] sm:$0xf] }
 0x9a3   : > { %v9961_v10 = vpack.c.bf16 %v4256_v14, %v4255_v1  ;;  %v8904_v31 = vld [vmem:[%s9035_s3 + $0x3c] sm:$0xf]  ;;  %v10123_v40 = vld [vmem:[%s10663_s13 + $0x4] sm:$0xf] }
 0x9a4   : > { %v9963_v58 = vpack.c.bf16 %v4258_v23, %v4257_v59  ;;  %v8901_v59 = vld [vmem:[%s9035_s3 + $0x30] sm:$0xf] }
 0x9a5   : > { %8504 = vmatpush3.bf16.msra.mxu1 %v9961_v10 }
 0x9a6   : > { %8510 = vmatpush3.bf16.msra.mxu0 %v9963_v58  ;;  %v4099_v60 = vpop.f32.mrb[48].mxu1  ;;  %8515 = vmatprep.subr.bf16.mxu1 %v8914_v52 }
 0x9a7   : > { %v4142_v5 = vpop.f32.mrb[52].mxu0  ;;  %8521 = vmatprep.subr.bf16.mxu0 %v8914_v52  ;;  %v8423_v34 = vpop.f32.mrb[49].mxu1  ;;  %v4259_v28 = vmax.f32 %v4099_v60, 0.0 }
 0x9a8   : > { %v4261_v24 = vmax.f32 %v4142_v5, 0.0  ;;  %v8429_v22 = vpop.f32.mrb[53].mxu0  ;;  %v4102_v45 = vpop.f32.mrb[50].mxu1  ;;  %8506 = vmatmul.mubr.msk.bf16.vlgmr.msra.gmra.mrb[76].mxu1 %vm1038_vm10, %v9881_v47 }
 0x9a9   : > { %v4145_v57 = vpop.f32.mrb[54].mxu0  ;;  %8512 = vmatmul.mubr.msk.bf16.vlgmr.msra.gmra.mrb[80].mxu0 %vm1038_vm10, %v9881_v47  ;;  %v4260_v46 = vmax.f32 %v4102_v45, 0.0  ;;  %v8424_v27 = vpop.f32.mrb[51].mxu1  ;;  %8517 = vmatprep.mubr.msk.bf16.mxu1 %vm8915_vm11, %v8914_v52 }
 0x9aa   : > { %v4262_v30 = vmax.f32 %v4145_v57, 0.0  ;;  %v8430_v41 = vpop.f32.mrb[55].mxu0  ;;  %8523 = vmatprep.mubr.msk.bf16.mxu0 %vm8915_vm11, %v8914_v52 }
 0x9ab   : > { %v9977_v4 = vpack.c.bf16 %v4260_v46, %v4259_v28 }
 0x9ac   : > { %v9979_v21 = vpack.c.bf16 %v4262_v30, %v4261_v24 }
 0x9ad   : > { %8516 = vmatpush3.bf16.msra.mxu1 %v9977_v4 }
 0x9ae   : > { %8522 = vmatpush3.bf16.msra.mxu0 %v9979_v21  ;;  %v4185_v55 = vpop.f32.mrb[52].mxu1  ;;  %8527 = vmatprep.subr.bf16.mxu1 %v8914_v52 }
 0x9af   : > { %8533 = vmatprep.subr.mxu0 %v8914_v52  ;;  %v4228_v2 = vpop.f32.mrb[56].mxu0  ;;  %v8435_v56 = vpop.f32.mrb[53].mxu1  ;;  %v4263_v63 = vmax.f32 %v4185_v55, 0.0 }
 0x9b0   : > { %v4265_v20 = vmax.f32 %v4228_v2, 0.0  ;;  %v8441_v61 = vpop.f32.mrb[57].mxu0  ;;  %v4188_v54 = vpop.f32.mrb[54].mxu1  ;;  %8518 = vmatmul.mubr.msk.bf16.vlgmr.msra.gmra.mrb[80].mxu1 %vm1038_vm10, %v9881_v47 }
 0x9b1   : > { %8524 = vmatmul.mubr.msk.bf16.vlgmr.msra.gmra.mrb[84].mxu0 %vm1038_vm10, %v9881_v47  ;;  %v4231_v26 = vpop.f32.mrb[58].mxu0  ;;  %v4264_v0 = vmax.f32 %v4188_v54, 0.0  ;;  %v8436_v51 = vpop.f32.mrb[55].mxu1  ;;  %8529 = vmatprep.mubr.msk.bf16.mxu1 %vm8915_vm11, %v8914_v52 }
 0x9b2   : > { %8534 = vmatpush3.msk.msra.mxu0 %vm809_vm1, %v8889_v18  ;;  %v4266_v8 = vmax.f32 %v4231_v26, 0.0  ;;  %v8442_v11 = vpop.f32.mrb[59].mxu0  ;;  %8535 = vmatprep.mubr.msk.f32.mxu0 %vm8915_vm11, %v8914_v52 }
 0x9b3   : > { %8538 = vmatprep.subr.mxu0 %v8914_v52  ;;  %v9996_v7 = vpack.c.bf16 %v4264_v0, %v4263_v63 }
 0x9b4   : > { %v9998_v9 = vpack.c.bf16 %v4266_v8, %v4265_v20 }
 0x9b5   : > { %8528 = vmatpush3.bf16.msra.mxu1 %v9996_v7 }
 0x9b6   : > { %8543 = vmatprep.subr.mxu1 %v8914_v52  ;;  %v10112_v1 = vpop.f32.mrb[56].mxu1 }
 0x9b7   : > { %v8447_v14 = vpop.f32.mrb[57].mxu1 }
 0x9b8   : > { %8530 = vmatmul.mubr.msk.bf16.vlgmr.msra.gmra.mrb[84].mxu1 %vm1038_vm10, %v9881_v47  ;;  %v8892_v47 = vld [vmem:[%s9035_s3 + $0xc] sm:$0xf]  ;;  %v4325_v23 = vpop.f32.mrb[58].mxu1 }
 0x9b9   : > { %8536 = vmatmul.mubr.msk.f32.vlgmr.msra.gmra.mrb[88].mxu0 %vm804_vm9, %v10004_v49  ;;  %8544 = vmatpush3.msk.msra.mxu1 %vm809_vm1, %v8891_v13  ;;  %v8448_v32 = vpop.f32.mrb[59].mxu1 }
 0x9ba   : > { %8539 = vmatpush3.msk.msra.mxu0 %vm809_vm1, %v8890_v29  ;;  %8540 = vmatprep.mubr.msk.f32.mxu0 %vm8915_vm11, %v8914_v52 }
 0x9bb   : > { %8545 = vmatprep.mubr.msk.f32.mxu1 %vm8915_vm11, %v8914_v52  ;;  %8548 = vmatprep.subr.mxu0 %v8914_v52 }
 0x9bc   : > { %8553 = vmatprep.subr.mxu1 %v8914_v52 }
 0x9bd   : > { %8541 = vmatmul.mubr.msk.f32.vlgmr.msra.gmra.mrb[90].mxu0 %vm804_vm9, %v10004_v49 }
 0x9be   : > { %8549 = vmatpush3.msk.msra.mxu0 %vm809_vm1, %v8892_v47  ;;  %8550 = vmatprep.mubr.msk.f32.mxu0 %vm8915_vm11, %v8914_v52 }
 0x9bf   : > { %8558 = vmatprep.subr.mxu0 %v8914_v52 }
 0x9c0   : > { %8546 = vmatmul.mubr.msk.f32.vlgmr.msra.gmra.mrb[10].mxu1 %vm804_vm9, %v10004_v49 }
 0x9c1   : > { %8551 = vmatmul.mubr.msk.f32.vlgmr.msra.gmra.mrb[92].mxu0 %vm804_vm9, %v10004_v49  ;;  %8554 = vmatpush3.msk.msra.mxu1 %vm809_vm1, %v8893_v17 }
 0x9c2   : > { %8555 = vmatprep.mubr.msk.f32.mxu1 %vm8915_vm11, %v8914_v52  ;;  %8559 = vmatpush3.msk.msra.mxu0 %vm809_vm1, %v8894_v15 }
 0x9c3   : > { %8560 = vmatprep.mubr.msk.f32.mxu0 %vm8915_vm11, %v8914_v52  ;;  %8563 = vmatprep.subr.mxu1 %v8914_v52 }
 0x9c4   : > { %8568 = vmatprep.subr.mxu0 %v8914_v52  ;;  %8556 = vmatmul.mubr.msk.f32.vlgmr.msra.gmra.mrb[88].mxu1 %vm804_vm9, %v10004_v49 }
 0x9c5   : > { %8561 = vmatmul.mubr.msk.f32.vlgmr.msra.gmra.mrb[94].mxu0 %vm804_vm9, %v10004_v49  ;;  %8564 = vmatpush3.msk.msra.mxu1 %vm809_vm1, %v8895_v35 }
 0x9c6   : > { %8565 = vmatprep.mubr.msk.f32.mxu1 %vm8915_vm11, %v8914_v52  ;;  %8569 = vmatpush3.msk.msra.mxu0 %vm809_vm1, %v8896_v42 }
 0x9c7   : > { %8570 = vmatprep.mubr.msk.f32.mxu0 %vm8915_vm11, %v8914_v52  ;;  %8573 = vmatprep.subr.mxu1 %v8914_v52 }
 0x9c8   : > { %8578 = vmatprep.subr.mxu0 %v8914_v52  ;;  %8566 = vmatmul.mubr.msk.f32.vlgmr.msra.gmra.mrb[90].mxu1 %vm804_vm9, %v10004_v49 }
 0x9c9   : > { %8571 = vmatmul.mubr.msk.f32.vlgmr.msra.gmra.mrb[96].mxu0 %vm804_vm9, %v10004_v49  ;;  %8574 = vmatpush3.msk.msra.mxu1 %vm809_vm1, %v8897_v33 }
 0x9ca   : > { %8575 = vmatprep.mubr.msk.f32.mxu1 %vm8915_vm11, %v8914_v52  ;;  %8579 = vmatpush3.msk.msra.mxu0 %vm809_vm1, %v8898_v3 }
 0x9cb   : > { %8580 = vmatprep.mubr.msk.f32.mxu0 %vm8915_vm11, %v8914_v52  ;;  %8583 = vmatprep.subr.mxu1 %v8914_v52 }
 0x9cc   : > { %8588 = vmatprep.subr.mxu0 %v8914_v52  ;;  %8576 = vmatmul.mubr.msk.f32.vlgmr.msra.gmra.mrb[92].mxu1 %vm804_vm9, %v10004_v49 }
 0x9cd   : > { %8581 = vmatmul.mubr.msk.f32.vlgmr.msra.gmra.mrb[98].mxu0 %vm804_vm9, %v10004_v49  ;;  %8584 = vmatpush3.msk.msra.mxu1 %vm809_vm1, %v8899_v12 }
 0x9ce   : > { %8585 = vmatprep.mubr.msk.f32.mxu1 %vm8915_vm11, %v8914_v52  ;;  %8589 = vmatpush3.msk.msra.mxu0 %vm809_vm1, %v8900_v39 }
 0x9cf   : > { %8590 = vmatprep.mubr.msk.f32.mxu0 %vm8915_vm11, %v8914_v52  ;;  %8593 = vmatprep.subr.mxu1 %v8914_v52 }
 0x9d0   : > { %8598 = vmatprep.subr.mxu0 %v8914_v52  ;;  %8586 = vmatmul.mubr.msk.f32.vlgmr.msra.gmra.mrb[94].mxu1 %vm804_vm9, %v10004_v49 }
 0x9d1   : > { %8591 = vmatmul.mubr.msk.f32.vlgmr.msra.gmra.mrb[100].mxu0 %vm804_vm9, %v10004_v49  ;;  %8594 = vmatpush3.msk.msra.mxu1 %vm809_vm1, %v8901_v59 }
 0x9d2   : > { %8595 = vmatprep.mubr.msk.f32.mxu1 %vm8915_vm11, %v8914_v52  ;;  %8599 = vmatpush3.msk.msra.mxu0 %vm809_vm1, %v8902_v62 }
 0x9d3   : > { %8600 = vmatprep.mubr.msk.f32.mxu0 %vm8915_vm11, %v8914_v52  ;;  %8603 = vmatprep.subr.mxu1 %v8914_v52 }
 0x9d4   : > { %8608 = vmatprep.subr.mxu0 %v8914_v52  ;;  %8596 = vmatmul.mubr.msk.f32.vlgmr.msra.gmra.mrb[96].mxu1 %vm804_vm9, %v10004_v49 }
 0x9d5   : > { %8601 = vmatmul.mubr.msk.f32.vlgmr.msra.gmra.mrb[102].mxu0 %vm804_vm9, %v10004_v49  ;;  %8604 = vmatpush3.msk.msra.mxu1 %vm809_vm1, %v8903_v48 }
 0x9d6   : > { %8605 = vmatprep.mubr.msk.f32.mxu1 %vm8915_vm11, %v8914_v52  ;;  %8613 = vmatprep.subr.bf16.mxu1 %v8914_v52 }
 0x9d7   : > { %8609 = vmatpush3.msk.msra.mxu0 %vm809_vm1, %v8904_v31  ;;  %8610 = vmatprep.mubr.msk.f32.mxu0 %vm8915_vm11, %v8914_v52 }
 0x9d8   : > { %8619 = vmatprep.subr.bf16.mxu0 %v8914_v52  ;;  %8606 = vmatmul.mubr.msk.f32.vlgmr.msra.gmra.mrb[98].mxu1 %vm804_vm9, %v10004_v49 }
 0x9d9   : > { %8611 = vmatmul.mubr.msk.f32.vlgmr.msra.gmra.mrb[104].mxu0 %vm804_vm9, %v10004_v49  ;;  %8614 = vmatpush3.bf16.msra.mxu1 %v9887_v36  ;;  %v8001_v36 = vld [vmem:[%s10663_s13 + $0x8] sm:$0xf] }
 0x9da   : > { %8620 = vmatpush3.bf16.msra.mxu0 %v9889_v44  ;;  %8615 = vmatprep.mubr.msk.bf16.mxu1 %vm8915_vm11, %v8914_v52 }
 0x9db   : > { %8625 = vmatprep.subr.bf16.mxu1 %v8914_v52  ;;  %8621 = vmatprep.mubr.msk.bf16.mxu0 %vm8915_vm11, %v8914_v52 }
 0x9dc   : > { %8631 = vmatprep.subr.bf16.mxu0 %v8914_v52  ;;  %8616 = vmatmul.mubr.msk.bf16.vlgmr.msra.gmra.mrb[100].mxu1 %vm1038_vm10, %v10123_v40 }
 0x9dd   : > { %8622 = vmatmul.mubr.msk.bf16.vlgmr.msra.gmra.mrb[108].mxu0 %vm1038_vm10, %v10123_v40  ;;  %8626 = vmatpush3.bf16.msra.mxu1 %v9903_v19 }
 0x9de   : > { %8632 = vmatpush3.bf16.msra.mxu0 %v9905_v25  ;;  %8627 = vmatprep.mubr.msk.bf16.mxu1 %vm8915_vm11, %v8914_v52 }
 0x9df   : > { %8637 = vmatprep.subr.bf16.mxu1 %v8914_v52  ;;  %8633 = vmatprep.mubr.msk.bf16.mxu0 %vm8915_vm11, %v8914_v52 }
 0x9e0   : > { %8643 = vmatprep.subr.bf16.mxu0 %v8914_v52 }
 0x9e4   : > { %8628 = vmatmul.mubr.msk.bf16.vlgmr.msra.gmra.mrb[104].mxu1 %vm1038_vm10, %v10123_v40 }
 0x9e5   : > { %8634 = vmatmul.mubr.msk.bf16.vlgmr.msra.gmra.mrb[112].mxu0 %vm1038_vm10, %v10123_v40  ;;  %8638 = vmatpush3.bf16.msra.mxu1 %v9919_v53 }
 0x9e6   : > { %8644 = vmatpush3.bf16.msra.mxu0 %v9921_v38  ;;  %8639 = vmatprep.mubr.msk.bf16.mxu1 %vm8915_vm11, %v8914_v52 }
 0x9e7   : > { %8649 = vmatprep.subr.bf16.mxu1 %v8914_v52  ;;  %8645 = vmatprep.mubr.msk.bf16.mxu0 %vm8915_vm11, %v8914_v52 }
 0x9e8   : > { %8655 = vmatprep.subr.bf16.mxu0 %v8914_v52 }
 0x9ec   : > { %8640 = vmatmul.mubr.msk.bf16.vlgmr.msra.gmra.mrb[108].mxu1 %vm1038_vm10, %v10123_v40 }
 0x9ed   : > { %8646 = vmatmul.mubr.msk.bf16.vlgmr.msra.gmra.mrb[116].mxu0 %vm1038_vm10, %v10123_v40  ;;  %8650 = vmatpush3.bf16.msra.mxu1 %v9935_v43 }
 0x9ee   : > { %8656 = vmatpush3.bf16.msra.mxu0 %v9937_v16  ;;  %8651 = vmatprep.mubr.msk.bf16.mxu1 %vm8915_vm11, %v8914_v52 }
 0x9ef   : > { %8661 = vmatprep.subr.bf16.mxu1 %v8914_v52  ;;  %8657 = vmatprep.mubr.msk.bf16.mxu0 %vm8915_vm11, %v8914_v52 }
 0x9f0   : > { %8667 = vmatprep.subr.bf16.mxu0 %v8914_v52 }
 0x9f4   : > { %8652 = vmatmul.mubr.msk.bf16.vlgmr.msra.gmra.mrb[112].mxu1 %vm1038_vm10, %v10123_v40 }
 0x9f5   : > { %8658 = vmatmul.mubr.msk.bf16.vlgmr.msra.gmra.mrb[120].mxu0 %vm1038_vm10, %v10123_v40  ;;  %8662 = vmatpush3.bf16.msra.mxu1 %v9945_v6 }
 0x9f6   : > { %8668 = vmatpush3.bf16.msra.mxu0 %v9947_v37  ;;  %8663 = vmatprep.mubr.msk.bf16.mxu1 %vm8915_vm11, %v8914_v52 }
 0x9f7   : > { %8673 = vmatprep.subr.bf16.mxu1 %v8914_v52  ;;  %8669 = vmatprep.mubr.msk.bf16.mxu0 %vm8915_vm11, %v8914_v52 }
 0x9f8   : > { %8679 = vmatprep.subr.bf16.mxu0 %v8914_v52 }
 0x9fc   : > { %8664 = vmatmul.mubr.msk.bf16.vlgmr.msra.gmra.mrb[116].mxu1 %vm1038_vm10, %v10123_v40 }
 0x9fd   : > { %8670 = vmatmul.mubr.msk.bf16.vlgmr.msra.gmra.mrb[124].mxu0 %vm1038_vm10, %v10123_v40  ;;  %8674 = vmatpush3.bf16.msra.mxu1 %v9961_v10 }
 0x9fe   : > { %8680 = vmatpush3.bf16.msra.mxu0 %v9963_v58  ;;  %8675 = vmatprep.mubr.msk.bf16.mxu1 %vm8915_vm11, %v8914_v52 }
 0x9ff   : > { %8685 = vmatprep.subr.bf16.mxu1 %v8914_v52  ;;  %8681 = vmatprep.mubr.msk.bf16.mxu0 %vm8915_vm11, %v8914_v52 }
 0xa00   : > { %8691 = vmatprep.subr.bf16.mxu0 %v8914_v52 }
 0xa04   : > { %8676 = vmatmul.mubr.msk.bf16.vlgmr.msra.gmra.mrb[120].mxu1 %vm1038_vm10, %v10123_v40 }
 0xa05   : > { %8682 = vmatmul.mubr.msk.bf16.vlgmr.msra.gmra.mrb[128].mxu0 %vm1038_vm10, %v10123_v40  ;;  %8686 = vmatpush3.bf16.msra.mxu1 %v9977_v4 }
 0xa06   : > { %8692 = vmatpush3.bf16.msra.mxu0 %v9979_v21  ;;  %8687 = vmatprep.mubr.msk.bf16.mxu1 %vm8915_vm11, %v8914_v52 }
 0xa07   : > { %8697 = vmatprep.subr.bf16.mxu1 %v8914_v52  ;;  %8693 = vmatprep.mubr.msk.bf16.mxu0 %vm8915_vm11, %v8914_v52 }
 0xa08   : > { %8703 = vmatprep.subr.bf16.mxu0 %v8914_v52 }
 0xa0c   : > { %8688 = vmatmul.mubr.msk.bf16.vlgmr.msra.gmra.mrb[124].mxu1 %vm1038_vm10, %v10123_v40 }
 0xa0d   : > { %8694 = vmatmul.mubr.msk.bf16.vlgmr.msra.gmra.mrb[132].mxu0 %vm1038_vm10, %v10123_v40  ;;  %8698 = vmatpush3.bf16.msra.mxu1 %v9996_v7 }
 0xa0e   : > { %8704 = vmatpush3.bf16.msra.mxu0 %v9998_v9  ;;  %8699 = vmatprep.mubr.msk.bf16.mxu1 %vm8915_vm11, %v8914_v52 }
 0xa0f   : > { %8709 = vmatprep.subr.bf16.mxu1 %v8914_v52  ;;  %8705 = vmatprep.mubr.msk.bf16.mxu0 %vm8915_vm11, %v8914_v52 }
 0xa10   : > { %8715 = vmatprep.subr.bf16.mxu0 %v8914_v52 }
 0xa14   : > { %8700 = vmatmul.mubr.msk.bf16.vlgmr.msra.gmra.mrb[128].mxu1 %vm1038_vm10, %v10123_v40 }
 0xa15   : > { %8706 = vmatmul.mubr.msk.bf16.vlgmr.msra.gmra.mrb[136].mxu0 %vm1038_vm10, %v10123_v40  ;;  %8710 = vmatpush3.bf16.msra.mxu1 %v9889_v44 }
 0xa16   : > { %8716 = vmatpush3.bf16.msra.mxu0 %v9903_v19  ;;  %8711 = vmatprep.mubr.msk.bf16.mxu1 %vm8915_vm11, %v8914_v52 }
 0xa17   : > { %8721 = vmatprep.subr.bf16.mxu1 %v8914_v52  ;;  %8717 = vmatprep.mubr.msk.bf16.mxu0 %vm8915_vm11, %v8914_v52 }
 0xa18   : > { %8727 = vmatprep.subr.bf16.mxu0 %v8914_v52 }
 0xa1c   : > { %8712 = vmatmul.mubr.msk.bf16.vlgmr.msra.gmra.mrb[132].mxu1 %vm1038_vm10, %v8001_v36 }
 0xa1d   : > { %8718 = vmatmul.mubr.msk.bf16.vlgmr.msra.gmra.mrb[140].mxu0 %vm1038_vm10, %v8001_v36  ;;  %8722 = vmatpush3.bf16.msra.mxu1 %v9905_v25 }
 0xa1e   : > { %8728 = vmatpush3.bf16.msra.mxu0 %v9919_v53  ;;  %8723 = vmatprep.mubr.msk.bf16.mxu1 %vm8915_vm11, %v8914_v52 }
 0xa1f   : > { %8733 = vmatprep.subr.bf16.mxu1 %v8914_v52  ;;  %8729 = vmatprep.mubr.msk.bf16.mxu0 %vm8915_vm11, %v8914_v52 }
 0xa20   : > { %8739 = vmatprep.subr.bf16.mxu0 %v8914_v52 }
 0xa24   : > { %8724 = vmatmul.mubr.msk.bf16.vlgmr.msra.gmra.mrb[136].mxu1 %vm1038_vm10, %v8001_v36 }
 0xa25   : > { %8730 = vmatmul.mubr.msk.bf16.vlgmr.msra.gmra.mrb[144].mxu0 %vm1038_vm10, %v8001_v36  ;;  %8734 = vmatpush3.bf16.msra.mxu1 %v9921_v38 }
 0xa26   : > { %8740 = vmatpush3.bf16.msra.mxu0 %v9935_v43  ;;  %8735 = vmatprep.mubr.msk.bf16.mxu1 %vm8915_vm11, %v8914_v52 }
 0xa27   : > { %8745 = vmatprep.subr.bf16.mxu1 %v8914_v52  ;;  %8741 = vmatprep.mubr.msk.bf16.mxu0 %vm8915_vm11, %v8914_v52 }
 0xa28   : > { %8751 = vmatprep.subr.bf16.mxu0 %v8914_v52 }
 0xa2c   : > { %8736 = vmatmul.mubr.msk.bf16.vlgmr.msra.gmra.mrb[140].mxu1 %vm1038_vm10, %v8001_v36 }
 0xa2d   : > { %8742 = vmatmul.mubr.msk.bf16.vlgmr.msra.gmra.mrb[148].mxu0 %vm1038_vm10, %v8001_v36  ;;  %8746 = vmatpush3.bf16.msra.mxu1 %v9937_v16 }
 0xa2e   : > { %8752 = vmatpush3.bf16.msra.mxu0 %v8913_v50  ;;  %8747 = vmatprep.mubr.msk.bf16.mxu1 %vm8915_vm11, %v8914_v52 }
 0xa2f   : > { %8757 = vmatprep.subr.bf16.mxu1 %v8914_v52  ;;  %8753 = vmatprep.mubr.msk.bf16.mxu0 %vm8915_vm11, %v8914_v52 }
 0xa30   : > { %8763 = vmatprep.subr.bf16.mxu0 %v8914_v52 }
 0xa34   : > { %8748 = vmatmul.mubr.msk.bf16.vlgmr.msra.gmra.mrb[144].mxu1 %vm1038_vm10, %v8001_v36 }
 0xa35   : > { %8754 = vmatmul.mubr.msk.bf16.vlgmr.msra.gmra.mrb[152].mxu0 %vm1038_vm10, %v8001_v36  ;;  %8758 = vmatpush3.bf16.msra.mxu1 %v9947_v37 }
 0xa36   : > { %8764 = vmatpush3.bf16.msra.mxu0 %v9961_v10  ;;  %8759 = vmatprep.mubr.msk.bf16.mxu1 %vm8915_vm11, %v8914_v52 }
 0xa37   : > { %8769 = vmatprep.subr.bf16.mxu1 %v8914_v52  ;;  %8765 = vmatprep.mubr.msk.bf16.mxu0 %vm8915_vm11, %v8914_v52 }
 0xa38   : > { %8775 = vmatprep.subr.bf16.mxu0 %v8914_v52 }
 0xa3c   : > { %8760 = vmatmul.mubr.msk.bf16.vlgmr.msra.gmra.mrb[148].mxu1 %vm1038_vm10, %v8001_v36 }
 0xa3d   : > { %8766 = vmatmul.mubr.msk.bf16.vlgmr.msra.gmra.mrb[156].mxu0 %vm1038_vm10, %v8001_v36  ;;  %8770 = vmatpush3.bf16.msra.mxu1 %v9963_v58 }
 0xa3e   : > { %8776 = vmatpush3.bf16.msra.mxu0 %v9977_v4  ;;  %8771 = vmatprep.mubr.msk.bf16.mxu1 %vm8915_vm11, %v8914_v52 }
 0xa3f   : > { %8781 = vmatprep.subr.bf16.mxu1 %v8914_v52  ;;  %8777 = vmatprep.mubr.msk.bf16.mxu0 %vm8915_vm11, %v8914_v52 }
 0xa40   : > { %8787 = vmatprep.subr.bf16.mxu0 %v8914_v52 }
 0xa44   : > { %8772 = vmatmul.mubr.msk.bf16.vlgmr.msra.gmra.mrb[152].mxu1 %vm1038_vm10, %v8001_v36 }
 0xa45   : > { %8778 = vmatmul.mubr.msk.bf16.vlgmr.msra.gmra.mrb[160].mxu0 %vm1038_vm10, %v8001_v36  ;;  %8782 = vmatpush3.bf16.msra.mxu1 %v9979_v21 }
 0xa46   : > { %8788 = vmatpush3.bf16.msra.mxu0 %v9996_v7  ;;  %8783 = vmatprep.mubr.msk.bf16.mxu1 %vm8915_vm11, %v8914_v52 }
 0xa47   : > { %8793 = vmatprep.subr.bf16.mxu1 %v8914_v52  ;;  %8789 = vmatprep.mubr.msk.bf16.mxu0 %vm8915_vm11, %v8914_v52 }
 0xa4c   : > { %8784 = vmatmul.mubr.msk.bf16.vlgmr.msra.gmra.mrb[156].mxu1 %vm1038_vm10, %v8001_v36 }
 0xa4d   : > { %8790 = vmatmul.mubr.msk.bf16.vlgmr.msra.gmra.mrb[164].mxu0 %vm1038_vm10, %v8001_v36  ;;  %8794 = vmatpush3.bf16.msra.mxu1 %v9998_v9 }
 0xa4e   : > { %8795 = vmatprep.mubr.msk.bf16.mxu1 %vm8915_vm11, %v8914_v52 }
 0xa53   : > { %v4362_v50 = vpop.f32.mrb[60].mxu0 }
 0xa54   : > { %v10294_v44 = vpop.f32.mrb[60].mxu1  ;;  %8796 = vmatmul.mubr.msk.bf16.vlgmr.msra.gmra.mrb[160].mxu1 %vm1038_vm10, %v8001_v36  ;;  %v8453_v19 = vpop.f32.mrb[61].mxu0 }
 0xa55   : > { %v8459_v25 = vpop.f32.mrb[61].mxu1  ;;  %v4365_v53 = vpop.f32.mrb[62].mxu0 }
 0xa56   : > { %v4405_v38 = vpop.f32.mrb[62].mxu1  ;;  %v8454_v43 = vpop.f32.mrb[63].mxu0 }
 0xa57   : > { %v8460_v16 = vpop.f32.mrb[63].mxu1 }
 0xa5b   : > { %v4442_v6 = vpop.f32.mrb[64].mxu0 }
 0xa5c   : > { %v4482_v37 = vpop.f32.mrb[64].mxu1  ;;  %v8465_v10 = vpop.f32.mrb[65].mxu0 }
 0xa5d   : > { %v8471_v58 = vpop.f32.mrb[65].mxu1  ;;  %v4445_v60 = vpop.f32.mrb[66].mxu0 }
 0xa5e   : > { %v4485_v5 = vpop.f32.mrb[66].mxu1  ;;  %v8466_v34 = vpop.f32.mrb[67].mxu0 }
 0xa5f   : > { %v8472_v24 = vpop.f32.mrb[67].mxu1 }
 0xa63   : > { %v4522_v52 = vpop.f32.mrb[68].mxu0 }
 0xa64   : > { %v4562_v22 = vpop.f32.mrb[68].mxu1  ;;  %v8477_v45 = vpop.f32.mrb[69].mxu0 }
 0xa65   : > { %v8483_v57 = vpop.f32.mrb[69].mxu1  ;;  %v4525_v28 = vpop.f32.mrb[70].mxu0 }
 0xa66   : > { %v4565_v46 = vpop.f32.mrb[70].mxu1  ;;  %v8478_v27 = vpop.f32.mrb[71].mxu0 }
 0xa67   : > { %v8484_v30 = vpop.f32.mrb[71].mxu1 }
 0xa6b   : > { %v4602_v41 = vpop.f32.mrb[72].mxu0 }
 0xa6c   : > { %v8489_v4 = vpop.f32.mrb[73].mxu0 }
 0xa6d   : > { %v4605_v21 = vpop.f32.mrb[74].mxu0 }
 0xa6e   : > { %v8490_v55 = vpop.f32.mrb[75].mxu0 }
 0xa73   : > { %v4642_v2 = vpop.f32.mrb[72].mxu1 }
 0xa74   : > { %v4682_v56 = vpop.f32.mrb[76].mxu0  ;;  %v8495_v20 = vpop.f32.mrb[73].mxu1 }
 0xa75   : > { %v8501_v61 = vpop.f32.mrb[77].mxu0  ;;  %v4645_v54 = vpop.f32.mrb[74].mxu1 }
 0xa76   : > { %v4685_v26 = vpop.f32.mrb[78].mxu0  ;;  %v8496_v63 = vpop.f32.mrb[75].mxu1 }
 0xa77   : > { %v8502_v0 = vpop.f32.mrb[79].mxu0 }
 0xa7b   : > { %v4722_v51 = vpop.f32.mrb[76].mxu1 }
 0xa7c   : > { %v4762_v18 = vpop.f32.mrb[80].mxu0  ;;  %v8507_v8 = vpop.f32.mrb[77].mxu1 }
 0xa7d   : > { %v8513_v11 = vpop.f32.mrb[81].mxu0  ;;  %v4725_v7 = vpop.f32.mrb[78].mxu1 }
 0xa7e   : > { %v4765_v9 = vpop.f32.mrb[82].mxu0  ;;  %v8508_v49 = vpop.f32.mrb[79].mxu1 }
 0xa7f   : > { %v8514_v29 = vpop.f32.mrb[83].mxu0 }
 0xa83   : > { %v4802_v13 = vpop.f32.mrb[80].mxu1 }
 0xa84   : > { %v4842_v47 = vpop.f32.mrb[84].mxu0  ;;  %v8519_v17 = vpop.f32.mrb[81].mxu1 }
 0xa85   : > { %v8525_v15 = vpop.f32.mrb[85].mxu0  ;;  %v4805_v35 = vpop.f32.mrb[82].mxu1 }
 0xa86   : > { %v4845_v42 = vpop.f32.mrb[86].mxu0  ;;  %v8520_v33 = vpop.f32.mrb[83].mxu1 }
 0xa87   : > { %v8526_v3 = vpop.f32.mrb[87].mxu0 }
 0xa8b   : > { %v4882_v12 = vpop.f32.mrb[84].mxu1 }
 0xa8c   : > { %v4960_v39 = vpop.f32.mrb[88].mxu0  ;;  %v8531_v62 = vpop.f32.mrb[85].mxu1 }
 0xa8d   : > { %v4961_v59 = vadd.f32 %v4960_v39, %v10112_v1  ;;  %v8537_v48 = vpop.f32.mrb[89].mxu0  ;;  %v4885_v31 = vpop.f32.mrb[86].mxu1 }
 0xa8e   : > { %v8532_v14 = vpop.f32.mrb[87].mxu1 }
 0xa90   : > { %v5033_v40 = vpop.f32.mrb[90].mxu0 }
 0xa91   : > { %v5034_v23 = vadd.f32 %v5033_v40, %v4362_v50  ;;  %v8542_v32 = vpop.f32.mrb[91].mxu0 }
 0xa93   : > { %v5106_v36 = vpop.f32.mrb[10].mxu1 }
 0xa94   : > { %v5179_v19 = vpop.f32.mrb[92].mxu0  ;;  %v5107_v25 = vadd.f32 %v5106_v36, %v10294_v44  ;;  %v8547_v38 = vpop.f32.mrb[11].mxu1 }
 0xa95   : > { %v5180_v53 = vadd.f32 %v5179_v19, %v4442_v6  ;;  %v8552_v43 = vpop.f32.mrb[93].mxu0 }
 0xa97   : > { %v5252_v16 = vpop.f32.mrb[88].mxu1 }
 0xa98   : > { %v5325_v10 = vpop.f32.mrb[94].mxu0  ;;  %v5253_v58 = vadd.f32 %v5252_v16, %v4482_v37  ;;  %v8557_v5 = vpop.f32.mrb[89].mxu1 }
 0xa99   : > { %v5326_v60 = vadd.f32 %v5325_v10, %v4522_v52  ;;  %v8562_v34 = vpop.f32.mrb[95].mxu0 }
 0xa9b   : > { %v5398_v24 = vpop.f32.mrb[90].mxu1 }
 0xa9c   : > { %v5471_v45 = vpop.f32.mrb[96].mxu0  ;;  %v5399_v57 = vadd.f32 %v5398_v24, %v4562_v22  ;;  %v8567_v46 = vpop.f32.mrb[91].mxu1 }
 0xa9d   : > { %v5472_v28 = vadd.f32 %v5471_v45, %v4602_v41  ;;  %v8572_v50 = vpop.f32.mrb[97].mxu0 }
 0xa9f   : > { %v5544_v27 = vpop.f32.mrb[92].mxu1 }
 0xaa0   : > { %v5617_v30 = vpop.f32.mrb[98].mxu0  ;;  %v10300_v4 = vadd.f32 %v5544_v27, %v10112_v1  ;;  %v8577_v6 = vpop.f32.mrb[93].mxu1 }
 0xaa1   : > { %v10302_v44 = vadd.f32 %v5617_v30, %v4642_v2  ;;  %v8582_v21 = vpop.f32.mrb[99].mxu0 }
 0xaa3   : > { %v5690_v55 = vpop.f32.mrb[94].mxu1 }
 0xaa4   : > { %v5763_v37 = vpop.f32.mrb[100].mxu0  ;;  %v10304_v52 = vadd.f32 %v5690_v55, %v4682_v56  ;;  %v8587_v61 = vpop.f32.mrb[95].mxu1 }
 0xaa5   : > { %v10306_v20 = vadd.f32 %v5763_v37, %v4722_v51  ;;  %v8592_v22 = vpop.f32.mrb[101].mxu0 }
 0xaa7   : > { %v5836_v41 = vpop.f32.mrb[96].mxu1 }
 0xaa8   : > { %v5909_v54 = vpop.f32.mrb[102].mxu0  ;;  %v10308_v26 = vadd.f32 %v5836_v41, %v4762_v18  ;;  %v8597_v1 = vpop.f32.mrb[97].mxu1 }
 0xaa9   : > { %v10310_v63 = vadd.f32 %v5909_v54, %v4802_v13  ;;  %v8602_v0 = vpop.f32.mrb[103].mxu0 }
 0xaab   : > { %v5982_v2 = vpop.f32.mrb[98].mxu1 }
 0xaac   : > { %v6055_v8 = vpop.f32.mrb[104].mxu0  ;;  %v10312_v11 = vadd.f32 %v5982_v2, %v4842_v47  ;;  %v8607_v56 = vpop.f32.mrb[99].mxu1 }
 0xaad   : > { %v10314_v7 = vadd.f32 %v6055_v8, %v4882_v12  ;;  %v8612_v9 = vpop.f32.mrb[105].mxu0 }
 0xaaf   : > { %v6098_v51 = vpop.f32.mrb[100].mxu1 }
 0xab0   : > { %v6138_v49 = vpop.f32.mrb[108].mxu0  ;;  %v10316_v29 = vadd.f32 %v6098_v51, %v4961_v59  ;;  %v8617_v18 = vpop.f32.mrb[101].mxu1 }
 0xab1   : > { %v10318_v17 = vadd.f32 %v6138_v49, %v5034_v23  ;;  %v8623_v15 = vpop.f32.mrb[109].mxu0  ;;  %v6101_v13 = vpop.f32.mrb[102].mxu1 }
 0xab2   : > { %v6141_v35 = vpop.f32.mrb[110].mxu0  ;;  %v8618_v42 = vpop.f32.mrb[103].mxu1 }
 0xab3   : > { %v8624_v33 = vpop.f32.mrb[111].mxu0 }
 0xab7   : > { %v6178_v3 = vpop.f32.mrb[104].mxu1 }
 0xab8   : > { %v6218_v39 = vpop.f32.mrb[112].mxu0  ;;  %v10320_v47 = vadd.f32 %v6178_v3, %v5107_v25  ;;  %v8629_v62 = vpop.f32.mrb[105].mxu1 }
 0xab9   : > { %v10322_v12 = vadd.f32 %v6218_v39, %v5180_v53  ;;  %v8635_v48 = vpop.f32.mrb[113].mxu0  ;;  %v6181_v31 = vpop.f32.mrb[106].mxu1 }
 0xaba   : > { %v6221_v14 = vpop.f32.mrb[114].mxu0  ;;  %v8630_v59 = vpop.f32.mrb[107].mxu1 }
 0xabb   : > { %v8636_v40 = vpop.f32.mrb[115].mxu0 }
 0xabf   : > { %v6258_v23 = vpop.f32.mrb[108].mxu1 }
 0xac0   : > { %v6298_v32 = vpop.f32.mrb[116].mxu0  ;;  %v10324_v36 = vadd.f32 %v6258_v23, %v5253_v58  ;;  %v8641_v38 = vpop.f32.mrb[109].mxu1 }
 0xac1   : > { %v10326_v19 = vadd.f32 %v6298_v32, %v5326_v60  ;;  %v8647_v43 = vpop.f32.mrb[117].mxu0  ;;  %v6261_v16 = vpop.f32.mrb[110].mxu1 }
 0xac2   : > { %v6301_v10 = vpop.f32.mrb[118].mxu0  ;;  %v8642_v25 = vpop.f32.mrb[111].mxu1 }
 0xac3   : > { %v8648_v5 = vpop.f32.mrb[119].mxu0  ;;  %v10356_v38 = vpop.permute.xlu0 %7346 }
 0xac7   : > { %v6338_v53 = vpop.f32.mrb[112].mxu1 }
 0xac8   : > { %v6378_v34 = vpop.f32.mrb[120].mxu0  ;;  %v10328_v24 = vadd.f32 %v6338_v53, %v5399_v57  ;;  %v8653_v46 = vpop.f32.mrb[113].mxu1 }
 0xac9   : > { %v10330_v45 = vadd.f32 %v6378_v34, %v5472_v28  ;;  %v8659_v50 = vpop.f32.mrb[121].mxu0  ;;  %v6341_v27 = vpop.f32.mrb[114].mxu1 }
 0xaca   : > { %v6381_v30 = vpop.f32.mrb[122].mxu0  ;;  %v8654_v58 = vpop.f32.mrb[115].mxu1 }
 0xacb   : > { %v8660_v6 = vpop.f32.mrb[123].mxu0 }
 0xacf   : > { %v6418_v60 = vpop.f32.mrb[116].mxu1 }
 0xad0   : > { %v6458_v21 = vpop.f32.mrb[124].mxu0  ;;  %v10333_v55 = vadd.f32 %v6418_v60, %v10300_v4  ;;  %v8665_v61 = vpop.f32.mrb[117].mxu1 }
 0xad1   : > { %v10336_v37 = vadd.f32 %v6458_v21, %v10302_v44  ;;  %v8671_v22 = vpop.f32.mrb[125].mxu0  ;;  %v6421_v57 = vpop.f32.mrb[118].mxu1 }
 0xad2   : > { %v6461_v41 = vpop.f32.mrb[126].mxu0  ;;  %v8666_v28 = vpop.f32.mrb[119].mxu1 }
 0xad3   : > { %v8672_v54 = vpop.f32.mrb[127].mxu0 }
 0xad7   : > { %v6498_v1 = vpop.f32.mrb[120].mxu1 }
 0xad8   : > { %v6538_v0 = vpop.f32.mrb[128].mxu0  ;;  %v10339_v2 = vadd.f32 %v6498_v1, %v10304_v52  ;;  %v8677_v56 = vpop.f32.mrb[121].mxu1 }
 0xad9   : > { %v10342_v8 = vadd.f32 %v6538_v0, %v10306_v20  ;;  %v8683_v4 = vpop.f32.mrb[129].mxu0  ;;  %v6501_v9 = vpop.f32.mrb[122].mxu1 }
 0xada   : > { %v6541_v51 = vpop.f32.mrb[130].mxu0  ;;  %v8678_v44 = vpop.f32.mrb[123].mxu1 }
 0xadb   : > { %v8684_v49 = vpop.f32.mrb[131].mxu0 }
 0xadf   : > { %v6578_v18 = vpop.f32.mrb[124].mxu1 }
 0xae0   : > { %v6618_v15 = vpop.f32.mrb[132].mxu0  ;;  %v10345_v13 = vadd.f32 %v6578_v18, %v10308_v26  ;;  %v8689_v42 = vpop.f32.mrb[125].mxu1 }
 0xae1   : > { %v10348_v35 = vadd.f32 %v6618_v15, %v10310_v63  ;;  %v8695_v52 = vpop.f32.mrb[133].mxu0  ;;  %v6581_v33 = vpop.f32.mrb[126].mxu1 }
 0xae2   : > { %v6621_v3 = vpop.f32.mrb[134].mxu0  ;;  %v8690_v20 = vpop.f32.mrb[127].mxu1 }
 0xae3   : > { %v8696_v39 = vpop.f32.mrb[135].mxu0 }
 0xae7   : > { %v6658_v62 = vpop.f32.mrb[128].mxu1 }
 0xae8   : > { %v6698_v48 = vpop.f32.mrb[136].mxu0  ;;  %v10351_v31 = vadd.f32 %v6658_v62, %v10312_v11  ;;  %v8701_v59 = vpop.f32.mrb[129].mxu1 }
 0xae9   : > { %v10354_v14 = vadd.f32 %v6698_v48, %v10314_v7  ;;  %v8707_v26 = vpop.f32.mrb[137].mxu0  ;;  %v6661_v40 = vpop.f32.mrb[130].mxu1 }
 0xaea   : > { %v6701_v23 = vpop.f32.mrb[138].mxu0  ;;  %v8702_v63 = vpop.f32.mrb[131].mxu1 }
 0xaeb   : > { %v8708_v32 = vpop.f32.mrb[139].mxu0  ;;  %v10390_v63 = vpop.permute.xlu1 %7582 }
 0xaef   : > { %v6759_v43 = vpop.f32.mrb[132].mxu1 }
 0xaf0   : > { %v6799_v16 = vpop.f32.mrb[140].mxu0  ;;  %v7325_v10 = vadd.f32 %v6759_v43, %v10316_v29  ;;  %v8713_v5 = vpop.f32.mrb[133].mxu1 }
 0xaf1   : > { %v7326_v25 = vadd.f32 %v6799_v16, %v10318_v17  ;;  %v8719_v11 = vpop.f32.mrb[141].mxu0  ;;  %v6762_v53 = vpop.f32.mrb[134].mxu1 }
 0xaf2   : > { %v6802_v34 = vpop.f32.mrb[142].mxu0  ;;  %v10361_v7 = vadd.f32 %v10356_v38, %v7325_v10  ;;  %v8714_v50 = vpop.f32.mrb[135].mxu1 }
 0xaf3   : > { %v10364_v46 = vadd.f32 %v10356_v38, %v7326_v25  ;;  %v8720_v27 = vpop.f32.mrb[143].mxu0 }
 0xaf4   : > { %v7365_v30 = vmax.f32 %v10361_v7, 0.0 }
 0xaf5   : > { %v7366_v58 = vmax.f32 %v10364_v46, 0.0 }
 0xaf6   : > { %v7381_v29 = vsel %vm1038_vm10, %v7365_v30, 0.0 }
 0xaf7   : > { %v7382_v17 = vsel %vm1038_vm10, %v7366_v58, 0.0  ;;  %v6839_v60 = vpop.f32.mrb[136].mxu1 }
 0xaf8   : > { %v7383_v6 = vadd.f32 %v7382_v17, %v7381_v29  ;;  %v6879_v21 = vpop.f32.mrb[144].mxu0  ;;  %v7327_v61 = vadd.f32 %v6839_v60, %v10320_v47  ;;  %v8725_v57 = vpop.f32.mrb[137].mxu1 }
 0xaf9   : > { %v7328_v22 = vadd.f32 %v6879_v21, %v10322_v12  ;;  %v8731_v41 = vpop.f32.mrb[145].mxu0  ;;  %v6842_v28 = vpop.f32.mrb[138].mxu1 }
 0xafa   : > { %v6882_v54 = vpop.f32.mrb[146].mxu0  ;;  %v10377_v1 = vadd.f32 %v10356_v38, %v7327_v61  ;;  %v8726_v56 = vpop.f32.mrb[139].mxu1 }
 0xafb   : > { %v10380_v0 = vadd.f32 %v10356_v38, %v7328_v22  ;;  %v8732_v4 = vpop.f32.mrb[147].mxu0  ;;  %v10401_v22 = vpop.permute.xlu0 %7594 }
 0xafc   : > { %v7367_v9 = vmax.f32 %v10377_v1, 0.0 }
 0xafd   : > { %v7368_v51 = vmax.f32 %v10380_v0, 0.0 }
 0xafe   : > { %v7384_v47 = vsel %vm1038_vm10, %v7367_v9, 0.0 }
 0xaff   : > { %v7386_v12 = vsel %vm1038_vm10, %v7368_v51, 0.0  ;;  %v7385_v44 = vadd.f32 %v7384_v47, %v7383_v6  ;;  %v6919_v49 = vpop.f32.mrb[140].mxu1 }
 0xb00   : > { %v6959_v18 = vpop.f32.mrb[148].mxu0  ;;  %v7329_v15 = vadd.f32 %v6919_v49, %v10324_v36  ;;  %v8737_v52 = vpop.f32.mrb[141].mxu1 }
 0xb01   : > { %v7330_v42 = vadd.f32 %v6959_v18, %v10326_v19  ;;  %v8743_v33 = vpop.f32.mrb[149].mxu0  ;;  %v7387_v3 = vadd.f32 %v7386_v12, %v7385_v44  ;;  %v6922_v20 = vpop.f32.mrb[142].mxu1 }
 0xb02   : > { %v6962_v39 = vpop.f32.mrb[150].mxu0  ;;  %v7353_v62 = vadd.f32 %v10356_v38, %v7329_v15  ;;  %v8738_v59 = vpop.f32.mrb[143].mxu1 }
 0xb03   : > { %v7354_v48 = vadd.f32 %v10356_v38, %v7330_v42  ;;  %v8744_v26 = vpop.f32.mrb[151].mxu0  ;;  %v10428_v20 = vpop.permute.xlu0 %7602 }
 0xb04   : > { %v7369_v40 = vmax.f32 %v7353_v62, 0.0 }
 0xb05   : > { %v7370_v23 = vmax.f32 %v7354_v48, 0.0 }
 0xb06   : > { %v7388_v32 = vsel %vm1038_vm10, %v7369_v40, 0.0 }
 0xb07   : > { %v7390_v36 = vsel %vm1038_vm10, %v7370_v23, 0.0  ;;  %v7389_v19 = vadd.f32 %v7388_v32, %v7387_v3  ;;  %v6999_v43 = vpop.f32.mrb[144].mxu1 }
 0xb08   : > { %v7039_v16 = vpop.f32.mrb[152].mxu0  ;;  %v7331_v10 = vadd.f32 %v6999_v43, %v10328_v24  ;;  %v8749_v11 = vpop.f32.mrb[145].mxu1 }
 0xb09   : > { %v7332_v25 = vadd.f32 %v7039_v16, %v10330_v45  ;;  %v10397_v5 = vadd.f32 %v7039_v16, %v10354_v14  ;;  %v8755_v53 = vpop.f32.mrb[153].mxu0  ;;  %v7391_v34 = vadd.f32 %v7390_v36, %v7389_v19  ;;  %v7002_v50 = vpop.f32.mrb[146].mxu1 }
 0xb0a   : > { %v7042_v27 = vpop.f32.mrb[154].mxu0  ;;  %v7355_v29 = vadd.f32 %v10356_v38, %v7331_v10  ;;  %v8750_v6 = vpop.f32.mrb[147].mxu1 }
 0xb0b   : > { %v7356_v17 = vadd.f32 %v10356_v38, %v7332_v25  ;;  %v8756_v60 = vpop.f32.mrb[155].mxu0  ;;  %v10403_v24 = vpop.permute.xlu1 %7586 }
 0xb0c   : > { %v7371_v21 = vmax.f32 %v7355_v29, 0.0 }
 0xb0d   : > { %v7372_v61 = vmax.f32 %v7356_v17, 0.0 }
 0xb0e   : > { %v7392_v45 = vsel %vm1038_vm10, %v7371_v21, 0.0 }
 0xb0f   : > { %v7394_v14 = vsel %vm1038_vm10, %v7372_v61, 0.0  ;;  %v7393_v57 = vadd.f32 %v7392_v45, %v7391_v34  ;;  %v7079_v41 = vpop.f32.mrb[148].mxu1  ;;  %v10430_v39 = vpop.permute.xlu1 %7590 }
 0xb10   : > { %v7119_v28 = vpop.f32.mrb[156].mxu0  ;;  %v7333_v54 = vadd.f32 %v7079_v41, %v10333_v55  ;;  %v8761_v0 = vpop.f32.mrb[149].mxu1 }
 0xb11   : > { %v7334_v1 = vadd.f32 %v7119_v28, %v10336_v37  ;;  %v8767_v56 = vpop.f32.mrb[157].mxu0  ;;  %v7395_v4 = vadd.f32 %v7394_v14, %v7393_v57  ;;  %v7082_v47 = vpop.f32.mrb[150].mxu1 }
 0xb12   : > { %v7122_v12 = vpop.f32.mrb[158].mxu0  ;;  %v10410_v44 = vadd.f32 %v10356_v38, %v7333_v54  ;;  %v8762_v49 = vpop.f32.mrb[151].mxu1 }
 0xb13   : > { %v8768_v18 = vpop.f32.mrb[159].mxu0  ;;  %v7412_v15 = vmul.f32 0.125, %v7395_v4  ;;  %v10413_v42 = vadd.f32 %v10356_v38, %v7334_v1  ;;  %v10470_v57 = vpop.permute.xlu0 %7610 }
 0xb14   : > { %v7373_v52 = vmax.f32 %v10410_v44, 0.0 }
 0xb15   : > { %v10418_v55 = vsub.f32 %v7365_v30, %v7412_v15  ;;  %v10422_v37 = vsub.f32 %v7366_v58, %v7412_v15  ;;  %v10424_v33 = vsub.f32 %v7367_v9, %v7412_v15  ;;  %v10426_v3 = vsub.f32 %v7368_v51, %v7412_v15 }
 0xb16   : > { %v10432_v62 = vsub.f32 %v7369_v40, %v7412_v15  ;;  %v10434_v48 = vsub.f32 %v7370_v23, %v7412_v15  ;;  %v10436_v59 = vsub.f32 %v7371_v21, %v7412_v15  ;;  %v10438_v7 = vsub.f32 %v7372_v61, %v7412_v15  ;;  %v10462_v21 = vpop.permute.xlu1 %7598 }
 0xb17   : > { %v7430_v46 = vmul.f32 %v10418_v55, %v10418_v55  ;;  %v7431_v30 = vmul.f32 %v10422_v37, %v10422_v37  ;;  %v7432_v58 = vmul.f32 %v10424_v33, %v10424_v33  ;;  %v7374_v9 = vmax.f32 %v10413_v42, 0.0  ;;  %v7159_v51 = vpop.f32.mrb[152].mxu1 }
 0xb18   : > { %v7199_v26 = vpop.f32.mrb[160].mxu0  ;;  %v8773_v40 = vpop.f32.mrb[153].mxu1  ;;  %v7433_v32 = vmul.f32 %v10426_v3, %v10426_v3  ;;  %v7434_v10 = vmul.f32 %v10432_v62, %v10432_v62  ;;  %v7396_v50 = vsel %vm1038_vm10, %v7373_v52, 0.0  ;;  %v7335_v29 = vadd.f32 %v7159_v51, %v10339_v2 }
 0xb19   : > { %v8779_v23 = vpop.f32.mrb[161].mxu0  ;;  %v7446_v36 = vsel %vm1038_vm10, %v7430_v46, 0.0  ;;  %v7447_v19 = vsel %vm1038_vm10, %v7431_v30, 0.0  ;;  %v7162_v43 = vpop.f32.mrb[154].mxu1  ;;  %v7449_v34 = vsel %vm1038_vm10, %v7432_v58, 0.0  ;;  %v7397_v27 = vsel %vm1038_vm10, %v7374_v9, 0.0 }
 0xb1a   : > { %v7202_v16 = vpop.f32.mrb[162].mxu0  ;;  %v7448_v25 = vadd.f32 %v7447_v19, %v7446_v36  ;;  %v8774_v11 = vpop.f32.mrb[155].mxu1  ;;  %v7398_v6 = vadd.f32 %v7397_v27, %v7396_v50  ;;  %v7336_v60 = vadd.f32 %v7199_v26, %v10342_v8  ;;  %v7435_v61 = vmul.f32 %v10434_v48, %v10434_v48 }
 0xb1b   : > { %v8780_v53 = vpop.f32.mrb[163].mxu0  ;;  %v7451_v45 = vsel %vm1038_vm10, %v7433_v32, 0.0  ;;  %v10468_v14 = vadd.f32 %v10356_v38, %v7335_v29  ;;  %v7436_v2 = vmul.f32 %v10436_v59, %v10436_v59  ;;  %v7453_v8 = vsel %vm1038_vm10, %v7434_v10, 0.0 }
 0xb1c   : > { %v7450_v17 = vadd.f32 %v7449_v34, %v7448_v25  ;;  %v10473_v28 = vadd.f32 %v10356_v38, %v7336_v60  ;;  %v7437_v15 = vmul.f32 %v10438_v7, %v10438_v7  ;;  %v7455_v46 = vsel %vm1038_vm10, %v7435_v61, 0.0 }
 0xb1d   : > { %v7375_v54 = vmax.f32 %v10468_v14, 0.0  ;;  %v7457_v19 = vsel %vm1038_vm10, %v7436_v2, 0.0  ;;  %v7364_v60 = vadd.f32 %v10356_v38, %v10397_v5 }
 0xb1e   : > { %v7452_v41 = vadd.f32 %v7451_v45, %v7450_v17  ;;  %v7376_v4 = vmax.f32 %v10473_v28, 0.0  ;;  %v7459_v11 = vsel %vm1038_vm10, %v7437_v15, 0.0 }
 0xb1f   : > { %v7239_v1 = vpop.f32.mrb[156].mxu1  ;;  %v7399_v30 = vsel %vm1038_vm10, %v7375_v54, 0.0 }
 0xb20   : > { %v7279_v0 = vpop.f32.mrb[164].mxu0  ;;  %v7454_v56 = vadd.f32 %v7453_v8, %v7452_v41  ;;  %v7337_v47 = vadd.f32 %v7239_v1, %v10345_v13  ;;  %v8785_v49 = vpop.f32.mrb[157].mxu1  ;;  %v7400_v40 = vadd.f32 %v7399_v30, %v7398_v6  ;;  %v7401_v23 = vsel %vm1038_vm10, %v7376_v4, 0.0 }
 0xb21   : > { %v7338_v12 = vadd.f32 %v7279_v0, %v10348_v35  ;;  %v8791_v18 = vpop.f32.mrb[165].mxu0  ;;  %v7242_v58 = vpop.f32.mrb[158].mxu1 }
 0xb22   : > { %v7282_v51 = vpop.f32.mrb[166].mxu0  ;;  %v7456_v26 = vadd.f32 %v7455_v46, %v7454_v56  ;;  %v7361_v32 = vadd.f32 %v10356_v38, %v7337_v47  ;;  %v8786_v13 = vpop.f32.mrb[159].mxu1  ;;  %v7402_v10 = vadd.f32 %v7401_v23, %v7400_v40  ;;  %v7380_v56 = vmax.f32 %v7364_v60, 0.0 }
 0xb23   : > { %v8792_v36 = vpop.f32.mrb[167].mxu0  ;;  %v10488_v35 = vpop.permute.xlu1 %7606  ;;  %v7362_v43 = vadd.f32 %v10356_v38, %v7338_v12 }
 0xb24   : > { %v7458_v16 = vadd.f32 %v7457_v19, %v7456_v26  ;;  %v7377_v25 = vmax.f32 %v7361_v32, 0.0  ;;  %v10495_v6 = vpop.permute.xlu0 %7717  ;;  %v7409_v18 = vsel %vm1038_vm10, %v7380_v56, 0.0 }
 0xb25   : > { %v7378_v53 = vmax.f32 %v7362_v43, 0.0 }
 0xb26   : > { %v7460_v34 = vadd.f32 %v7459_v11, %v7458_v16  ;;  %v7403_v50 = vsel %vm1038_vm10, %v7377_v25, 0.0 }
 0xb27   : > { %v7404_v27 = vadd.f32 %v7403_v50, %v7402_v10  ;;  %v7405_v29 = vsel %vm1038_vm10, %v7378_v53, 0.0  ;;  %v7319_v17 = vpop.f32.mrb[160].mxu1  ;;  %v10500_v41 = vpop.permute.xlu1 %7713 }
 0xb28   : > { %v7476_v61 = vmul.f32 0.125, %v7460_v34  ;;  %v7339_v45 = vadd.f32 %v7319_v17, %v10351_v31  ;;  %v8797_v14 = vpop.f32.mrb[161].mxu1  ;;  %v10504_v49 = vpop.permute.xlu0 %7725 }
 0xb29   : > { %v7406_v28 = vadd.f32 %v7405_v29, %v7404_v27  ;;  %v7322_v2 = vpop.f32.mrb[162].mxu1 }
 0xb2a   : > { %v7478_v8 = vadd.f32 1e-05, %v7476_v61  ;;  %v7363_v1 = vadd.f32 %v10356_v38, %v7339_v45  ;;  %v8798_v0 = vpop.f32.mrb[163].mxu1 }
 0xb2b   : > { %v10506_v5 = vpop.permute.xlu1 %7721 }
 0xb2c   : > { %8869 = vrsqrt.f32 %v7478_v8  ;;  %v7379_v47 = vmax.f32 %v7363_v1, 0.0  ;;  %v10509_v30 = vpop.permute.xlu0 %7733 }
 0xb2e   : > { %v7407_v12 = vsel %vm1038_vm10, %v7379_v47, 0.0 }
 0xb2f   : > { %v7408_v31 = vadd.f32 %v7407_v12, %v7406_v28  ;;  %v10511_v58 = vpop.permute.xlu1 %7729 }
 0xb31   : > { %v7410_v15 = vadd.f32 %v7409_v18, %v7408_v31 }
 0xb33   : > { %v7413_v46 = vmul.f32 0.125, %v7410_v15 }
 0xb35   : > { %v10515_v38 = vsub.f32 %v7373_v52, %v7413_v46  ;;  %v10519_v51 = vsub.f32 %v7374_v9, %v7413_v46  ;;  %v10521_v26 = vsub.f32 %v7375_v54, %v7413_v46  ;;  %v10523_v40 = vsub.f32 %v7376_v4, %v7413_v46 }
 0xb36   : > { %v8870_v23 = vpop.eup %8869  ;;  %v10525_v32 = vsub.f32 %v7377_v25, %v7413_v46  ;;  %v10527_v13 = vsub.f32 %v7378_v53, %v7413_v46  ;;  %v10529_v36 = vsub.f32 %v7379_v47, %v7413_v46  ;;  %v10531_v19 = vsub.f32 %v7380_v56, %v7413_v46 }
 0xb37   : > { %v7482_v44 = vmul.f32 %v8870_v23, %v10418_v55  ;;  %v7483_v42 = vmul.f32 %v8870_v23, %v10422_v37  ;;  %v7484_v52 = vmul.f32 %v8870_v23, %v10424_v33  ;;  %v7485_v9 = vmul.f32 %v8870_v23, %v10426_v3 }
 0xb38   : > { %v7486_v54 = vmul.f32 %v8870_v23, %v10432_v62  ;;  %v7487_v4 = vmul.f32 %v8870_v23, %v10434_v48  ;;  %v7488_v43 = vmul.f32 %v8870_v23, %v10436_v59  ;;  %v7489_v16 = vmul.f32 %v8870_v23, %v10438_v7  ;;  %v10555_v59 = vpop.permute.xlu0 %7741  ;;  %v10557_v7 = vpop.permute.xlu1 %7737 }
 0xb39   : > { %v7613_v10 = vmul.f32 %v10390_v63, %v7482_v44  ;;  %v7614_v25 = vmul.f32 %v10403_v24, %v7483_v42  ;;  %v7615_v55 = vmul.f32 %v10430_v39, %v7484_v52  ;;  %v7616_v37 = vmul.f32 %v10401_v22, %v7485_v9 }
 0xb3a   : > { %v7617_v33 = vmul.f32 %v10462_v21, %v7486_v54  ;;  %v7618_v3 = vmul.f32 %v10428_v20, %v7487_v4  ;;  %v7619_v62 = vmul.f32 %v10488_v35, %v7488_v43  ;;  %v7620_v48 = vmul.f32 %v10470_v57, %v7489_v16 }
 0xb3b   : > { %v7744_v11 = vadd.f32 %v10500_v41, %v7613_v10  ;;  %v7745_v53 = vadd.f32 %v10495_v6, %v7614_v25  ;;  %v7746_v34 = vadd.f32 %v10506_v5, %v7615_v55  ;;  %v7747_v50 = vadd.f32 %v10504_v49, %v7616_v37 }
 0xb3c   : > { %v7748_v27 = vadd.f32 %v10511_v58, %v7617_v33  ;;  %v7749_v29 = vadd.f32 %v10509_v30, %v7618_v3  ;;  %v7750_v17 = vadd.f32 %v10557_v7, %v7619_v62  ;;  %v7751_v60 = vadd.f32 %v10555_v59, %v7620_v48 }
 0xb3d   : > { %7760 = vst.msk [vmem:[%s10549_s27] sm:$0xff] %vm1038_vm10, %v7744_v11  ;;  %7761 = vst.msk [vmem:[%s10549_s27 + $0x8] sm:$0xff] %vm1038_vm10, %v7745_v53  ;;  %v7438_v61 = vmul.f32 %v10515_v38, %v10515_v38  ;;  %v7439_v45 = vmul.f32 %v10519_v51, %v10519_v51  ;;  %v7440_v14 = vmul.f32 %v10521_v26, %v10521_v26 }
 0xb3e   : > { %7762 = vst.msk [vmem:[%s10549_s27 + $0x10] sm:$0xff] %vm1038_vm10, %v7746_v34  ;;  %7763 = vst.msk [vmem:[%s10549_s27 + $0x18] sm:$0xff] %vm1038_vm10, %v7747_v50  ;;  %v7441_v28 = vmul.f32 %v10523_v40, %v10523_v40  ;;  %v7442_v0 = vmul.f32 %v10525_v32, %v10525_v32  ;;  %v7443_v12 = vmul.f32 %v10527_v13, %v10527_v13 }
 0xb3f   : > { %7764 = vst.msk [vmem:[%s10549_s27 + $0x20] sm:$0xff] %vm1038_vm10, %v7748_v27  ;;  %7765 = vst.msk [vmem:[%s10549_s27 + $0x28] sm:$0xff] %vm1038_vm10, %v7749_v29  ;;  %v7461_v2 = vsel %vm1038_vm10, %v7438_v61, 0.0  ;;  %v7462_v8 = vsel %vm1038_vm10, %v7439_v45, 0.0  ;;  %v7464_v56 = vsel %vm1038_vm10, %v7440_v14, 0.0  ;;  %v7444_v15 = vmul.f32 %v10529_v36, %v10529_v36 }
 0xb40   : > { %7767 = vst.msk [vmem:[%s10549_s27 + $0x38] sm:$0xff] %vm1038_vm10, %v7751_v60  ;;  %7766 = vst.msk [vmem:[%s10549_s27 + $0x30] sm:$0xff] %vm1038_vm10, %v7750_v17  ;;  %v7463_v1 = vadd.f32 %v7462_v8, %v7461_v2  ;;  %v7466_v31 = vsel %vm1038_vm10, %v7441_v28, 0.0  ;;  %v7468_v46 = vsel %vm1038_vm10, %v7442_v0, 0.0  ;;  %v7445_v44 = vmul.f32 %v10531_v19, %v10531_v19 }
 0xb41   : > { %v7470_v42 = vsel %vm1038_vm10, %v7443_v12, 0.0  ;;  %v7472_v9 = vsel %vm1038_vm10, %v7444_v15, 0.0 }
 0xb42   : > { %v7465_v47 = vadd.f32 %v7464_v56, %v7463_v1  ;;  %v7474_v4 = vsel %vm1038_vm10, %v7445_v44, 0.0 }
 0xb44   : > { %v7467_v18 = vadd.f32 %v7466_v31, %v7465_v47 }
 0xb46   : > { %v7469_v23 = vadd.f32 %v7468_v46, %v7467_v18 }
 0xb48   : > { %v7471_v52 = vadd.f32 %v7470_v42, %v7469_v23 }
 0xb4a   : > { %v7473_v54 = vadd.f32 %v7472_v9, %v7471_v52 }
 0xb4c   : > { %v7475_v43 = vadd.f32 %v7474_v4, %v7473_v54 }
 0xb4e   : > { %v7477_v16 = vmul.f32 0.125, %v7475_v43 }
 0xb50   : > { %v7479_v10 = vadd.f32 1e-05, %v7477_v16 }
 0xb52   : > { %8871 = vrsqrt.f32 %v7479_v10 }
 0xb5c   : > { %v8872_v25 = vpop.eup %8871 }
 0xb5d   : > { %v7490_v55 = vmul.f32 %v8872_v25, %v10515_v38  ;;  %v7491_v37 = vmul.f32 %v8872_v25, %v10519_v51  ;;  %v7492_v33 = vmul.f32 %v8872_v25, %v10521_v26  ;;  %v7493_v3 = vmul.f32 %v8872_v25, %v10523_v40 }
 0xb5e   : > { %v7494_v62 = vmul.f32 %v8872_v25, %v10525_v32  ;;  %v7495_v48 = vmul.f32 %v8872_v25, %v10527_v13  ;;  %v7496_v11 = vmul.f32 %v8872_v25, %v10529_v36  ;;  %v7497_v53 = vmul.f32 %v8872_v25, %v10531_v19 }
 0xb5f   : > { %v7621_v34 = vmul.f32 %v10390_v63, %v7490_v55  ;;  %v7622_v50 = vmul.f32 %v10403_v24, %v7491_v37  ;;  %v7623_v38 = vmul.f32 %v10430_v39, %v7492_v33  ;;  %v7624_v51 = vmul.f32 %v10401_v22, %v7493_v3 }
 0xb60   : > { %v7625_v26 = vmul.f32 %v10462_v21, %v7494_v62  ;;  %v7626_v40 = vmul.f32 %v10428_v20, %v7495_v48  ;;  %v7627_v32 = vmul.f32 %v10488_v35, %v7496_v11  ;;  %v7628_v63 = vmul.f32 %v10470_v57, %v7497_v53 }
 0xb61   : > { %v7752_v24 = vadd.f32 %v10500_v41, %v7621_v34  ;;  %v7753_v39 = vadd.f32 %v10495_v6, %v7622_v50  ;;  %v7754_v13 = vadd.f32 %v10506_v5, %v7623_v38  ;;  %v7755_v22 = vadd.f32 %v10504_v49, %v7624_v51 }
 0xb62   : > { %v7756_v21 = vadd.f32 %v10511_v58, %v7625_v26  ;;  %v7757_v36 = vadd.f32 %v10509_v30, %v7626_v40  ;;  %v7758_v20 = vadd.f32 %v10557_v7, %v7627_v32  ;;  %v7759_v35 = vadd.f32 %v10555_v59, %v7628_v63 }
 0xb63   : > { %7768 = vst.msk [vmem:[%s10549_s27 + $0x40] sm:$0xff] %vm1038_vm10, %v7752_v24  ;;  %7769 = vst.msk [vmem:[%s10549_s27 + $0x48] sm:$0xff] %vm1038_vm10, %v7753_v39 }
 0xb64   : > { %7770 = vst.msk [vmem:[%s10549_s27 + $0x50] sm:$0xff] %vm1038_vm10, %v7754_v13  ;;  %7771 = vst.msk [vmem:[%s10549_s27 + $0x58] sm:$0xff] %vm1038_vm10, %v7755_v22 }
 0xb65   : > { %7772 = vst.msk [vmem:[%s10549_s27 + $0x60] sm:$0xff] %vm1038_vm10, %v7756_v21  ;;  %7773 = vst.msk [vmem:[%s10549_s27 + $0x68] sm:$0xff] %vm1038_vm10, %v7757_v36 }
 0xb66   : > { %7774 = vst.msk [vmem:[%s10549_s27 + $0x70] sm:$0xff] %vm1038_vm10, %v7758_v20  ;;  %7775 = vst.msk [vmem:[%s10549_s27 + $0x78] sm:$0xff] %vm1038_vm10, %v7759_v35 }
 0xb67 PF: > { %s29_s0 = sadd.s32 1, %s8911_s0  }
 0xb68   : > { %p26_p4 = scmp.ge.s32.totalorder %s29_s0, 4  }
 0xb6a   :  { %28 = sbr.rel (!%p26_p4) target bundleno = 5 (0x5), region = 130 }

</bundles_post_ra>
